<compile_context>
chip_gen: v6e
topology: v6e:2x2x1
jax: 0.10.0
libtpu: 0.0.40
codegen_flags: <defaults>
</compile_context>

<pallas_src>
import functools

import jax
import jax.numpy as jnp
from jax.experimental import pallas as pl
from jax.experimental.pallas import tpu as pltpu


def _round_up(x, m):
    return ((x + m - 1) // m) * m


# ---------------------------------------------------------------------------
# Fused kernel:  per-phase matmul (MXU, bf16 in / f32 acc)
#              + BatchNorm batch-stat accumulation (VMEM scratch)
#              + finalize: normalize (+gamma/beta) + LeakyReLU in place on the
#                VMEM-resident output, written back to HBM once at the end.
# Grid = (phase, m_tile), both "arbitrary" (stats span the whole grid).
# ---------------------------------------------------------------------------
def _fused_deconv_bn_lrelu_kernel(a_ref, b_ref, gamma_ref, beta_ref, o_ref,
                                  sum_sc, sq_sc,
                                  *, cout, tm, m_pad, inv_count, eps, slope):
    p = pl.program_id(0)
    i = pl.program_id(1)
    nph = pl.num_programs(0)
    m_tiles = pl.num_programs(1)

    @pl.when(jnp.logical_and(p == 0, i == 0))
    def _init():
        sum_sc[...] = jnp.zeros_like(sum_sc)
        sq_sc[...] = jnp.zeros_like(sq_sc)

    # (tm, Kdim) bf16 @ (Kdim, Cpad) bf16 -> (tm, Cpad) f32 on the MXU.
    y = jnp.dot(a_ref[0], b_ref[0], preferred_element_type=jnp.float32)

    # Fused batch statistics (zero pad rows / pad columns contribute 0).
    sum_sc[...] += jnp.sum(y, axis=0, keepdims=True)
    sq_sc[...] += jnp.sum(y * y, axis=0, keepdims=True)

    # Stash the raw conv tile into the VMEM-resident output; only the real
    # Cout columns exist there, so the single HBM writeback is Cout wide.
    row0 = pl.multiple_of(p * m_pad + i * tm, tm)
    o_ref[pl.ds(row0, tm), :] = y[:, :cout]

    # Finalize on the very last grid step: fold stats + gamma/beta into one
    # scale/shift, then normalize + LeakyReLU the whole resident block.
    @pl.when(jnp.logical_and(p == nph - 1, i == m_tiles - 1))
    def _finalize():
        mean = sum_sc[...] * inv_count                          # (1, Cpad)
        var = jnp.maximum(sq_sc[...] * inv_count - mean * mean, 0.0)
        inv_std = jax.lax.rsqrt(var + eps)
        scale = gamma_ref[...] * inv_std
        shift = beta_ref[...] - mean * scale
        z = o_ref[...] * scale[:, :cout] + shift[:, :cout]
        o_ref[...] = jnp.where(z >= 0, z, slope * z)


# ---------------------------------------------------------------------------
# Phase geometry for the sub-pixel decomposition (all static Python ints).
# Output positions of phase r along one axis:  o = q*stride + r - padding,
# with q in [qlo, qlo + nq).  Tap t (kernel index k = r + t*stride) reads
# input index q - t; the input is padded so every read is in range.
# ---------------------------------------------------------------------------
def _phase_axis_geometry(in_size, out_size, stride, padding, r, T):
    qlo = -((r - padding) // stride)                 # ceil((padding - r)/stride)
    qhi = (out_size - 1 + padding - r) // stride
    nq = qhi - qlo + 1
    pad_front = max(0, (T - 1) - qlo)
    pad_back = max(0, qhi - (in_size - 1))
    return qlo, nq, pad_front, pad_back


# ---------------------------------------------------------------------------
# Module forward: ConvTranspose2d(stride, padding) -> BatchNorm2d -> LeakyReLU
# x: [N, Cin, H, W] (NCHW);  w: [Cin, Cout, K, K] (PyTorch ConvTranspose2d)
# ---------------------------------------------------------------------------
def conv_transpose_bn_lrelu(x, w, b, gamma, beta, *, stride, padding,
                            eps=1e-5, slope=0.01):
    # NOTE: the deconv bias `b` cancels exactly under train-mode BatchNorm
    # ((y + b) - mean(y + b) == y - mean(y)), so it never touches the data.
    N, Cin, H, W = x.shape
    _, Cout, K, _ = w.shape
    OH = (H - 1) * stride - 2 * padding + K
    OW = (W - 1) * stride - 2 * padding + K

    T = -(-K // stride)                  # taps per axis per phase = ceil(K/stride)
    Kdim = T * T * Cin
    LANES = 128
    Cpad = _round_up(Cout, LANES)        # lane-dense matmul columns (VMEM only)

    x_nhwc = jnp.transpose(x, (0, 2, 3, 1)).astype(jnp.float32)

    # ---- static per-phase geometry -----------------------------------------
    phases = []
    for rh in range(stride):
        for rw in range(stride):
            qlo_h, nq_h, pf_h, pb_h = _phase_axis_geometry(H, OH, stride, padding, rh, T)
            qlo_w, nq_w, pf_w, pb_w = _phase_axis_geometry(W, OW, stride, padding, rw, T)
            assert nq_h > 0 and nq_w > 0
            phases.append(dict(rh=rh, rw=rw,
                               qlo_h=qlo_h, nq_h=nq_h, pf_h=pf_h, pb_h=pb_h,
                               qlo_w=qlo_w, nq_w=nq_w, pf_w=pf_w, pb_w=pb_w,
                               oh0=qlo_h * stride + rh - padding,
                               ow0=qlo_w * stride + rw - padding))
    nph = len(phases)

    # Uniform layout: every phase owns (OH/stride, OW/stride) pixels and phase
    # offsets tile {0..stride-1}^2 -> de-interleave is one reshape/transpose.
    offs = sorted((ph["oh0"], ph["ow0"]) for ph in phases)
    uniform = (OH % stride == 0 and OW % stride == 0
               and all(ph["nq_h"] == OH // stride and ph["nq_w"] == OW // stride
                       for ph in phases)
               and offs == [(mh, mw) for mh in range(stride) for mw in range(stride)])
    if uniform:
        phases.sort(key=lambda ph: (ph["oh0"], ph["ow0"]))   # p = oh0*stride + ow0

    m_sizes = [N * ph["nq_h"] * ph["nq_w"] for ph in phases]
    M_max = max(m_sizes)
    # Sweep tm to minimize zero-row pad waste; prefer larger tm on ties.
    cands = [256, 512, 1024]
    if M_max <= 2048:
        cands.append(_round_up(M_max, 8))
    tm = min(cands, key=lambda t: (_round_up(M_max, t), -t))
    M_pad = _round_up(M_max, tm)
    m_tiles = M_pad // tm

    # ---- per-phase im2col patches + sub-kernel matrices (JAX glue) ----------
    pf_h_max = max(ph["pf_h"] for ph in phases)
    pb_h_max = max(ph["pb_h"] for ph in phases)
    pf_w_max = max(ph["pf_w"] for ph in phases)
    pb_w_max = max(ph["pb_w"] for ph in phases)
    xp = jnp.pad(x_nhwc, ((0, 0), (pf_h_max, pb_h_max), (pf_w_max, pb_w_max), (0, 0)))

    a_list, b_list = [], []
    for ph in phases:
        pats, wmats = [], []
        for th in range(T):
            oh_off = ph["qlo_h"] - th + pf_h_max
            for tw in range(T):
                ow_off = ph["qlo_w"] - tw + pf_w_max
                pats.append(xp[:, oh_off:oh_off + ph["nq_h"],
                               ow_off:ow_off + ph["nq_w"], :])
                kh = ph["rh"] + th * stride
                kw = ph["rw"] + tw * stride
                if kh < K and kw < K:
                    wmats.append(w[:, :, kh, kw].astype(jnp.float32))   # [Cin, Cout]
                else:
                    wmats.append(jnp.zeros((Cin, Cout), jnp.float32))
        m_ph = N * ph["nq_h"] * ph["nq_w"]
        a_ph = jnp.stack(pats, axis=3).reshape(m_ph, Kdim)
        a_ph = jnp.pad(a_ph, ((0, M_pad - m_ph), (0, 0)))               # zero rows
        b_ph = jnp.stack(wmats, axis=0).reshape(Kdim, Cout)
        b_ph = jnp.pad(b_ph, ((0, 0), (0, Cpad - Cout)))                # zero cols
        a_list.append(a_ph)
        b_list.append(b_ph)

    a_all = jnp.stack(a_list, axis=0).astype(jnp.bfloat16)   # [nph, M_pad, Kdim]
    b_all = jnp.stack(b_list, axis=0).astype(jnp.bfloat16)   # [nph, Kdim, Cpad]
    gamma_p = jnp.pad(gamma.astype(jnp.float32), (0, Cpad - Cout)).reshape(1, Cpad)
    beta_p = jnp.pad(beta.astype(jnp.float32), (0, Cpad - Cout)).reshape(1, Cpad)

    count = float(N * OH * OW)            # zero pad rows add 0 to the fused sums
    inv_count = 1.0 / count

    # ---- VMEM budget (lane-padded; resident output budgeted 2x) -------------
    vmem_est = (2 * nph * M_pad * max(Cpad, 128) * 4          # resident y/z
                + 2 * tm * _round_up(Kdim, 128) * 2           # A double-buffer
                + 2 * _round_up(Kdim, 16) * Cpad * 2          # B double-buffer
                + 4 * 8 * Cpad * 4 + 2 * 8 * Cpad * 4)        # gamma/beta + stats
    # Gate against v7x (64 MiB physical VMEM; 32 MiB scoped default).
    assert vmem_est < 48 * 1024 * 1024, (
        "fused VMEM-resident path too large for VMEM; see TODO(synk) fallback")
    vmem_limit = int(min(56 * 1024 * 1024, max(16 * 1024 * 1024, 2 * vmem_est)))

    # ---- single fused Pallas call -------------------------------------------
    kern = functools.partial(_fused_deconv_bn_lrelu_kernel,
                             cout=Cout, tm=tm, m_pad=M_pad,
                             inv_count=inv_count, eps=float(eps), slope=float(slope))
    z_all = pl.pallas_call(
        kern,
        out_shape=jax.ShapeDtypeStruct((nph * M_pad, Cout), jnp.float32),
        grid=(nph, m_tiles),
        in_specs=[
            pl.BlockSpec((1, tm, Kdim), lambda p, i: (p, i, 0)),
            pl.BlockSpec((1, Kdim, Cpad), lambda p, i: (p, 0, 0)),
            pl.BlockSpec((1, Cpad), lambda p, i: (0, 0)),
            pl.BlockSpec((1, Cpad), lambda p, i: (0, 0)),
        ],
        # Constant index map -> output stays VMEM-resident for the whole grid
        # and is written to HBM exactly once, after the finalize step.
        out_specs=pl.BlockSpec((nph * M_pad, Cout), lambda p, i: (0, 0)),
        scratch_shapes=[pltpu.VMEM((1, Cpad), jnp.float32),
                        pltpu.VMEM((1, Cpad), jnp.float32)],
        compiler_params=pltpu.CompilerParams(
            # Both axes "arbitrary": the stats and the resident output span
            # the whole grid (per-core partial stats would be needed for v7x
            # megacore parallelism; see TODO(synk)).
            dimension_semantics=("arbitrary", "arbitrary"),
            vmem_limit_bytes=vmem_limit),
    )(a_all, b_all, gamma_p, beta_p)

    z3 = z_all.reshape(nph, M_pad, Cout)

    # ---- de-interleave the sub-pixel phases ---------------------------------
    if uniform:
        nq_h, nq_w = OH // stride, OW // stride
        z6 = z3[:, :N * nq_h * nq_w, :].reshape(stride, stride, N, nq_h, nq_w, Cout)
        out_nhwc = jnp.transpose(z6, (2, 3, 0, 4, 1, 5)).reshape(N, OH, OW, Cout)
    else:
        out_nhwc = jnp.zeros((N, OH, OW, Cout), jnp.float32)
        for p_idx, ph in enumerate(phases):
            m_ph = N * ph["nq_h"] * ph["nq_w"]
            img = z3[p_idx, :m_ph, :].reshape(N, ph["nq_h"], ph["nq_w"], Cout)
            out_nhwc = out_nhwc.at[:, ph["oh0"]::stride, ph["ow0"]::stride, :].set(img)

    return jnp.transpose(out_nhwc, (0, 3, 1, 2)).astype(x.dtype)


# ---------------------------------------------------------------------------
# Pure-JAX reference (independent scatter-add formulation) for self-check.
# ---------------------------------------------------------------------------
def _reference(x, w, b, gamma, beta, *, stride, padding, eps=1e-5, slope=0.01):
    N, Cin, H, W = x.shape
    _, Cout, K, _ = w.shape
    OH = (H - 1) * stride - 2 * padding + K
    OW = (W - 1) * stride - 2 * padding + K
    full = jnp.zeros((N, Cout, (H - 1) * stride + K, (W - 1) * stride + K), jnp.float32)
    for kh in range(K):
        for kw in range(K):
            contrib = jnp.einsum('nchw,co->nohw', x, w[:, :, kh, kw],
                                 precision=jax.lax.Precision.HIGHEST)
            full = full.at[:, :, kh:kh + (H - 1) * stride + 1:stride,
                                 kw:kw + (W - 1) * stride + 1:stride].add(contrib)
    conv = full[:, :, padding:padding + OH, padding:padding + OW] + b[None, :, None, None]
    mean = conv.mean(axis=(0, 2, 3), keepdims=True)
    var = ((conv - mean) ** 2).mean(axis=(0, 2, 3), keepdims=True)
    z = (conv - mean) * jax.lax.rsqrt(var + eps)
    z = z * gamma[None, :, None, None] + beta[None, :, None, None]
    return jnp.where(z >= 0, z, slope * z)


if __name__ == "__main__":
    # Module config: ConvTranspose2DBatchNormRelu(in=4, out=8, kernel=4, stride=2, padding=1)
    N, Cin, Cout, K, stride, padding = 2, 4, 8, 4, 2, 1
    H = W = 16

    key = jax.random.PRNGKey(0)
    kx, kw, kb, kg, kbt = jax.random.split(key, 5)
    # Pre-round x / w to bf16-representable f32 so the bf16 MXU path is exact
    # and the f32 reference comparison stays tight.
    x = jax.random.normal(kx, (N, Cin, H, W), jnp.float32)
    x = x.astype(jnp.bfloat16).astype(jnp.float32)
    w = 0.1 * jax.random.normal(kw, (Cin, Cout, K, K), jnp.float32)
    w = w.astype(jnp.bfloat16).astype(jnp.float32)
    b = 0.1 * jax.random.normal(kb, (Cout,), jnp.float32)
    gamma = 1.0 + 0.1 * jax.random.normal(kg, (Cout,), jnp.float32)
    beta = 0.1 * jax.random.normal(kbt, (Cout,), jnp.float32)

    out = conv_transpose_bn_lrelu(x, w, b, gamma, beta, stride=stride, padding=padding)
    out = jax.block_until_ready(out)

    ref = _reference(x, w, b, gamma, beta, stride=stride, padding=padding)
    assert out.shape == (N, Cout, 32, 32), out.shape
    err = float(jnp.abs(out - ref).max())
    assert jnp.allclose(out, ref, atol=1e-3, rtol=1e-3), err

    print("KERNEL_OK")
</pallas_src>

<mosaic_0001>
module attributes {stable_mosaic.version = 11 : i64} {
  func.func @_fused_deconv_bn_lrelu_kernel(%arg0: i32, %arg1: i32, %arg2: memref<1x512x16xbf16, #tpu.memory_space<vmem>>, %arg3: memref<1x16x128xbf16, #tpu.memory_space<vmem>>, %arg4: memref<1x128xf32, #tpu.memory_space<vmem>>, %arg5: memref<1x128xf32, #tpu.memory_space<vmem>>, %arg6: memref<2048x8xf32, #tpu.memory_space<vmem>>, %arg7: memref<1x128xf32, #tpu.memory_space<vmem>>, %arg8: memref<1x128xf32, #tpu.memory_space<vmem>>) attributes {dimension_semantics = [#tpu.dimension_semantics<arbitrary>, #tpu.dimension_semantics<arbitrary>], iteration_bounds = array<i64: 4, 1>, scalar_prefetch = 0 : i64, scratch_operands = 2 : i64, tpu.core_type = #tpu.core_type<tc>, window_params = [{transform_indices = @transform_0, window_bounds = array<i64: 1, 512, 16>}, {transform_indices = @transform_1, window_bounds = array<i64: 1, 16, 128>}, {pipeline_mode = #tpu.pipeline_mode<synchronous>, transform_indices = @transform_2, window_bounds = array<i64: 1, 128>}, {pipeline_mode = #tpu.pipeline_mode<synchronous>, transform_indices = @transform_3, window_bounds = array<i64: 1, 128>}, {pipeline_mode = #tpu.pipeline_mode<synchronous>, transform_indices = @transform_4, window_bounds = array<i64: 2048, 8>}]} {
    %c0_i32 = arith.constant 0 : i32
    %0 = arith.cmpi eq, %arg0, %c0_i32 : i32
    %c0_i32_0 = arith.constant 0 : i32
    %1 = arith.cmpi eq, %arg1, %c0_i32_0 : i32
    %2 = arith.andi %0, %1 : i1
    %3 = arith.extui %2 : i1 to i32
    %c0_i32_1 = arith.constant 0 : i32
    %4 = arith.cmpi ne, %3, %c0_i32_1 : i32
    scf.if %4 {
      %cst_21 = arith.constant 0.000000e+00 : f32
      %33 = vector.broadcast %cst_21 : f32 to vector<1x128xf32>
      %c0_22 = arith.constant 0 : index
      %c0_23 = arith.constant 0 : index
      %34 = vector.load %arg7[%c0_22, %c0_23] : memref<1x128xf32, #tpu.memory_space<vmem>>, vector<1x128xf32>
      tpu.vector_store %arg7[%c0_22, %c0_23], %33 {strides = array<i32>} : memref<1x128xf32, #tpu.memory_space<vmem>>, vector<1x128xf32>,
      %cst_24 = arith.constant 0.000000e+00 : f32
      %35 = vector.broadcast %cst_24 : f32 to vector<1x128xf32>
      %c0_25 = arith.constant 0 : index
      %c0_26 = arith.constant 0 : index
      %36 = vector.load %arg8[%c0_25, %c0_26] : memref<1x128xf32, #tpu.memory_space<vmem>>, vector<1x128xf32>
      tpu.vector_store %arg8[%c0_25, %c0_26], %35 {strides = array<i32>} : memref<1x128xf32, #tpu.memory_space<vmem>>, vector<1x128xf32>,
    } else {
    }
    %c0 = arith.constant 0 : index
    %c0_2 = arith.constant 0 : index
    %c0_3 = arith.constant 0 : index
    %5 = vector.load %arg2[%c0, %c0_2, %c0_3] : memref<1x512x16xbf16, #tpu.memory_space<vmem>>, vector<1x512x16xbf16>
    %6 = vector.shape_cast %5 : vector<1x512x16xbf16> to vector<512x16xbf16>
    %c0_4 = arith.constant 0 : index
    %c0_5 = arith.constant 0 : index
    %c0_6 = arith.constant 0 : index
    %7 = vector.load %arg3[%c0_4, %c0_5, %c0_6] : memref<1x16x128xbf16, #tpu.memory_space<vmem>>, vector<1x16x128xbf16>
    %8 = vector.shape_cast %7 : vector<1x16x128xbf16> to vector<16x128xbf16>
    %cst = arith.constant dense<0.000000e+00> : vector<512x128xf32>
    %9 = tpu.matmul %6, %8, %cst {dimension_numbers = #tpu.dot_dimension_numbers<[1], [0], [0], [1], [0, 0, 1, 1], [], []>} : vector<512x16xbf16>, vector<16x128xbf16>, vector<512x128xf32> -> vector<512x128xf32>
    %c0_7 = arith.constant 0 : index
    %c0_8 = arith.constant 0 : index
    %10 = vector.load %arg7[%c0_7, %c0_8] : memref<1x128xf32, #tpu.memory_space<vmem>>, vector<1x128xf32>
    %cst_9 = arith.constant dense<0.000000e+00> : vector<128xf32>
    %11 = vector.multi_reduction <add>, %9, %cst_9 [0] : vector<512x128xf32> to vector<128xf32>
    %12 = vector.shape_cast %11 : vector<128xf32> to vector<1x128xf32>
    %13 = arith.addf %10, %12 : vector<1x128xf32>
    %c0_10 = arith.constant 0 : index
    %c0_11 = arith.constant 0 : index
    %14 = vector.load %arg7[%c0_10, %c0_11] : memref<1x128xf32, #tpu.memory_space<vmem>>, vector<1x128xf32>
    tpu.vector_store %arg7[%c0_10, %c0_11], %13 {strides = array<i32>} : memref<1x128xf32, #tpu.memory_space<vmem>>, vector<1x128xf32>,
    %c0_12 = arith.constant 0 : index
    %c0_13 = arith.constant 0 : index
    %15 = vector.load %arg8[%c0_12, %c0_13] : memref<1x128xf32, #tpu.memory_space<vmem>>, vector<1x128xf32>
    %16 = arith.mulf %9, %9 : vector<512x128xf32>
    %cst_14 = arith.constant dense<0.000000e+00> : vector<128xf32>
    %17 = vector.multi_reduction <add>, %16, %cst_14 [0] : vector<512x128xf32> to vector<128xf32>
    %18 = vector.shape_cast %17 : vector<128xf32> to vector<1x128xf32>
    %19 = arith.addf %15, %18 : vector<1x128xf32>
    %c0_15 = arith.constant 0 : index
    %c0_16 = arith.constant 0 : index
    %20 = vector.load %arg8[%c0_15, %c0_16] : memref<1x128xf32, #tpu.memory_space<vmem>>, vector<1x128xf32>
    tpu.vector_store %arg8[%c0_15, %c0_16], %19 {strides = array<i32>} : memref<1x128xf32, #tpu.memory_space<vmem>>, vector<1x128xf32>,
    %c512_i32 = arith.constant 512 : i32
    %21 = arith.muli %arg0, %c512_i32 : i32
    %c512_i32_17 = arith.constant 512 : i32
    %22 = arith.muli %arg1, %c512_i32_17 : i32
    %23 = arith.addi %21, %22 : i32
    %24 = tpu.assume_multiple %23, 512 : i32
    %25 = vector.extract_strided_slice %9 {offsets = [0, 0], sizes = [512, 8], strides = [1, 1]} : vector<512x128xf32> to vector<512x8xf32>
    %26 = arith.index_cast %24 : i32 to index
    %c0_18 = arith.constant 0 : index
    %27 = vector.load %arg6[%26, %c0_18] : memref<2048x8xf32, #tpu.memory_space<vmem>>, vector<512x8xf32>
    tpu.vector_store %arg6[%26, %c0_18], %25 {strides = array<i32>} : memref<2048x8xf32, #tpu.memory_space<vmem>>, vector<512x8xf32>,
    %c3_i32 = arith.constant 3 : i32
    %28 = arith.cmpi eq, %arg0, %c3_i32 : i32
    %c0_i32_19 = arith.constant 0 : i32
    %29 = arith.cmpi eq, %arg1, %c0_i32_19 : i32
    %30 = arith.andi %28, %29 : i1
    %31 = arith.extui %30 : i1 to i32
    %c0_i32_20 = arith.constant 0 : i32
    %32 = arith.cmpi ne, %31, %c0_i32_20 : i32
    scf.if %32 {
      %c0_21 = arith.constant 0 : index
      %c0_22 = arith.constant 0 : index
      %33 = vector.load %arg7[%c0_21, %c0_22] : memref<1x128xf32, #tpu.memory_space<vmem>>, vector<1x128xf32>
      %cst_23 = arith.constant 4.8828125E-4 : f32
      %34 = vector.broadcast %cst_23 : f32 to vector<1x128xf32>
      %35 = arith.mulf %33, %34 : vector<1x128xf32>
      %c0_24 = arith.constant 0 : index
      %c0_25 = arith.constant 0 : index
      %36 = vector.load %arg8[%c0_24, %c0_25] : memref<1x128xf32, #tpu.memory_space<vmem>>, vector<1x128xf32>
      %cst_26 = arith.constant 4.8828125E-4 : f32
      %37 = vector.broadcast %cst_26 : f32 to vector<1x128xf32>
      %38 = arith.mulf %36, %37 : vector<1x128xf32>
      %39 = arith.mulf %35, %35 : vector<1x128xf32>
      %40 = arith.subf %38, %39 : vector<1x128xf32>
      %cst_27 = arith.constant 0.000000e+00 : f32
      %41 = vector.broadcast %cst_27 : f32 to vector<1x128xf32>
      %42 = arith.maximumf %40, %41 : vector<1x128xf32>
      %cst_28 = arith.constant 9.99999974E-6 : f32
      %43 = vector.broadcast %cst_28 : f32 to vector<1x128xf32>
      %44 = arith.addf %42, %43 : vector<1x128xf32>
      %45 = math.rsqrt %44 : vector<1x128xf32>
      %c0_29 = arith.constant 0 : index
      %c0_30 = arith.constant 0 : index
      %46 = vector.load %arg4[%c0_29, %c0_30] : memref<1x128xf32, #tpu.memory_space<vmem>>, vector<1x128xf32>
      %47 = arith.mulf %46, %45 : vector<1x128xf32>
      %c0_31 = arith.constant 0 : index
      %c0_32 = arith.constant 0 : index
      %48 = vector.load %arg5[%c0_31, %c0_32] : memref<1x128xf32, #tpu.memory_space<vmem>>, vector<1x128xf32>
      %49 = arith.mulf %35, %47 : vector<1x128xf32>
      %50 = arith.subf %48, %49 : vector<1x128xf32>
      %c0_33 = arith.constant 0 : index
      %c0_34 = arith.constant 0 : index
      %51 = vector.load %arg6[%c0_33, %c0_34] : memref<2048x8xf32, #tpu.memory_space<vmem>>, vector<2048x8xf32>
      %52 = vector.extract_strided_slice %47 {offsets = [0, 0], sizes = [1, 8], strides = [1, 1]} : vector<1x128xf32> to vector<1x8xf32>
      %53 = vector.broadcast %52 : vector<1x8xf32> to vector<2048x8xf32>
      %54 = arith.mulf %51, %53 : vector<2048x8xf32>
      %55 = vector.extract_strided_slice %50 {offsets = [0, 0], sizes = [1, 8], strides = [1, 1]} : vector<1x128xf32> to vector<1x8xf32>
      %56 = vector.broadcast %55 : vector<1x8xf32> to vector<2048x8xf32>
      %57 = arith.addf %54, %56 : vector<2048x8xf32>
      %cst_35 = arith.constant 0.000000e+00 : f32
      %58 = vector.broadcast %cst_35 : f32 to vector<2048x8xf32>
      %59 = arith.cmpf oge, %57, %58 : vector<2048x8xf32>
      %cst_36 = arith.constant 0.00999999977 : f32
      %60 = vector.broadcast %cst_36 : f32 to vector<2048x8xf32>
      %61 = arith.mulf %60, %57 : vector<2048x8xf32>
      %62 = arith.select %59, %57, %61 : vector<2048x8xi1>, vector<2048x8xf32>
      %c0_37 = arith.constant 0 : index
      %c0_38 = arith.constant 0 : index
      %63 = vector.load %arg6[%c0_37, %c0_38] : memref<2048x8xf32, #tpu.memory_space<vmem>>, vector<2048x8xf32>
      tpu.vector_store %arg6[%c0_37, %c0_38], %62 {strides = array<i32>} : memref<2048x8xf32, #tpu.memory_space<vmem>>, vector<2048x8xf32>,
    } else {
    }
    return
  }
  func.func @transform_0(%arg0: i32, %arg1: i32) -> (i32, i32, i32) {
    %c0_i32 = arith.constant 0 : i32
    %c0_i32_0 = arith.constant 0 : i32
    return %arg0, %arg1, %c0_i32 : i32, i32, i32
  }
  func.func @transform_1(%arg0: i32, %arg1: i32) -> (i32, i32, i32) {
    %c0_i32 = arith.constant 0 : i32
    %c0_i32_0 = arith.constant 0 : i32
    %c0_i32_1 = arith.constant 0 : i32
    return %arg0, %c0_i32, %c0_i32_0 : i32, i32, i32
  }
  func.func @transform_2(%arg0: i32, %arg1: i32) -> (i32, i32) {
    %c0_i32 = arith.constant 0 : i32
    %c0_i32_0 = arith.constant 0 : i32
    %c0_i32_1 = arith.constant 0 : i32
    return %c0_i32, %c0_i32_0 : i32, i32
  }
  func.func @transform_3(%arg0: i32, %arg1: i32) -> (i32, i32) {
    %c0_i32 = arith.constant 0 : i32
    %c0_i32_0 = arith.constant 0 : i32
    %c0_i32_1 = arith.constant 0 : i32
    return %c0_i32, %c0_i32_0 : i32, i32
  }
  func.func @transform_4(%arg0: i32, %arg1: i32) -> (i32, i32) {
    %c0_i32 = arith.constant 0 : i32
    %c0_i32_0 = arith.constant 0 : i32
    %c0_i32_1 = arith.constant 0 : i32
    return %c0_i32, %c0_i32_0 : i32, i32
  }
}

</mosaic_0001>

<bundles_post_ra>
// kernel: tpu_custom_call.1
= control target key start
LH: loop header
LB: loop body
LE: loop exit
PB: predicated region body
PF: predicated region fallthrough
CT: control target
= control target key end

     0   :  { %s3309_s15 = smov 0   ;;  %s3311_s16 = smov 0   ;;  %s6059_s0 = inlined_call_operand.vmem [shape: bf16[4,512,16], index: 0, kind: input, shape index: {}]   ;;  %s6060_s1 = inlined_call_operand.vmem [shape: bf16[4,16,128], index: 1, kind: input, shape index: {}]   ;;  %s6061_s2 = inlined_call_operand.vmem [shape: f32[1,128], index: 2, kind: input, shape index: {}]   ;;  %s6062_s3 = inlined_call_operand.vmem [shape: f32[1,128], index: 3, kind: input, shape index: {}]   ;;  %s6063_s4 = inlined_call_operand.vmem [shape: f32[2048,8], index: 4, kind: output, shape index: {}]  }
   0x1   :  { %s3313_s17 = smov 0  }
   0x2 LB: > { %s26_s18 = sadd.s32 1, %s3277_s16  ;;  %p3019_p0 = scmp.ge.s32.totalorder %s3281_s17, 1  ;;  %s3281_s17 = sphi %s3313_s17, %s14_s17   ;;  %s3277_s16 = sphi %s3311_s16, %s6065_s16   ;;  %s3273_s15 = sphi %s3309_s15, %s6064_s15  }
   0x3   : > { %p28_p1 = scmp.ge.s32.totalorder %s26_s18, 4  ;;  %p186_p2 = scmp.lt.s32.totalorder %s3281_s17, 5 }
   0x5   : > { %s6067_s18 = smov (%p28_p1, %s26_s18), 0  ;;  %p187_p3 = pnand %p3019_p0, %p186_p2 }
   0x6   : > { %p217_p4 = scmp.lt.s32.totalorder (!%p187_p3), %s3273_s15, 3  ;;  %p232_p5 = scmp.eq.s32.totalorder (!%p187_p3), %s3273_s15, 0 }
   0x7   : > { %190 = sbr.rel (%p187_p3) target bundleno = 723 (0x2d3), region = 36 }
   0xc   : > { %s218_s19 = scalar_select %p217_p4, %s3273_s15, 3  ;;  %v3283_v0 = vmov (%p232_p5), 0.0  }
   0xd   : > { %237 = sbr.rel (!%p232_p5) target bundleno = 18 (0x12), region = 40  ;;  %238 = vst [vmem:[#allocation2] sm:$0x1] (%p232_p5), %v3283_v0  ;;  %239 = vst [vmem:[#allocation3] sm:$0x1] (%p232_p5), %v3283_v0 }
   0xe   : > { %s3094_s20 = sshll.u32 %s218_s19, 8  ;;  %s3095_s21 = sshll.u32 %s218_s19, 3 }
   0xf   : > { %s3335_s24 = scalar_lea.vmem %s6059_s0, %s3094_s20  ;;  %s230_s27 = scalar_lea.vmem %s6060_s1, %s3095_s21 }
  0x12 PF: > { %v3224_v1 = vld [vmem:[%s230_s27] sm:$0xff]   ;;  %vm472_vm0 = vcmask 130048   ;;  %v3226_v3 = vld [vmem:[%s3335_s24 + $0x8] sm:$0xff]   ;;  %v3227_v4 = vld [vmem:[%s3335_s24 + $0x10] sm:$0xff]   ;;  %s3090_s28 = sshll.u32 %s3273_s15, 9  ;;  %vm1070_vm1 = vcmask 64512  }
  0x13   : > { %v3225_v2 = vld [vmem:[%s3335_s24] sm:$0xff]   ;;  %3131 = vmatprep.subr.bf16.mxu0 %v3224_v1  ;;  %3197 = vmatprep.subr.bf16.mxu1 %v3224_v1  ;;  %v3228_v5 = vld [vmem:[%s3335_s24 + $0x18] sm:$0xff]   ;;  %v3230_v7 = vld [vmem:[%s3335_s24 + $0x28] sm:$0xff]   ;;  %s3408_s5 = scalar_lea.vmem %s6063_s4, %s3090_s28  ;;  %p1135_p6 = scmp.eq.s32.totalorder %s3273_s15, 3 }
  0x14   : > { %3132 = vmatpush3.bf16.msra.mxu0 %v3224_v1  ;;  %3133 = vmatprep.mubr.msk.bf16.mxu0 %vm472_vm0, %v3225_v2  ;;  %v3229_v6 = vld [vmem:[%s3335_s24 + $0x20] sm:$0xff]   ;;  %v3231_v8 = vld [vmem:[%s3335_s24 + $0x30] sm:$0xff]   ;;  %v3242_v10 = vld [vmem:[%s3335_s24 + $0x88] sm:$0xff]  }
  0x15   : > { %3198 = vmatpush3.bf16.msra.mxu1 %v3224_v1  ;;  %v3241_v9 = vld [vmem:[%s3335_s24 + $0x80] sm:$0xff]   ;;  %v3243_v11 = vld [vmem:[%s3335_s24 + $0x90] sm:$0xff]   ;;  %v3244_v12 = vld [vmem:[%s3335_s24 + $0x98] sm:$0xff]  }
  0x16   : > { %3165 = vmatprep.mubr.msk.bf16.mxu1 %vm472_vm0, %v3241_v9  ;;  %v3245_v13 = vld [vmem:[%s3335_s24 + $0xa0] sm:$0xff]   ;;  %v3232_v14 = vld [vmem:[%s3335_s24 + $0x38] sm:$0xff]   ;;  %v3246_v16 = vld [vmem:[%s3335_s24 + $0xa8] sm:$0xff]  }
  0x17   : > { %3134 = vmatmul.mubr.msk.bf16.vlgmr.msra.gmra.mxu0 %vm472_vm0, %v3226_v3  ;;  %v3233_v15 = vld [vmem:[%s3335_s24 + $0x40] sm:$0xff]   ;;  %v3247_v17 = vld [vmem:[%s3335_s24 + $0xb0] sm:$0xff]   ;;  %v3234_v18 = vld [vmem:[%s3335_s24 + $0x48] sm:$0xff]  }
  0x18   : > { %3137 = vmatprep.mubr.msk.bf16.mxu0 %vm472_vm0, %v3227_v4  ;;  %3166 = vmatmul.mubr.msk.bf16.vlgmr.msra.gmra.mxu1 %vm472_vm0, %v3242_v10  ;;  %v3235_v19 = vld [vmem:[%s3335_s24 + $0x50] sm:$0xff]   ;;  %v3248_v20 = vld [vmem:[%s3335_s24 + $0xb8] sm:$0xff]   ;;  %v3249_v21 = vld [vmem:[%s3335_s24 + $0xc0] sm:$0xff]  }
  0x19   : > { %3169 = vmatprep.mubr.msk.bf16.mxu1 %vm472_vm0, %v3243_v11  ;;  %v3236_v22 = vld [vmem:[%s3335_s24 + $0x58] sm:$0xff]   ;;  %v3237_v23 = vld [vmem:[%s3335_s24 + $0x60] sm:$0xff]   ;;  %v3250_v24 = vld [vmem:[%s3335_s24 + $0xc8] sm:$0xff]  }
  0x1a   : > { %v3251_v25 = vld [vmem:[%s3335_s24 + $0xd0] sm:$0xff]   ;;  %v3238_v26 = vld [vmem:[%s3335_s24 + $0x68] sm:$0xff]   ;;  %v3252_v28 = vld [vmem:[%s3335_s24 + $0xd8] sm:$0xff]  }
  0x1b   : > { %v3239_v27 = vld [vmem:[%s3335_s24 + $0x70] sm:$0xff]   ;;  %v3253_v29 = vld [vmem:[%s3335_s24 + $0xe0] sm:$0xff]   ;;  %v3240_v30 = vld [vmem:[%s3335_s24 + $0x78] sm:$0xff]  }
  0x1c   : > { %v3254_v31 = vld [vmem:[%s3335_s24 + $0xe8] sm:$0xff]   ;;  %v3255_v32 = vld [vmem:[%s3335_s24 + $0xf0] sm:$0xff]   ;;  %v3256_v33 = vld [vmem:[%s3335_s24 + $0xf8] sm:$0xff]  }
  0x1f   : > { %3138 = vmatmul.mubr.msk.bf16.gmra.mxu0 %vm472_vm0, %v3228_v5 }
  0x20   : > { %3141 = vmatprep.mubr.msk.bf16.mxu0 %vm472_vm0, %v3229_v6  ;;  %3170 = vmatmul.mubr.msk.bf16.gmra.mxu1 %vm472_vm0, %v3244_v12 }
  0x21   : > { %3173 = vmatprep.mubr.msk.bf16.mxu1 %vm472_vm0, %v3245_v13 }
  0x27   : > { %3142 = vmatmul.mubr.msk.bf16.gmra.mxu0 %vm472_vm0, %v3230_v7 }
  0x28   : > { %3145 = vmatprep.mubr.msk.bf16.mxu0 %vm472_vm0, %v3231_v8  ;;  %3174 = vmatmul.mubr.msk.bf16.gmra.mxu1 %vm472_vm0, %v3246_v16 }
  0x29   : > { %3177 = vmatprep.mubr.msk.bf16.mxu1 %vm472_vm0, %v3247_v17 }
  0x2f   : > { %3146 = vmatmul.mubr.msk.bf16.gmra.mxu0 %vm472_vm0, %v3232_v14 }
  0x30   : > { %3149 = vmatprep.mubr.msk.bf16.mxu0 %vm472_vm0, %v3233_v15  ;;  %3178 = vmatmul.mubr.msk.bf16.gmra.mxu1 %vm472_vm0, %v3248_v20 }
  0x31   : > { %3181 = vmatprep.mubr.msk.bf16.mxu1 %vm472_vm0, %v3249_v21 }
  0x37   : > { %3150 = vmatmul.mubr.msk.bf16.gmra.mxu0 %vm472_vm0, %v3234_v18 }
  0x38   : > { %3153 = vmatprep.mubr.msk.bf16.mxu0 %vm472_vm0, %v3235_v19  ;;  %3182 = vmatmul.mubr.msk.bf16.gmra.mxu1 %vm472_vm0, %v3250_v24 }
  0x39   : > { %3185 = vmatprep.mubr.msk.bf16.mxu1 %vm472_vm0, %v3251_v25 }
  0x3f   : > { %3154 = vmatmul.mubr.msk.bf16.gmra.mxu0 %vm472_vm0, %v3236_v22 }
  0x40   : > { %3157 = vmatprep.mubr.msk.bf16.mxu0 %vm472_vm0, %v3237_v23  ;;  %3186 = vmatmul.mubr.msk.bf16.gmra.mxu1 %vm472_vm0, %v3252_v28 }
  0x41   : > { %3189 = vmatprep.mubr.msk.bf16.mxu1 %vm472_vm0, %v3253_v29 }
  0x47   : > { %3158 = vmatmul.mubr.msk.bf16.gmra.mxu0 %vm472_vm0, %v3238_v26 }
  0x48   : > { %3161 = vmatprep.mubr.msk.bf16.mxu0 %vm472_vm0, %v3239_v27  ;;  %3190 = vmatmul.mubr.msk.bf16.gmra.mxu1 %vm472_vm0, %v3254_v31 }
  0x49   : > { %3193 = vmatprep.mubr.msk.bf16.mxu1 %vm472_vm0, %v3255_v32 }
  0x4f   : > { %3162 = vmatmul.mubr.msk.bf16.gmra.mxu0 %vm472_vm0, %v3240_v30 }
  0x50   : > { %3194 = vmatmul.mubr.msk.bf16.gmra.mxu1 %vm472_vm0, %v3256_v33 }
  0xd7   : > { %v3135_v34 = vpop.f32.mrf.mxu0 }
  0xd8   : > { %1073 = vst.msk [vmem:[%s3408_s5 + $0x10] sm:$0xff] %vm1070_vm1, %v3135_v34  ;;  %v933_v42 = vmul.f32 %v3135_v34, %v3135_v34  ;;  %v3424_v54 = vpop.f32.mrf.mxu1 }
  0xd9   : > { %v603_v35 = vpop.f32.mrf.mxu0  ;;  %1105 = vst.msk [vmem:[%s3408_s5 + $0x110] sm:$0xff] %vm1070_vm1, %v3424_v54 }
  0xda   : > { %1071 = vst.msk [vmem:[%s3408_s5] sm:$0xff] %vm1070_vm1, %v603_v35  ;;  %v931_v38 = vmul.f32 %v603_v35, %v603_v35  ;;  %v3431_v59 = vpop.f32.mrf.mxu1 }
  0xdb   : > { %v3136_v36 = vpop.f32.mrf.mxu0  ;;  %1103 = vst.msk [vmem:[%s3408_s5 + $0x100] sm:$0xff] %vm1070_vm1, %v3431_v59 }
  0xdc   : > { %1074 = vst.msk [vmem:[%s3408_s5 + $0x18] sm:$0xff] %vm1070_vm1, %v3136_v36  ;;  %v934_v46 = vmul.f32 %v3136_v36, %v3136_v36  ;;  %v3438_v0 = vpop.f32.mrf.mxu1 }
  0xdd   : > { %v606_v37 = vpop.f32.mrf.mxu0  ;;  %1106 = vst.msk [vmem:[%s3408_s5 + $0x118] sm:$0xff] %vm1070_vm1, %v3438_v0 }
  0xde   : > { %v859_v39 = vadd.f32 %v606_v37, %v603_v35  ;;  %v932_v40 = vmul.f32 %v606_v37, %v606_v37  ;;  %1072 = vst.msk [vmem:[%s3408_s5 + $0x8] sm:$0xff] %vm1070_vm1, %v606_v37  ;;  %v3445_v5 = vpop.f32.mrf.mxu1 }
  0xdf   : > { %v3139_v41 = vpop.f32.mrf.mxu0  ;;  %1104 = vst.msk [vmem:[%s3408_s5 + $0x108] sm:$0xff] %vm1070_vm1, %v3445_v5 }
  0xe0   : > { %v860_v43 = vadd.f32 %v3135_v34, %v859_v39  ;;  %v995_v44 = vadd.f32 %v932_v40, %v931_v38  ;;  %1077 = vst.msk [vmem:[%s3408_s5 + $0x30] sm:$0xff] %vm1070_vm1, %v3139_v41  ;;  %v937_v60 = vmul.f32 %v3139_v41, %v3139_v41  ;;  %v3453_v10 = vpop.f32.mrf.mxu1 }
  0xe1   : > { %v619_v45 = vpop.f32.mrf.mxu0  ;;  %1109 = vst.msk [vmem:[%s3408_s5 + $0x130] sm:$0xff] %vm1070_vm1, %v3453_v10 }
  0xe2   : > { %v996_v47 = vadd.f32 %v995_v44, %v933_v42  ;;  %v861_v48 = vadd.f32 %v3136_v36, %v860_v43  ;;  %1075 = vst.msk [vmem:[%s3408_s5 + $0x20] sm:$0xff] %vm1070_vm1, %v619_v45  ;;  %v935_v51 = vmul.f32 %v619_v45, %v619_v45  ;;  %v3460_v15 = vpop.f32.mrf.mxu1 }
  0xe3   : > { %v3140_v49 = vpop.f32.mrf.mxu0  ;;  %1107 = vst.msk [vmem:[%s3408_s5 + $0x120] sm:$0xff] %vm1070_vm1, %v3460_v15 }
  0xe4   : > { %v862_v50 = vadd.f32 %v861_v48, %v619_v45  ;;  %v997_v52 = vadd.f32 %v996_v47, %v934_v46  ;;  %1078 = vst.msk [vmem:[%s3408_s5 + $0x38] sm:$0xff] %vm1070_vm1, %v3140_v49  ;;  %v938_v1 = vmul.f32 %v3140_v49, %v3140_v49  ;;  %v3467_v20 = vpop.f32.mrf.mxu1 }
  0xe5   : > { %v622_v53 = vpop.f32.mrf.mxu0  ;;  %1110 = vst.msk [vmem:[%s3408_s5 + $0x138] sm:$0xff] %vm1070_vm1, %v3467_v20 }
  0xe6   : > { %v998_v55 = vadd.f32 %v997_v52, %v935_v51  ;;  %v863_v56 = vadd.f32 %v862_v50, %v622_v53  ;;  %v936_v57 = vmul.f32 %v622_v53, %v622_v53  ;;  %1076 = vst.msk [vmem:[%s3408_s5 + $0x28] sm:$0xff] %vm1070_vm1, %v622_v53  ;;  %v3474_v25 = vpop.f32.mrf.mxu1 }
  0xe7   : > { %v3143_v58 = vpop.f32.mrf.mxu0  ;;  %1108 = vst.msk [vmem:[%s3408_s5 + $0x128] sm:$0xff] %vm1070_vm1, %v3474_v25 }
  0xe8   : > { %v864_v61 = vadd.f32 %v3139_v41, %v863_v56  ;;  %v999_v62 = vadd.f32 %v998_v55, %v936_v57  ;;  %1081 = vst.msk [vmem:[%s3408_s5 + $0x50] sm:$0xff] %vm1070_vm1, %v3143_v58  ;;  %v941_v16 = vmul.f32 %v3143_v58, %v3143_v58  ;;  %v3481_v30 = vpop.f32.mrf.mxu1 }
  0xe9   : > { %v635_v63 = vpop.f32.mrf.mxu0  ;;  %1113 = vst.msk [vmem:[%s3408_s5 + $0x150] sm:$0xff] %vm1070_vm1, %v3481_v30 }
  0xea   : > { %v1000_v2 = vadd.f32 %v999_v62, %v937_v60  ;;  %v865_v3 = vadd.f32 %v3140_v49, %v864_v61  ;;  %1079 = vst.msk [vmem:[%s3408_s5 + $0x40] sm:$0xff] %vm1070_vm1, %v635_v63  ;;  %v939_v7 = vmul.f32 %v635_v63, %v635_v63  ;;  %v3488_v35 = vpop.f32.mrf.mxu1 }
  0xeb   : > { %v3144_v4 = vpop.f32.mrf.mxu0  ;;  %1111 = vst.msk [vmem:[%s3408_s5 + $0x140] sm:$0xff] %vm1070_vm1, %v3488_v35 }
  0xec   : > { %v866_v6 = vadd.f32 %v865_v3, %v635_v63  ;;  %v1001_v8 = vadd.f32 %v1000_v2, %v938_v1  ;;  %1082 = vst.msk [vmem:[%s3408_s5 + $0x58] sm:$0xff] %vm1070_vm1, %v3144_v4  ;;  %v942_v21 = vmul.f32 %v3144_v4, %v3144_v4  ;;  %v3495_v40 = vpop.f32.mrf.mxu1 }
  0xed   : > { %v638_v9 = vpop.f32.mrf.mxu0  ;;  %1114 = vst.msk [vmem:[%s3408_s5 + $0x158] sm:$0xff] %vm1070_vm1, %v3495_v40 }
  0xee   : > { %v1002_v11 = vadd.f32 %v1001_v8, %v939_v7  ;;  %v867_v12 = vadd.f32 %v866_v6, %v638_v9  ;;  %v940_v13 = vmul.f32 %v638_v9, %v638_v9  ;;  %1080 = vst.msk [vmem:[%s3408_s5 + $0x48] sm:$0xff] %vm1070_vm1, %v638_v9  ;;  %v3502_v45 = vpop.f32.mrf.mxu1 }
  0xef   : > { %v3147_v14 = vpop.f32.mrf.mxu0  ;;  %1112 = vst.msk [vmem:[%s3408_s5 + $0x148] sm:$0xff] %vm1070_vm1, %v3502_v45 }
  0xf0   : > { %v868_v17 = vadd.f32 %v3143_v58, %v867_v12  ;;  %v1003_v18 = vadd.f32 %v1002_v11, %v940_v13  ;;  %1085 = vst.msk [vmem:[%s3408_s5 + $0x70] sm:$0xff] %vm1070_vm1, %v3147_v14  ;;  %v945_v36 = vmul.f32 %v3147_v14, %v3147_v14  ;;  %v3509_v50 = vpop.f32.mrf.mxu1 }
  0xf1   : > { %v651_v19 = vpop.f32.mrf.mxu0  ;;  %1117 = vst.msk [vmem:[%s3408_s5 + $0x170] sm:$0xff] %vm1070_vm1, %v3509_v50 }
  0xf2   : > { %v1004_v22 = vadd.f32 %v1003_v18, %v941_v16  ;;  %v869_v23 = vadd.f32 %v3144_v4, %v868_v17  ;;  %1083 = vst.msk [vmem:[%s3408_s5 + $0x60] sm:$0xff] %vm1070_vm1, %v651_v19  ;;  %v943_v27 = vmul.f32 %v651_v19, %v651_v19  ;;  %v3516_v56 = vpop.f32.mrf.mxu1 }
  0xf3   : > { %v3148_v24 = vpop.f32.mrf.mxu0  ;;  %1115 = vst.msk [vmem:[%s3408_s5 + $0x160] sm:$0xff] %vm1070_vm1, %v3516_v56 }
  0xf4   : > { %v870_v26 = vadd.f32 %v869_v23, %v651_v19  ;;  %v1005_v28 = vadd.f32 %v1004_v22, %v942_v21  ;;  %1086 = vst.msk [vmem:[%s3408_s5 + $0x78] sm:$0xff] %vm1070_vm1, %v3148_v24  ;;  %v946_v41 = vmul.f32 %v3148_v24, %v3148_v24  ;;  %v3523_v62 = vpop.f32.mrf.mxu1 }
  0xf5   : > { %v654_v29 = vpop.f32.mrf.mxu0  ;;  %1118 = vst.msk [vmem:[%s3408_s5 + $0x178] sm:$0xff] %vm1070_vm1, %v3523_v62 }
  0xf6   : > { %v1006_v31 = vadd.f32 %v1005_v28, %v943_v27  ;;  %v871_v32 = vadd.f32 %v870_v26, %v654_v29  ;;  %v944_v33 = vmul.f32 %v654_v29, %v654_v29  ;;  %1084 = vst.msk [vmem:[%s3408_s5 + $0x68] sm:$0xff] %vm1070_vm1, %v654_v29  ;;  %v3530_v4 = vpop.f32.mrf.mxu1 }
  0xf7   : > { %v3151_v34 = vpop.f32.mrf.mxu0  ;;  %1116 = vst.msk [vmem:[%s3408_s5 + $0x168] sm:$0xff] %vm1070_vm1, %v3530_v4 }
  0xf8   : > { %v872_v37 = vadd.f32 %v3147_v14, %v871_v32  ;;  %v1007_v38 = vadd.f32 %v1006_v31, %v944_v33  ;;  %1089 = vst.msk [vmem:[%s3408_s5 + $0x90] sm:$0xff] %vm1070_vm1, %v3151_v34  ;;  %v949_v57 = vmul.f32 %v3151_v34, %v3151_v34  ;;  %v3537_v11 = vpop.f32.mrf.mxu1 }
  0xf9   : > { %v667_v39 = vpop.f32.mrf.mxu0  ;;  %1121 = vst.msk [vmem:[%s3408_s5 + $0x190] sm:$0xff] %vm1070_vm1, %v3537_v11 }
  0xfa   : > { %v1008_v42 = vadd.f32 %v1007_v38, %v945_v36  ;;  %v873_v43 = vadd.f32 %v3148_v24, %v872_v37  ;;  %1087 = vst.msk [vmem:[%s3408_s5 + $0x80] sm:$0xff] %vm1070_vm1, %v667_v39  ;;  %v947_v47 = vmul.f32 %v667_v39, %v667_v39  ;;  %v3544_v17 = vpop.f32.mrf.mxu1 }
  0xfb   : > { %v3152_v44 = vpop.f32.mrf.mxu0  ;;  %1119 = vst.msk [vmem:[%s3408_s5 + $0x180] sm:$0xff] %vm1070_vm1, %v3544_v17 }
  0xfc   : > { %v874_v46 = vadd.f32 %v873_v43, %v667_v39  ;;  %v1009_v48 = vadd.f32 %v1008_v42, %v946_v41  ;;  %1090 = vst.msk [vmem:[%s3408_s5 + $0x98] sm:$0xff] %vm1070_vm1, %v3152_v44  ;;  %v950_v63 = vmul.f32 %v3152_v44, %v3152_v44  ;;  %v3551_v23 = vpop.f32.mrf.mxu1 }
  0xfd   : > { %v670_v49 = vpop.f32.mrf.mxu0  ;;  %1122 = vst.msk [vmem:[%s3408_s5 + $0x198] sm:$0xff] %vm1070_vm1, %v3551_v23 }
  0xfe   : > { %v1010_v51 = vadd.f32 %v1009_v48, %v947_v47  ;;  %v875_v52 = vadd.f32 %v874_v46, %v670_v49  ;;  %v948_v53 = vmul.f32 %v670_v49, %v670_v49  ;;  %1088 = vst.msk [vmem:[%s3408_s5 + $0x88] sm:$0xff] %vm1070_vm1, %v670_v49  ;;  %v3558_v29 = vpop.f32.mrf.mxu1 }
  0xff   : > { %v3155_v55 = vpop.f32.mrf.mxu0  ;;  %1120 = vst.msk [vmem:[%s3408_s5 + $0x188] sm:$0xff] %vm1070_vm1, %v3558_v29 }
 0x100   : > { %v876_v58 = vadd.f32 %v3151_v34, %v875_v52  ;;  %v1011_v60 = vadd.f32 %v1010_v51, %v948_v53  ;;  %1093 = vst.msk [vmem:[%s3408_s5 + $0xb0] sm:$0xff] %vm1070_vm1, %v3155_v55  ;;  %v953_v18 = vmul.f32 %v3155_v55, %v3155_v55  ;;  %v3565_v36 = vpop.f32.mrf.mxu1 }
 0x101   : > { %v683_v61 = vpop.f32.mrf.mxu0  ;;  %1125 = vst.msk [vmem:[%s3408_s5 + $0x1b0] sm:$0xff] %vm1070_vm1, %v3565_v36 }
 0x102   : > { %v1012_v1 = vadd.f32 %v1011_v60, %v949_v57  ;;  %v877_v2 = vadd.f32 %v3152_v44, %v876_v58  ;;  %1091 = vst.msk [vmem:[%s3408_s5 + $0xa0] sm:$0xff] %vm1070_vm1, %v683_v61  ;;  %v951_v7 = vmul.f32 %v683_v61, %v683_v61  ;;  %v3572_v42 = vpop.f32.mrf.mxu1 }
 0x103   : > { %v3156_v3 = vpop.f32.mrf.mxu0  ;;  %1123 = vst.msk [vmem:[%s3408_s5 + $0x1a0] sm:$0xff] %vm1070_vm1, %v3572_v42 }
 0x104   : > { %v878_v6 = vadd.f32 %v877_v2, %v683_v61  ;;  %v1013_v8 = vadd.f32 %v1012_v1, %v950_v63  ;;  %1094 = vst.msk [vmem:[%s3408_s5 + $0xb8] sm:$0xff] %vm1070_vm1, %v3156_v3  ;;  %v954_v24 = vmul.f32 %v3156_v3, %v3156_v3  ;;  %v3579_v48 = vpop.f32.mrf.mxu1 }
 0x105   : > { %v686_v9 = vpop.f32.mrf.mxu0  ;;  %1126 = vst.msk [vmem:[%s3408_s5 + $0x1b8] sm:$0xff] %vm1070_vm1, %v3579_v48 }
 0x106   : > { %v1014_v12 = vadd.f32 %v1013_v8, %v951_v7  ;;  %v879_v13 = vadd.f32 %v878_v6, %v686_v9  ;;  %v952_v14 = vmul.f32 %v686_v9, %v686_v9  ;;  %1092 = vst.msk [vmem:[%s3408_s5 + $0xa8] sm:$0xff] %vm1070_vm1, %v686_v9 }
 0x107   : > { %v3159_v16 = vpop.f32.mrf.mxu0 }
 0x108   : > { %v880_v19 = vadd.f32 %v3155_v55, %v879_v13  ;;  %v1015_v21 = vadd.f32 %v1014_v12, %v952_v14  ;;  %1097 = vst.msk [vmem:[%s3408_s5 + $0xd0] sm:$0xff] %vm1070_vm1, %v3159_v16  ;;  %v957_v43 = vmul.f32 %v3159_v16, %v3159_v16  ;;  %v3586_v55 = vpop.f32.mrf.mxu1 }
 0x109   : > { %v699_v22 = vpop.f32.mrf.mxu0  ;;  %1124 = vst.msk [vmem:[%s3408_s5 + $0x1a8] sm:$0xff] %vm1070_vm1, %v3586_v55 }
 0x10a   : > { %v1016_v26 = vadd.f32 %v1015_v21, %v953_v18  ;;  %v881_v27 = vadd.f32 %v3156_v3, %v880_v19  ;;  %1095 = vst.msk [vmem:[%s3408_s5 + $0xc0] sm:$0xff] %vm1070_vm1, %v699_v22  ;;  %v955_v32 = vmul.f32 %v699_v22, %v699_v22  ;;  %v3593_v63 = vpop.f32.mrf.mxu1  ;;  %v963_v19 = vmul.f32 %v3431_v59, %v3431_v59 }
 0x10b   : > { %v3160_v28 = vpop.f32.mrf.mxu0  ;;  %1129 = vst.msk [vmem:[%s3408_s5 + $0x1d0] sm:$0xff] %vm1070_vm1, %v3593_v63 }
 0x10c   : > { %v882_v31 = vadd.f32 %v881_v27, %v699_v22  ;;  %v1017_v33 = vadd.f32 %v1016_v26, %v954_v24  ;;  %1098 = vst.msk [vmem:[%s3408_s5 + $0xd8] sm:$0xff] %vm1070_vm1, %v3160_v28  ;;  %v958_v49 = vmul.f32 %v3160_v28, %v3160_v28  ;;  %v3600_v6 = vpop.f32.mrf.mxu1  ;;  %v964_v27 = vmul.f32 %v3445_v5, %v3445_v5 }
 0x10d   : > { %v702_v34 = vpop.f32.mrf.mxu0  ;;  %1127 = vst.msk [vmem:[%s3408_s5 + $0x1c0] sm:$0xff] %vm1070_vm1, %v3600_v6 }
 0x10e   : > { %v1018_v37 = vadd.f32 %v1017_v33, %v955_v32  ;;  %v883_v38 = vadd.f32 %v882_v31, %v702_v34  ;;  %v956_v39 = vmul.f32 %v702_v34, %v702_v34  ;;  %1096 = vst.msk [vmem:[%s3408_s5 + $0xc8] sm:$0xff] %vm1070_vm1, %v702_v34  ;;  %v3605_v12 = vpop.f32.mrf.mxu1 }
 0x10f   : > { %v3163_v41 = vpop.f32.mrf.mxu0  ;;  %1130 = vst.msk [vmem:[%s3408_s5 + $0x1d8] sm:$0xff] %vm1070_vm1, %v3605_v12 }
 0x110   : > { %v884_v44 = vadd.f32 %v3159_v16, %v883_v38  ;;  %v1019_v46 = vadd.f32 %v1018_v37, %v956_v39  ;;  %1101 = vst.msk [vmem:[%s3408_s5 + $0xf0] sm:$0xff] %vm1070_vm1, %v3163_v41  ;;  %v961_v7 = vmul.f32 %v3163_v41, %v3163_v41  ;;  %v3610_v18 = vpop.f32.mrf.mxu1 }
 0x111   : > { %v715_v47 = vpop.f32.mrf.mxu0  ;;  %1128 = vst.msk [vmem:[%s3408_s5 + $0x1c8] sm:$0xff] %vm1070_vm1, %v3610_v18 }
 0x112   : > { %v1020_v51 = vadd.f32 %v1019_v46, %v957_v43  ;;  %v885_v52 = vadd.f32 %v3160_v28, %v884_v44  ;;  %1099 = vst.msk [vmem:[%s3408_s5 + $0xe0] sm:$0xff] %vm1070_vm1, %v715_v47  ;;  %v959_v58 = vmul.f32 %v715_v47, %v715_v47  ;;  %v3618_v24 = vpop.f32.mrf.mxu1 }
 0x113   : > { %v3164_v53 = vpop.f32.mrf.mxu0  ;;  %1133 = vst.msk [vmem:[%s3408_s5 + $0x1f0] sm:$0xff] %vm1070_vm1, %v3618_v24 }
 0x114   : > { %v886_v57 = vadd.f32 %v885_v52, %v715_v47  ;;  %v1021_v60 = vadd.f32 %v1020_v51, %v958_v49  ;;  %1102 = vst.msk [vmem:[%s3408_s5 + $0xf8] sm:$0xff] %vm1070_vm1, %v3164_v53  ;;  %v962_v13 = vmul.f32 %v3164_v53, %v3164_v53  ;;  %v3626_v31 = vpop.f32.mrf.mxu1  ;;  %v969_v47 = vmul.f32 %v3453_v10, %v3453_v10 }
 0x115   : > { %v718_v61 = vpop.f32.mrf.mxu0  ;;  %1131 = vst.msk [vmem:[%s3408_s5 + $0x1e0] sm:$0xff] %vm1070_vm1, %v3626_v31  ;;  %v970_v52 = vmul.f32 %v3467_v20, %v3467_v20 }
 0x116   : > { %v1022_v1 = vadd.f32 %v1021_v60, %v959_v58  ;;  %v887_v2 = vadd.f32 %v886_v57, %v718_v61  ;;  %v960_v3 = vmul.f32 %v718_v61, %v718_v61  ;;  %1100 = vst.msk [vmem:[%s3408_s5 + $0xe8] sm:$0xff] %vm1070_vm1, %v718_v61  ;;  %v3634_v34 = vpop.f32.mrf.mxu1  ;;  %v971_v58 = vmul.f32 %v3488_v35, %v3488_v35 }
 0x117   : > { %1134 = vst.msk [vmem:[%s3408_s5 + $0x1f8] sm:$0xff] %vm1070_vm1, %v3634_v34 }
 0x118   : > { %v888_v8 = vadd.f32 %v3163_v41, %v887_v2  ;;  %v1023_v9 = vadd.f32 %v1022_v1, %v960_v3  ;;  %v3642_v39 = vpop.f32.mrf.mxu1  ;;  %v972_v1 = vmul.f32 %v3502_v45, %v3502_v45 }
 0x119   : > { %1132 = vst.msk [vmem:[%s3408_s5 + $0x1e8] sm:$0xff] %vm1070_vm1, %v3642_v39 }
 0x11a   : > { %v889_v14 = vadd.f32 %v3164_v53, %v888_v8  ;;  %v1024_v16 = vadd.f32 %v1023_v9, %v961_v7  ;;  %v975_v9 = vmul.f32 %v3516_v56, %v3516_v56 }
 0x11c   : > { %v1025_v21 = vadd.f32 %v1024_v16, %v962_v13  ;;  %v890_v22 = vadd.f32 %v889_v14, %v3431_v59  ;;  %v965_v59 = vmul.f32 %v3424_v54, %v3424_v54  ;;  %v976_v16 = vmul.f32 %v3530_v4, %v3530_v4 }
 0x11e   : > { %v891_v26 = vadd.f32 %v890_v22, %v3445_v5  ;;  %v1026_v28 = vadd.f32 %v1025_v21, %v963_v19  ;;  %v966_v5 = vmul.f32 %v3438_v0, %v3438_v0 }
 0x120   : > { %v892_v32 = vadd.f32 %v3424_v54, %v891_v26  ;;  %v1027_v33 = vadd.f32 %v1026_v28, %v964_v27  ;;  %v967_v54 = vmul.f32 %v3460_v15, %v3460_v15  ;;  %v979_v27 = vmul.f32 %v3544_v17, %v3544_v17 }
 0x122   : > { %v1028_v37 = vadd.f32 %v1027_v33, %v965_v59  ;;  %v893_v38 = vadd.f32 %v3438_v0, %v892_v32  ;;  %v968_v0 = vmul.f32 %v3474_v25, %v3474_v25  ;;  %v980_v32 = vmul.f32 %v3558_v29, %v3558_v29 }
 0x124   : > { %v894_v41 = vadd.f32 %v893_v38, %v3460_v15  ;;  %v1029_v43 = vadd.f32 %v1028_v37, %v966_v5 }
 0x126   : > { %v1030_v44 = vadd.f32 %v1029_v43, %v967_v54  ;;  %v895_v46 = vadd.f32 %v894_v41, %v3474_v25  ;;  %v983_v41 = vmul.f32 %v3572_v42, %v3572_v42 }
 0x128   : > { %v896_v49 = vadd.f32 %v3453_v10, %v895_v46  ;;  %v1031_v51 = vadd.f32 %v1030_v44, %v968_v0  ;;  %v973_v10 = vmul.f32 %v3481_v30, %v3481_v30  ;;  %v984_v44 = vmul.f32 %v3586_v55, %v3586_v55 }
 0x12a   : > { %v1032_v15 = vadd.f32 %v1031_v51, %v969_v47  ;;  %v897_v53 = vadd.f32 %v3467_v20, %v896_v49  ;;  %v974_v20 = vmul.f32 %v3495_v40, %v3495_v40  ;;  %v987_v51 = vmul.f32 %v3600_v6, %v3600_v6 }
 0x12c   : > { %v898_v57 = vadd.f32 %v897_v53, %v3488_v35  ;;  %v1033_v60 = vadd.f32 %v1032_v15, %v970_v52  ;;  %v988_v53 = vmul.f32 %v3610_v18, %v3610_v18 }
 0x12e   : > { %v1034_v61 = vadd.f32 %v1033_v60, %v971_v58  ;;  %v899_v25 = vadd.f32 %v898_v57, %v3502_v45 }
 0x130   : > { %v900_v2 = vadd.f32 %v3481_v30, %v899_v25  ;;  %v1035_v3 = vadd.f32 %v1034_v61, %v972_v1  ;;  %v977_v30 = vmul.f32 %v3509_v50, %v3509_v50  ;;  %v991_v25 = vmul.f32 %v3626_v31, %v3626_v31 }
 0x132   : > { %v1036_v7 = vadd.f32 %v1035_v3, %v973_v10  ;;  %v901_v8 = vadd.f32 %v3495_v40, %v900_v2  ;;  %v978_v40 = vmul.f32 %v3523_v62, %v3523_v62  ;;  %v992_v2 = vmul.f32 %v3642_v39, %v3642_v39 }
 0x134   : > { %v902_v35 = vadd.f32 %v901_v8, %v3516_v56  ;;  %v1037_v13 = vadd.f32 %v1036_v7, %v974_v20 }
 0x136   : > { %v1038_v14 = vadd.f32 %v1037_v13, %v975_v9  ;;  %v903_v45 = vadd.f32 %v902_v35, %v3530_v4 }
 0x138   : > { %v904_v19 = vadd.f32 %v3509_v50, %v903_v45  ;;  %v1039_v21 = vadd.f32 %v1038_v14, %v976_v16  ;;  %v981_v50 = vmul.f32 %v3537_v11, %v3537_v11 }
 0x13a   : > { %v1040_v22 = vadd.f32 %v1039_v21, %v977_v30  ;;  %v905_v26 = vadd.f32 %v3523_v62, %v904_v19  ;;  %v982_v62 = vmul.f32 %v3551_v23, %v3551_v23  ;;  %v858_v21 = vld [vmem:[#allocation2] sm:$0x1] }
 0x13c   : > { %v906_v56 = vadd.f32 %v905_v26, %v3544_v17  ;;  %v1041_v28 = vadd.f32 %v1040_v22, %v978_v40  ;;  %v930_v22 = vld [vmem:[#allocation3] sm:$0x1] }
 0x13e   : > { %v1042_v59 = vadd.f32 %v1041_v28, %v979_v27  ;;  %v907_v4 = vadd.f32 %v906_v56, %v3558_v29 }
 0x140   : > { %v908_v33 = vadd.f32 %v3537_v11, %v907_v4  ;;  %v1043_v5 = vadd.f32 %v1042_v59, %v980_v32  ;;  %v985_v11 = vmul.f32 %v3565_v36, %v3565_v36 }
 0x142   : > { %v1044_v37 = vadd.f32 %v1043_v5, %v981_v50  ;;  %v909_v38 = vadd.f32 %v3551_v23, %v908_v33  ;;  %v986_v23 = vmul.f32 %v3579_v48, %v3579_v48 }
 0x144   : > { %v910_v17 = vadd.f32 %v909_v38, %v3572_v42  ;;  %v1045_v54 = vadd.f32 %v1044_v37, %v982_v62  ;;  %v1411_v62 = vlaneseq (%p1135_p6)  ;;  %v1149_v38 = vld [vmem:[%s6061_s2] sm:$0x1] (%p1135_p6) }
 0x146   : > { %v1046_v43 = vadd.f32 %v1045_v54, %v983_v41  ;;  %v911_v29 = vadd.f32 %v910_v17, %v3586_v55  ;;  %v1412_v37 = vshrl.u32 (%p1135_p6), %v1411_v62, 7 }
 0x148   : > { %v912_v46 = vadd.f32 %v3565_v36, %v911_v29  ;;  %v1047_v0 = vadd.f32 %v1046_v43, %v984_v44  ;;  %v989_v36 = vmul.f32 %v3593_v63, %v3593_v63  ;;  %v1413_v17 = vsub.s32 (%p1135_p6), 0, %v1412_v37  ;;  %v1151_v43 = vld [vmem:[%s6062_s3] sm:$0x1] (%p1135_p6)  ;;  %v1155_v44 = vld [vmem:[%s6063_s4 + $0x8] sm:$0xff] (%p1135_p6) }
 0x149   : > { %v1154_v29 = vld [vmem:[%s6063_s4] sm:$0xff] (%p1135_p6) }
 0x14a   : > { %v1048_v47 = vadd.f32 %v1047_v0, %v985_v11  ;;  %v913_v49 = vadd.f32 %v3579_v48, %v912_v46  ;;  %v990_v48 = vmul.f32 %v3605_v12, %v3605_v12  ;;  %v1156_v11 = vld [vmem:[%s6063_s4 + $0x10] sm:$0xff] (%p1135_p6)  ;;  %v1157_v46 = vld [vmem:[%s6063_s4 + $0x18] sm:$0xff] (%p1135_p6)  ;;  %v1158_v0 = vld [vmem:[%s6063_s4 + $0x20] sm:$0xff] (%p1135_p6) }
 0x14c   : > { %v914_v42 = vadd.f32 %v913_v49, %v3600_v6  ;;  %v1049_v52 = vadd.f32 %v1048_v47, %v986_v23  ;;  %v1159_v49 = vld [vmem:[%s6063_s4 + $0x28] sm:$0xff] (%p1135_p6) }
 0x14e   : > { %v1050_v15 = vadd.f32 %v1049_v52, %v987_v51  ;;  %v915_v55 = vadd.f32 %v914_v42, %v3610_v18  ;;  %v1160_v42 = vld [vmem:[%s6063_s4 + $0x30] sm:$0xff] (%p1135_p6)  ;;  %v1161_v51 = vld [vmem:[%s6063_s4 + $0x38] sm:$0xff] (%p1135_p6)  ;;  %v1162_v52 = vld [vmem:[%s6063_s4 + $0x40] sm:$0xff] (%p1135_p6) }
 0x150   : > { %v916_v57 = vadd.f32 %v3593_v63, %v915_v55  ;;  %v1051_v58 = vadd.f32 %v1050_v15, %v988_v53  ;;  %v993_v63 = vmul.f32 %v3618_v24, %v3618_v24  ;;  %v1163_v15 = vld [vmem:[%s6063_s4 + $0x48] sm:$0xff] (%p1135_p6)  ;;  %v1164_v55 = vld [vmem:[%s6063_s4 + $0x50] sm:$0xff] (%p1135_p6) }
 0x152   : > { %v1052_v60 = vadd.f32 %v1051_v58, %v989_v36  ;;  %v917_v61 = vadd.f32 %v3605_v12, %v916_v57  ;;  %v994_v12 = vmul.f32 %v3634_v34, %v3634_v34 }
 0x154   : > { %v918_v6 = vadd.f32 %v917_v61, %v3626_v31  ;;  %v1053_v1 = vadd.f32 %v1052_v60, %v990_v48  ;;  %v1165_v48 = vld [vmem:[%s6063_s4 + $0x58] sm:$0xff] (%p1135_p6)  ;;  %v1166_v60 = vld [vmem:[%s6063_s4 + $0x60] sm:$0xff] (%p1135_p6)  ;;  %v1167_v61 = vld [vmem:[%s6063_s4 + $0x68] sm:$0xff] (%p1135_p6) }
 0x156   : > { %v1054_v10 = vadd.f32 %v1053_v1, %v991_v25  ;;  %v919_v18 = vadd.f32 %v918_v6, %v3642_v39 }
 0x158   : > { %v920_v3 = vadd.f32 %v3618_v24, %v919_v18  ;;  %v1055_v20 = vadd.f32 %v1054_v10, %v992_v2 }
 0x15a   : > { %v921_v7 = vadd.f32 %v3634_v34, %v920_v3  ;;  %v1056_v8 = vadd.f32 %v1055_v20, %v993_v63 }
 0x15c   : > { %v922_v31 = vrot.slane %v921_v7, 4  ;;  %v1057_v35 = vadd.f32 %v1056_v8, %v994_v12 }
 0x15e   : > { %v923_v9 = vadd.f32 %v922_v31, %v921_v7  ;;  %v1058_v13 = vrot.slane %v1057_v35, 4 }
 0x160   : > { %v924_v14 = vrot.slane %v923_v9, 2  ;;  %v1059_v45 = vadd.f32 %v1058_v13, %v1057_v35 }
 0x162   : > { %v925_v16 = vadd.f32 %v924_v14, %v923_v9  ;;  %v1060_v39 = vrot.slane %v1059_v45, 2 }
 0x164   : > { %v926_v30 = vrot.slane %v925_v16, 1  ;;  %v1061_v19 = vadd.f32 %v1060_v39, %v1059_v45 }
 0x166   : > { %v927_v40 = vadd.f32 %v926_v30, %v925_v16  ;;  %v1062_v24 = vrot.slane %v1061_v19, 1 }
 0x168   : > { %v928_v26 = vadd.f32 %v927_v40, %v858_v21  ;;  %v1063_v56 = vadd.f32 %v1062_v24, %v1061_v19  ;;  %1139 = sbr.rel (!%p1135_p6) target bundleno = 723 (0x2d3), region = 44 }
 0x16a   : > { %929 = vst [vmem:[#allocation2] sm:$0x1] %v928_v26  ;;  %v1064_v27 = vadd.f32 %v1063_v56, %v930_v22 }
 0x16c   : > { %1065 = vst [vmem:[#allocation3] sm:$0x1] %v1064_v27 }
 0x171   : > { %v1140_v34 = vld [vmem:[#allocation2] sm:$0x1] }
 0x172   : > { %v1141_v59 = vmul.f32 0.00048828125, %v1140_v34 }
 0x173   : > { %v1142_v28 = vld [vmem:[#allocation3] sm:$0x1] }
 0x174   : > { %v1143_v4 = vmul.f32 0.00048828125, %v1142_v28  ;;  %v1144_v32 = vmul.f32 %v1141_v59, %v1141_v59 }
 0x176   : > { %v1145_v50 = vsub.f32 %v1143_v4, %v1144_v32 }
 0x178   : > { %v1146_v33 = vmax.f32 %v1145_v50, 0.0 }
 0x17a   : > { %v1147_v5 = vadd.f32 1e-05, %v1146_v33 }
 0x17c   : > { %3257 = vrsqrt.f32 %v1147_v5 }
 0x189   : > { %v3258_v41 = vpop.eup %3257 }
 0x18a   : > { %v1150_v54 = vmul.f32 %v3258_v41, %v1149_v38 }
 0x18c   : > { %v1152_v23 = vmul.f32 %v1150_v54, %v1141_v59  ;;  %v3754_v47 = vrot.slane %v1150_v54, %v1413_v17 }
 0x18e   : > { %v1153_v53 = vsub.f32 %v1151_v43, %v1152_v23  ;;  %v1416_v36 = vmul.f32 %v3754_v47, %v1154_v29  ;;  %v1417_v57 = vmul.f32 %v3754_v47, %v1155_v44  ;;  %v1418_v58 = vmul.f32 %v3754_v47, %v1156_v11  ;;  %v1169_v43 = vld [vmem:[%s6063_s4 + $0x78] sm:$0xff]  ;;  %v1170_v29 = vld [vmem:[%s6063_s4 + $0x80] sm:$0xff] }
 0x18f   : > { %v1419_v6 = vmul.f32 %v3754_v47, %v1157_v46  ;;  %v1420_v25 = vmul.f32 %v3754_v47, %v1158_v0  ;;  %v1421_v1 = vmul.f32 %v3754_v47, %v1159_v49  ;;  %v1422_v10 = vmul.f32 %v3754_v47, %v1160_v42  ;;  %v1171_v49 = vld [vmem:[%s6063_s4 + $0x88] sm:$0xff] }
 0x190   : > { %v3790_v18 = vrot.slane %v1153_v53, %v1413_v17  ;;  %v1423_v2 = vmul.f32 %v3754_v47, %v1161_v51  ;;  %v1424_v63 = vmul.f32 %v3754_v47, %v1162_v52  ;;  %v1425_v3 = vmul.f32 %v3754_v47, %v1163_v15  ;;  %v1168_v17 = vld [vmem:[%s6063_s4 + $0x70] sm:$0xff]  ;;  %v1173_v53 = vld [vmem:[%s6063_s4 + $0x98] sm:$0xff] }
 0x191   : > { %v1426_v20 = vmul.f32 %v3754_v47, %v1164_v55  ;;  %v1427_v12 = vmul.f32 %v3754_v47, %v1165_v48  ;;  %v1428_v7 = vmul.f32 %v3754_v47, %v1166_v60  ;;  %v3799_v8 = vmul.f32 %v3754_v47, %v1167_v61  ;;  %v1172_v55 = vld [vmem:[%s6063_s4 + $0x90] sm:$0xff] }
 0x192   : > { %v1678_v31 = vadd.f32 %v3790_v18, %v1416_v36  ;;  %v1679_v35 = vadd.f32 %v3790_v18, %v1417_v57  ;;  %v1680_v9 = vadd.f32 %v3790_v18, %v1418_v58  ;;  %v1681_v13 = vadd.f32 %v3790_v18, %v1419_v6 }
 0x193   : > { %v1682_v14 = vadd.f32 %v3790_v18, %v1420_v25  ;;  %v1683_v45 = vadd.f32 %v3790_v18, %v1421_v1  ;;  %v1684_v16 = vadd.f32 %v3790_v18, %v1422_v10  ;;  %v1685_v39 = vadd.f32 %v3790_v18, %v1423_v2 }
 0x194   : > { %vm1934_vm2 = vcmp.ge.f32.partialorder %v1678_v31, 0.0  ;;  %v2190_v30 = vmul.f32 0.01, %v1678_v31  ;;  %vm1935_vm3 = vcmp.ge.f32.partialorder %v1679_v35, 0.0  ;;  %v2191_v19 = vmul.f32 0.01, %v1679_v35 }
 0x195   : > { %vm1936_vm4 = vcmp.ge.f32.partialorder %v1680_v9, 0.0  ;;  %v2192_v21 = vmul.f32 0.01, %v1680_v9  ;;  %vm1937_vm5 = vcmp.ge.f32.partialorder %v1681_v13, 0.0  ;;  %v2193_v40 = vmul.f32 0.01, %v1681_v13 }
 0x196   : > { %v2446_v24 = vsel %vm1934_vm2, %v1678_v31, %v2190_v30  ;;  %v2447_v22 = vsel %vm1935_vm3, %v1679_v35, %v2191_v19  ;;  %vm1938_vm6 = vcmp.ge.f32.partialorder %v1682_v14, 0.0  ;;  %v2194_v26 = vmul.f32 0.01, %v1682_v14  ;;  %v1177_v19 = vld [vmem:[%s6063_s4 + $0xb8] sm:$0xff] }
 0x197   : > { %2702 = vst.msk [vmem:[%s6063_s4] sm:$0xff] %vm1070_vm1, %v2446_v24  ;;  %2703 = vst.msk [vmem:[%s6063_s4 + $0x8] sm:$0xff] %vm1070_vm1, %v2447_v22  ;;  %v2448_v56 = vsel %vm1936_vm4, %v1680_v9, %v2192_v21  ;;  %v2449_v27 = vsel %vm1937_vm5, %v1681_v13, %v2193_v40  ;;  %vm1939_vm7 = vcmp.ge.f32.partialorder %v1683_v45, 0.0  ;;  %v2195_v34 = vmul.f32 0.01, %v1683_v45  ;;  %v1178_v21 = vld [vmem:[%s6063_s4 + $0xc0] sm:$0xff] }
 0x198   : > { %2704 = vst.msk [vmem:[%s6063_s4 + $0x10] sm:$0xff] %vm1070_vm1, %v2448_v56  ;;  %2705 = vst.msk [vmem:[%s6063_s4 + $0x18] sm:$0xff] %vm1070_vm1, %v2449_v27  ;;  %v2450_v28 = vsel %vm1938_vm6, %v1682_v14, %v2194_v26  ;;  %vm1940_vm8 = vcmp.ge.f32.partialorder %v1684_v16, 0.0  ;;  %v2196_v59 = vmul.f32 0.01, %v1684_v16  ;;  %vm1941_vm9 = vcmp.ge.f32.partialorder %v1685_v39, 0.0 }
 0x199   : > { %2706 = vst.msk [vmem:[%s6063_s4 + $0x20] sm:$0xff] %vm1070_vm1, %v2450_v28  ;;  %v2451_v4 = vsel %vm1939_vm7, %v1683_v45, %v2195_v34  ;;  %v2197_v32 = vmul.f32 0.01, %v1685_v39  ;;  %v1686_v50 = vadd.f32 %v3790_v18, %v1424_v63  ;;  %v1687_v33 = vadd.f32 %v3790_v18, %v1425_v3  ;;  %v1176_v14 = vld [vmem:[%s6063_s4 + $0xb0] sm:$0xff] }
 0x19a   : > { %2707 = vst.msk [vmem:[%s6063_s4 + $0x28] sm:$0xff] %vm1070_vm1, %v2451_v4  ;;  %v2452_v5 = vsel %vm1940_vm8, %v1684_v16, %v2196_v59  ;;  %v1688_v62 = vadd.f32 %v3790_v18, %v1426_v20  ;;  %v1689_v37 = vadd.f32 %v3790_v18, %v1427_v12  ;;  %v1690_v38 = vadd.f32 %v3790_v18, %v1428_v7  ;;  %v1174_v12 = vld [vmem:[%s6063_s4 + $0xa0] sm:$0xff]  ;;  %v1175_v7 = vld [vmem:[%s6063_s4 + $0xa8] sm:$0xff] }
 0x19b   : > { %2708 = vst.msk [vmem:[%s6063_s4 + $0x30] sm:$0xff] %vm1070_vm1, %v2452_v5  ;;  %v2453_v41 = vsel %vm1941_vm9, %v1685_v39, %v2197_v32  ;;  %vm1942_vm10 = vcmp.ge.f32.partialorder %v1686_v50, 0.0  ;;  %v2198_v54 = vmul.f32 0.01, %v1686_v50  ;;  %vm1943_vm11 = vcmp.ge.f32.partialorder %v1687_v33, 0.0  ;;  %v1179_v32 = vld [vmem:[%s6063_s4 + $0xc8] sm:$0xff] }
 0x19c   : > { %2709 = vst.msk [vmem:[%s6063_s4 + $0x38] sm:$0xff] %vm1070_vm1, %v2453_v41  ;;  %v2199_v44 = vmul.f32 0.01, %v1687_v33  ;;  %vm1944_vm12 = vcmp.ge.f32.partialorder %v1688_v62, 0.0  ;;  %v2200_v11 = vmul.f32 0.01, %v1688_v62  ;;  %v1691_v52 = vadd.f32 %v3790_v18, %v3799_v8 }
 0x19d   : > { %vm1945_vm13 = vcmp.ge.f32.partialorder %v1689_v37, 0.0  ;;  %v2454_v46 = vsel %vm1942_vm10, %v1686_v50, %v2198_v54  ;;  %v2201_v0 = vmul.f32 0.01, %v1689_v37  ;;  %vm1946_vm14 = vcmp.ge.f32.partialorder %v1690_v38, 0.0 }
 0x19e   : > { %v2202_v23 = vmul.f32 0.01, %v1690_v38  ;;  %2710 = vst.msk [vmem:[%s6063_s4 + $0x40] sm:$0xff] %vm1070_vm1, %v2454_v46  ;;  %v2455_v42 = vsel %vm1943_vm11, %v1687_v33, %v2199_v44  ;;  %v2456_v51 = vsel %vm1944_vm12, %v1688_v62, %v2200_v11  ;;  %v1430_v15 = vmul.f32 %v3754_v47, %v1168_v17  ;;  %v1180_v17 = vld [vmem:[%s6063_s4 + $0xd0] sm:$0xff]  ;;  %v1182_v44 = vld [vmem:[%s6063_s4 + $0xe0] sm:$0xff]  ;;  %v1183_v11 = vld [vmem:[%s6063_s4 + $0xe8] sm:$0xff] }
 0x19f   : > { %2711 = vst.msk [vmem:[%s6063_s4 + $0x48] sm:$0xff] %vm1070_vm1, %v2455_v42  ;;  %2712 = vst.msk [vmem:[%s6063_s4 + $0x50] sm:$0xff] %vm1070_vm1, %v2456_v51  ;;  %v2457_v36 = vsel %vm1945_vm13, %v1689_v37, %v2201_v0  ;;  %v1431_v58 = vmul.f32 %v3754_v47, %v1169_v43  ;;  %v1432_v48 = vmul.f32 %v3754_v47, %v1170_v29  ;;  %vm1947_vm15 = vcmp.ge.f32.partialorder %v1691_v52, 0.0  ;;  %v1181_v29 = vld [vmem:[%s6063_s4 + $0xd8] sm:$0xff] }
 0x1a0   : > { %v2458_v57 = vsel %vm1946_vm14, %v1690_v38, %v2202_v23  ;;  %2713 = vst.msk [vmem:[%s6063_s4 + $0x58] sm:$0xff] %vm1070_vm1, %v2457_v36  ;;  %v2203_v60 = vmul.f32 0.01, %v1691_v52  ;;  %v1692_v61 = vadd.f32 %v3790_v18, %v1430_v15  ;;  %v1433_v6 = vmul.f32 %v3754_v47, %v1171_v49 }
 0x1a1   : > { %2714 = vst.msk [vmem:[%s6063_s4 + $0x60] sm:$0xff] %vm1070_vm1, %v2458_v57  ;;  %v1693_v25 = vadd.f32 %v3790_v18, %v1431_v58  ;;  %v1694_v1 = vadd.f32 %v3790_v18, %v1432_v48  ;;  %v1434_v10 = vmul.f32 %v3754_v47, %v1172_v55  ;;  %v1435_v2 = vmul.f32 %v3754_v47, %v1173_v53  ;;  %v1185_v57 = vld [vmem:[%s6063_s4 + $0xf8] sm:$0xff] }
 0x1a2   : > { %v2459_v63 = vsel %vm1947_vm15, %v1691_v52, %v2203_v60  ;;  %vm1948_vm0 = vcmp.ge.f32.partialorder %v1692_v61, 0.0  ;;  %v2204_v3 = vmul.f32 0.01, %v1692_v61  ;;  %v1695_v20 = vadd.f32 %v3790_v18, %v1433_v6  ;;  %v1184_v52 = vld [vmem:[%s6063_s4 + $0xf0] sm:$0xff] }
 0x1a3   : > { %2715 = vst.msk [vmem:[%s6063_s4 + $0x68] sm:$0xff] %vm1070_vm1, %v2459_v63  ;;  %vm1949_vm2 = vcmp.ge.f32.partialorder %v1693_v25, 0.0  ;;  %v2205_v8 = vmul.f32 0.01, %v1693_v25  ;;  %vm1950_vm3 = vcmp.ge.f32.partialorder %v1694_v1, 0.0  ;;  %v1696_v13 = vadd.f32 %v3790_v18, %v1434_v10 }
 0x1a4   : > { %v2206_v31 = vmul.f32 0.01, %v1694_v1  ;;  %v2460_v35 = vsel %vm1948_vm0, %v1692_v61, %v2204_v3  ;;  %vm1951_vm4 = vcmp.ge.f32.partialorder %v1695_v20, 0.0  ;;  %v2207_v9 = vmul.f32 0.01, %v1695_v20  ;;  %v1186_v3 = vld [vmem:[%s6063_s4 + $0x100] sm:$0xff] }
 0x1a5   : > { %2716 = vst.msk [vmem:[%s6063_s4 + $0x70] sm:$0xff] %vm1070_vm1, %v2460_v35  ;;  %v2461_v45 = vsel %vm1949_vm2, %v1693_v25, %v2205_v8  ;;  %v1697_v39 = vadd.f32 %v3790_v18, %v1435_v2  ;;  %v1436_v30 = vmul.f32 %v3754_v47, %v1174_v12  ;;  %vm1952_vm5 = vcmp.ge.f32.partialorder %v1696_v13, 0.0 }
 0x1a6   : > { %v2462_v16 = vsel %vm1950_vm3, %v1694_v1, %v2206_v31  ;;  %2717 = vst.msk [vmem:[%s6063_s4 + $0x78] sm:$0xff] %vm1070_vm1, %v2461_v45  ;;  %v2463_v40 = vsel %vm1951_vm4, %v1695_v20, %v2207_v9  ;;  %v2208_v24 = vmul.f32 0.01, %v1696_v13  ;;  %v1437_v22 = vmul.f32 %v3754_v47, %v1175_v7  ;;  %v1187_v20 = vld [vmem:[%s6063_s4 + $0x108] sm:$0xff]  ;;  %v1188_v9 = vld [vmem:[%s6063_s4 + $0x110] sm:$0xff] }
 0x1a7   : > { %2718 = vst.msk [vmem:[%s6063_s4 + $0x80] sm:$0xff] %vm1070_vm1, %v2462_v16  ;;  %2719 = vst.msk [vmem:[%s6063_s4 + $0x88] sm:$0xff] %vm1070_vm1, %v2463_v40  ;;  %vm1953_vm6 = vcmp.ge.f32.partialorder %v1697_v39, 0.0  ;;  %v2209_v26 = vmul.f32 0.01, %v1697_v39  ;;  %v1698_v56 = vadd.f32 %v3790_v18, %v1436_v30  ;;  %v1438_v27 = vmul.f32 %v3754_v47, %v1176_v14  ;;  %v1190_v30 = vld [vmem:[%s6063_s4 + $0x120] sm:$0xff] }
 0x1a8   : > { %v2464_v34 = vsel %vm1952_vm5, %v1696_v13, %v2208_v24  ;;  %v1699_v28 = vadd.f32 %v3790_v18, %v1437_v22  ;;  %v1439_v59 = vmul.f32 %v3754_v47, %v1177_v19  ;;  %v1440_v4 = vmul.f32 %v3754_v47, %v1178_v21 }
 0x1a9   : > { %2720 = vst.msk [vmem:[%s6063_s4 + $0x90] sm:$0xff] %vm1070_vm1, %v2464_v34  ;;  %v2465_v50 = vsel %vm1953_vm6, %v1697_v39, %v2209_v26  ;;  %vm1954_vm7 = vcmp.ge.f32.partialorder %v1698_v56, 0.0  ;;  %v2210_v33 = vmul.f32 0.01, %v1698_v56  ;;  %v1700_v5 = vadd.f32 %v3790_v18, %v1438_v27  ;;  %v1189_v39 = vld [vmem:[%s6063_s4 + $0x118] sm:$0xff] }
 0x1aa   : > { %2721 = vst.msk [vmem:[%s6063_s4 + $0x98] sm:$0xff] %vm1070_vm1, %v2465_v50  ;;  %vm1955_vm8 = vcmp.ge.f32.partialorder %v1699_v28, 0.0  ;;  %v2211_v62 = vmul.f32 0.01, %v1699_v28  ;;  %v1701_v37 = vadd.f32 %v3790_v18, %v1439_v59  ;;  %v1702_v38 = vadd.f32 %v3790_v18, %v1440_v4  ;;  %v1191_v59 = vld [vmem:[%s6063_s4 + $0x128] sm:$0xff] }
 0x1ab   : > { %v2466_v41 = vsel %vm1954_vm7, %v1698_v56, %v2210_v33  ;;  %vm1956_vm9 = vcmp.ge.f32.partialorder %v1700_v5, 0.0  ;;  %v2212_v54 = vmul.f32 0.01, %v1700_v5  ;;  %v1441_v43 = vmul.f32 %v3754_v47, %v1179_v32 }
 0x1ac   : > { %2722 = vst.msk [vmem:[%s6063_s4 + $0xa0] sm:$0xff] %vm1070_vm1, %v2466_v41  ;;  %v2467_v46 = vsel %vm1955_vm8, %v1699_v28, %v2211_v62  ;;  %vm1957_vm10 = vcmp.ge.f32.partialorder %v1701_v37, 0.0  ;;  %v2213_v0 = vmul.f32 0.01, %v1701_v37  ;;  %vm1958_vm11 = vcmp.ge.f32.partialorder %v1702_v38, 0.0 }
 0x1ad   : > { %2723 = vst.msk [vmem:[%s6063_s4 + $0xa8] sm:$0xff] %vm1070_vm1, %v2467_v46  ;;  %v2468_v23 = vsel %vm1956_vm9, %v1700_v5, %v2212_v54  ;;  %v2214_v49 = vmul.f32 0.01, %v1702_v38  ;;  %v1703_v42 = vadd.f32 %v3790_v18, %v1441_v43  ;;  %v1442_v51 = vmul.f32 %v3754_v47, %v1180_v17  ;;  %v1193_v54 = vld [vmem:[%s6063_s4 + $0x138] sm:$0xff]  ;;  %v1194_v43 = vld [vmem:[%s6063_s4 + $0x140] sm:$0xff] }
 0x1ae   : > { %2724 = vst.msk [vmem:[%s6063_s4 + $0xb0] sm:$0xff] %vm1070_vm1, %v2468_v23  ;;  %v2469_v15 = vsel %vm1957_vm10, %v1701_v37, %v2213_v0  ;;  %v1443_v55 = vmul.f32 %v3754_v47, %v1181_v29  ;;  %v1444_v53 = vmul.f32 %v3754_v47, %v1182_v44  ;;  %v1445_v36 = vmul.f32 %v3754_v47, %v1183_v11  ;;  %v1192_v37 = vld [vmem:[%s6063_s4 + $0x130] sm:$0xff]  ;;  %v1195_v29 = vld [vmem:[%s6063_s4 + $0x148] sm:$0xff] }
 0x1af   : > { %2725 = vst.msk [vmem:[%s6063_s4 + $0xb8] sm:$0xff] %vm1070_vm1, %v2469_v15  ;;  %v2470_v58 = vsel %vm1958_vm11, %v1702_v38, %v2214_v49  ;;  %vm1959_vm12 = vcmp.ge.f32.partialorder %v1703_v42, 0.0  ;;  %v2215_v48 = vmul.f32 0.01, %v1703_v42  ;;  %v1704_v60 = vadd.f32 %v3790_v18, %v1442_v51 }
 0x1b0   : > { %2726 = vst.msk [vmem:[%s6063_s4 + $0xc0] sm:$0xff] %vm1070_vm1, %v2470_v58  ;;  %v1705_v61 = vadd.f32 %v3790_v18, %v1443_v55  ;;  %v1706_v6 = vadd.f32 %v3790_v18, %v1444_v53  ;;  %v1707_v25 = vadd.f32 %v3790_v18, %v1445_v36  ;;  %v1446_v1 = vmul.f32 %v3754_v47, %v1184_v52  ;;  %v1197_v53 = vld [vmem:[%s6063_s4 + $0x158] sm:$0xff] }
 0x1b1   : > { %v2471_v10 = vsel %vm1959_vm12, %v1703_v42, %v2215_v48  ;;  %vm1960_vm13 = vcmp.ge.f32.partialorder %v1704_v60, 0.0  ;;  %v2216_v2 = vmul.f32 0.01, %v1704_v60  ;;  %v1447_v63 = vmul.f32 %v3754_v47, %v1185_v57  ;;  %v1196_v42 = vld [vmem:[%s6063_s4 + $0x150] sm:$0xff] }
 0x1b2   : > { %2727 = vst.msk [vmem:[%s6063_s4 + $0xc8] sm:$0xff] %vm1070_vm1, %v2471_v10  ;;  %vm1961_vm14 = vcmp.ge.f32.partialorder %v1705_v61, 0.0  ;;  %v2217_v12 = vmul.f32 0.01, %v1705_v61  ;;  %vm1962_vm15 = vcmp.ge.f32.partialorder %v1706_v6, 0.0  ;;  %vm1963_vm0 = vcmp.ge.f32.partialorder %v1707_v25, 0.0 }
 0x1b3   : > { %v2218_v7 = vmul.f32 0.01, %v1706_v6  ;;  %v2472_v8 = vsel %vm1960_vm13, %v1704_v60, %v2216_v2  ;;  %v2219_v31 = vmul.f32 0.01, %v1707_v25  ;;  %v1708_v35 = vadd.f32 %v3790_v18, %v1446_v1  ;;  %v1198_v2 = vld [vmem:[%s6063_s4 + $0x160] sm:$0xff] }
 0x1b4   : > { %2728 = vst.msk [vmem:[%s6063_s4 + $0xd0] sm:$0xff] %vm1070_vm1, %v2472_v8  ;;  %v2473_v13 = vsel %vm1961_vm14, %v1705_v61, %v2217_v12  ;;  %v1709_v45 = vadd.f32 %v3790_v18, %v1447_v63  ;;  %v1448_v16 = vmul.f32 %v3754_v47, %v1186_v3  ;;  %v1449_v40 = vmul.f32 %v3754_v47, %v1187_v20  ;;  %v1199_v63 = vld [vmem:[%s6063_s4 + $0x168] sm:$0xff] }
 0x1b5   : > { %v2474_v14 = vsel %vm1962_vm15, %v1706_v6, %v2218_v7  ;;  %2729 = vst.msk [vmem:[%s6063_s4 + $0xd8] sm:$0xff] %vm1070_vm1, %v2473_v13  ;;  %v2475_v19 = vsel %vm1963_vm0, %v1707_v25, %v2219_v31  ;;  %vm1964_vm2 = vcmp.ge.f32.partialorder %v1708_v35, 0.0  ;;  %v2220_v21 = vmul.f32 0.01, %v1708_v35  ;;  %v1200_v31 = vld [vmem:[%s6063_s4 + $0x170] sm:$0xff] }
 0x1b6   : > { %2730 = vst.msk [vmem:[%s6063_s4 + $0xe0] sm:$0xff] %vm1070_vm1, %v2474_v14  ;;  %2731 = vst.msk [vmem:[%s6063_s4 + $0xe8] sm:$0xff] %vm1070_vm1, %v2475_v19  ;;  %vm1965_vm3 = vcmp.ge.f32.partialorder %v1709_v45, 0.0  ;;  %v2221_v24 = vmul.f32 0.01, %v1709_v45  ;;  %v1710_v22 = vadd.f32 %v3790_v18, %v1448_v16  ;;  %v1450_v26 = vmul.f32 %v3754_v47, %v1188_v9  ;;  %v1202_v16 = vld [vmem:[%s6063_s4 + $0x180] sm:$0xff] }
 0x1b7   : > { %v2476_v56 = vsel %vm1964_vm2, %v1708_v35, %v2220_v21  ;;  %v1711_v27 = vadd.f32 %v3790_v18, %v1449_v40  ;;  %v1451_v34 = vmul.f32 %v3754_v47, %v1189_v39  ;;  %v1452_v28 = vmul.f32 %v3754_v47, %v1190_v30 }
 0x1b8   : > { %2732 = vst.msk [vmem:[%s6063_s4 + $0xf0] sm:$0xff] %vm1070_vm1, %v2476_v56  ;;  %v2477_v4 = vsel %vm1965_vm3, %v1709_v45, %v2221_v24  ;;  %vm1966_vm4 = vcmp.ge.f32.partialorder %v1710_v22, 0.0  ;;  %v2222_v32 = vmul.f32 0.01, %v1710_v22  ;;  %v1712_v50 = vadd.f32 %v3790_v18, %v1450_v26  ;;  %v1201_v45 = vld [vmem:[%s6063_s4 + $0x178] sm:$0xff] }
 0x1b9   : > { %2733 = vst.msk [vmem:[%s6063_s4 + $0xf8] sm:$0xff] %vm1070_vm1, %v2477_v4  ;;  %vm1967_vm5 = vcmp.ge.f32.partialorder %v1711_v27, 0.0  ;;  %v2223_v33 = vmul.f32 0.01, %v1711_v27  ;;  %v1713_v5 = vadd.f32 %v3790_v18, %v1451_v34  ;;  %v1714_v62 = vadd.f32 %v3790_v18, %v1452_v28  ;;  %v1203_v34 = vld [vmem:[%s6063_s4 + $0x188] sm:$0xff] }
 0x1ba   : > { %v2478_v38 = vsel %vm1966_vm4, %v1710_v22, %v2222_v32  ;;  %vm1968_vm6 = vcmp.ge.f32.partialorder %v1712_v50, 0.0  ;;  %v2224_v17 = vmul.f32 0.01, %v1712_v50  ;;  %v1453_v41 = vmul.f32 %v3754_v47, %v1191_v59 }
 0x1bb   : > { %2734 = vst.msk [vmem:[%s6063_s4 + $0x100] sm:$0xff] %vm1070_vm1, %v2478_v38  ;;  %v2479_v44 = vsel %vm1967_vm5, %v1711_v27, %v2223_v33  ;;  %vm1969_vm7 = vcmp.ge.f32.partialorder %v1713_v5, 0.0  ;;  %v2225_v11 = vmul.f32 0.01, %v1713_v5  ;;  %vm1970_vm8 = vcmp.ge.f32.partialorder %v1714_v62, 0.0 }
 0x1bc   : > { %2735 = vst.msk [vmem:[%s6063_s4 + $0x108] sm:$0xff] %vm1070_vm1, %v2479_v44  ;;  %v2480_v46 = vsel %vm1968_vm6, %v1712_v50, %v2224_v17  ;;  %v2226_v0 = vmul.f32 0.01, %v1714_v62  ;;  %v1715_v23 = vadd.f32 %v3790_v18, %v1453_v41  ;;  %v1454_v49 = vmul.f32 %v3754_v47, %v1192_v37  ;;  %v1205_v17 = vld [vmem:[%s6063_s4 + $0x198] sm:$0xff]  ;;  %v1206_v41 = vld [vmem:[%s6063_s4 + $0x1a0] sm:$0xff] }
 0x1bd   : > { %2736 = vst.msk [vmem:[%s6063_s4 + $0x110] sm:$0xff] %vm1070_vm1, %v2480_v46  ;;  %v2481_v51 = vsel %vm1969_vm7, %v1713_v5, %v2225_v11  ;;  %v1455_v52 = vmul.f32 %v3754_v47, %v1193_v54  ;;  %v1456_v15 = vmul.f32 %v3754_v47, %v1194_v43  ;;  %v1457_v55 = vmul.f32 %v3754_v47, %v1195_v29  ;;  %v1204_v5 = vld [vmem:[%s6063_s4 + $0x190] sm:$0xff]  ;;  %v1207_v54 = vld [vmem:[%s6063_s4 + $0x1a8] sm:$0xff] }
 0x1be   : > { %2737 = vst.msk [vmem:[%s6063_s4 + $0x118] sm:$0xff] %vm1070_vm1, %v2481_v51  ;;  %v2482_v36 = vsel %vm1970_vm8, %v1714_v62, %v2226_v0  ;;  %vm1971_vm9 = vcmp.ge.f32.partialorder %v1715_v23, 0.0  ;;  %v2227_v57 = vmul.f32 0.01, %v1715_v23  ;;  %v1716_v58 = vadd.f32 %v3790_v18, %v1454_v49 }
 0x1bf   : > { %2738 = vst.msk [vmem:[%s6063_s4 + $0x120] sm:$0xff] %vm1070_vm1, %v2482_v36  ;;  %v1717_v48 = vadd.f32 %v3790_v18, %v1455_v52  ;;  %v1718_v60 = vadd.f32 %v3790_v18, %v1456_v15  ;;  %v1719_v61 = vadd.f32 %v3790_v18, %v1457_v55  ;;  %v1458_v6 = vmul.f32 %v3754_v47, %v1196_v42  ;;  %v1209_v15 = vld [vmem:[%s6063_s4 + $0x1b8] sm:$0xff] }
 0x1c0   : > { %v2483_v25 = vsel %vm1971_vm9, %v1715_v23, %v2227_v57  ;;  %vm1972_vm10 = vcmp.ge.f32.partialorder %v1716_v58, 0.0  ;;  %v2228_v1 = vmul.f32 0.01, %v1716_v58  ;;  %v1459_v10 = vmul.f32 %v3754_v47, %v1197_v53  ;;  %v1208_v23 = vld [vmem:[%s6063_s4 + $0x1b0] sm:$0xff] }
 0x1c1   : > { %2739 = vst.msk [vmem:[%s6063_s4 + $0x128] sm:$0xff] %vm1070_vm1, %v2483_v25  ;;  %vm1973_vm11 = vcmp.ge.f32.partialorder %v1717_v48, 0.0  ;;  %v2229_v3 = vmul.f32 0.01, %v1717_v48  ;;  %vm1974_vm12 = vcmp.ge.f32.partialorder %v1718_v60, 0.0  ;;  %vm1975_vm13 = vcmp.ge.f32.partialorder %v1719_v61, 0.0 }
 0x1c2   : > { %v2230_v20 = vmul.f32 0.01, %v1718_v60  ;;  %v2484_v12 = vsel %vm1972_vm10, %v1716_v58, %v2228_v1  ;;  %v2231_v7 = vmul.f32 0.01, %v1719_v61  ;;  %v1720_v8 = vadd.f32 %v3790_v18, %v1458_v6  ;;  %v1210_v1 = vld [vmem:[%s6063_s4 + $0x1c0] sm:$0xff] }
 0x1c3   : > { %2740 = vst.msk [vmem:[%s6063_s4 + $0x130] sm:$0xff] %vm1070_vm1, %v2484_v12  ;;  %v2485_v35 = vsel %vm1973_vm11, %v1717_v48, %v2229_v3  ;;  %v1721_v13 = vadd.f32 %v3790_v18, %v1459_v10  ;;  %v1460_v14 = vmul.f32 %v3754_v47, %v1198_v2  ;;  %v1461_v19 = vmul.f32 %v3754_v47, %v1199_v63  ;;  %v1211_v10 = vld [vmem:[%s6063_s4 + $0x1c8] sm:$0xff] }
 0x1c4   : > { %v2486_v9 = vsel %vm1974_vm12, %v1718_v60, %v2230_v20  ;;  %2741 = vst.msk [vmem:[%s6063_s4 + $0x138] sm:$0xff] %vm1070_vm1, %v2485_v35  ;;  %v2487_v39 = vsel %vm1975_vm13, %v1719_v61, %v2231_v7  ;;  %vm1976_vm14 = vcmp.ge.f32.partialorder %v1720_v8, 0.0  ;;  %v2232_v30 = vmul.f32 0.01, %v1720_v8  ;;  %v1212_v7 = vld [vmem:[%s6063_s4 + $0x1d0] sm:$0xff] }
 0x1c5   : > { %2742 = vst.msk [vmem:[%s6063_s4 + $0x140] sm:$0xff] %vm1070_vm1, %v2486_v9  ;;  %2743 = vst.msk [vmem:[%s6063_s4 + $0x148] sm:$0xff] %vm1070_vm1, %v2487_v39  ;;  %vm1977_vm15 = vcmp.ge.f32.partialorder %v1721_v13, 0.0  ;;  %v2233_v21 = vmul.f32 0.01, %v1721_v13  ;;  %v1722_v40 = vadd.f32 %v3790_v18, %v1460_v14  ;;  %v1462_v24 = vmul.f32 %v3754_v47, %v1200_v31  ;;  %v1214_v14 = vld [vmem:[%s6063_s4 + $0x1e0] sm:$0xff] }
 0x1c6   : > { %v2488_v22 = vsel %vm1976_vm14, %v1720_v8, %v2232_v30  ;;  %v1723_v26 = vadd.f32 %v3790_v18, %v1461_v19  ;;  %v1463_v56 = vmul.f32 %v3754_v47, %v1201_v45  ;;  %v1464_v27 = vmul.f32 %v3754_v47, %v1202_v16 }
 0x1c7   : > { %2744 = vst.msk [vmem:[%s6063_s4 + $0x150] sm:$0xff] %vm1070_vm1, %v2488_v22  ;;  %v2489_v28 = vsel %vm1977_vm15, %v1721_v13, %v2233_v21  ;;  %vm1978_vm0 = vcmp.ge.f32.partialorder %v1722_v40, 0.0  ;;  %v2234_v59 = vmul.f32 0.01, %v1722_v40  ;;  %v1724_v4 = vadd.f32 %v3790_v18, %v1462_v24  ;;  %v1213_v13 = vld [vmem:[%s6063_s4 + $0x1d8] sm:$0xff] }
 0x1c8   : > { %2745 = vst.msk [vmem:[%s6063_s4 + $0x158] sm:$0xff] %vm1070_vm1, %v2489_v28  ;;  %vm1979_vm2 = vcmp.ge.f32.partialorder %v1723_v26, 0.0  ;;  %v2235_v32 = vmul.f32 0.01, %v1723_v26  ;;  %v1725_v50 = vadd.f32 %v3790_v18, %v1463_v56  ;;  %v1726_v33 = vadd.f32 %v3790_v18, %v1464_v27  ;;  %v1215_v56 = vld [vmem:[%s6063_s4 + $0x1e8] sm:$0xff] }
 0x1c9   : > { %v2490_v62 = vsel %vm1978_vm0, %v1722_v40, %v2234_v59  ;;  %vm1980_vm3 = vcmp.ge.f32.partialorder %v1724_v4, 0.0  ;;  %v2236_v37 = vmul.f32 0.01, %v1724_v4  ;;  %v1465_v38 = vmul.f32 %v3754_v47, %v1203_v34 }
 0x1ca   : > { %2746 = vst.msk [vmem:[%s6063_s4 + $0x160] sm:$0xff] %vm1070_vm1, %v2490_v62  ;;  %v2491_v43 = vsel %vm1979_vm2, %v1723_v26, %v2235_v32  ;;  %vm1981_vm4 = vcmp.ge.f32.partialorder %v1725_v50, 0.0  ;;  %v2237_v29 = vmul.f32 0.01, %v1725_v50  ;;  %vm1982_vm5 = vcmp.ge.f32.partialorder %v1726_v33, 0.0 }
 0x1cb   : > { %2747 = vst.msk [vmem:[%s6063_s4 + $0x168] sm:$0xff] %vm1070_vm1, %v2491_v43  ;;  %v2492_v44 = vsel %vm1980_vm3, %v1724_v4, %v2236_v37  ;;  %v2238_v11 = vmul.f32 0.01, %v1726_v33  ;;  %v1727_v46 = vadd.f32 %v3790_v18, %v1465_v38  ;;  %v1466_v0 = vmul.f32 %v3754_v47, %v1204_v5  ;;  %v1217_v37 = vld [vmem:[%s6063_s4 + $0x1f8] sm:$0xff]  ;;  %v1218_v38 = vld [vmem:[%s6063_s4 + $0x200] sm:$0xff] }
 0x1cc   : > { %2748 = vst.msk [vmem:[%s6063_s4 + $0x170] sm:$0xff] %vm1070_vm1, %v2492_v44  ;;  %v2493_v49 = vsel %vm1981_vm4, %v1725_v50, %v2237_v29  ;;  %v1467_v42 = vmul.f32 %v3754_v47, %v1205_v17  ;;  %v1468_v51 = vmul.f32 %v3754_v47, %v1206_v41  ;;  %v1469_v52 = vmul.f32 %v3754_v47, %v1207_v54  ;;  %v1216_v50 = vld [vmem:[%s6063_s4 + $0x1f0] sm:$0xff]  ;;  %v1219_v17 = vld [vmem:[%s6063_s4 + $0x208] sm:$0xff] }
 0x1cd   : > { %2749 = vst.msk [vmem:[%s6063_s4 + $0x178] sm:$0xff] %vm1070_vm1, %v2493_v49  ;;  %v2494_v55 = vsel %vm1982_vm5, %v1726_v33, %v2238_v11  ;;  %vm1983_vm6 = vcmp.ge.f32.partialorder %v1727_v46, 0.0  ;;  %v2239_v53 = vmul.f32 0.01, %v1727_v46  ;;  %v1728_v36 = vadd.f32 %v3790_v18, %v1466_v0 }
 0x1ce   : > { %2750 = vst.msk [vmem:[%s6063_s4 + $0x180] sm:$0xff] %vm1070_vm1, %v2494_v55  ;;  %v1729_v57 = vadd.f32 %v3790_v18, %v1467_v42  ;;  %v1730_v58 = vadd.f32 %v3790_v18, %v1468_v51  ;;  %v1731_v48 = vadd.f32 %v3790_v18, %v1469_v52  ;;  %v1470_v60 = vmul.f32 %v3754_v47, %v1208_v23  ;;  %v1221_v51 = vld [vmem:[%s6063_s4 + $0x218] sm:$0xff] }
 0x1cf   : > { %v2495_v61 = vsel %vm1983_vm6, %v1727_v46, %v2239_v53  ;;  %vm1984_vm7 = vcmp.ge.f32.partialorder %v1728_v36, 0.0  ;;  %v2240_v6 = vmul.f32 0.01, %v1728_v36  ;;  %v1471_v25 = vmul.f32 %v3754_v47, %v1209_v15  ;;  %v1220_v46 = vld [vmem:[%s6063_s4 + $0x210] sm:$0xff] }
 0x1d0   : > { %2751 = vst.msk [vmem:[%s6063_s4 + $0x188] sm:$0xff] %vm1070_vm1, %v2495_v61  ;;  %vm1985_vm8 = vcmp.ge.f32.partialorder %v1729_v57, 0.0  ;;  %v2241_v2 = vmul.f32 0.01, %v1729_v57  ;;  %vm1986_vm9 = vcmp.ge.f32.partialorder %v1730_v58, 0.0  ;;  %vm1987_vm10 = vcmp.ge.f32.partialorder %v1731_v48, 0.0 }
 0x1d1   : > { %v2242_v63 = vmul.f32 0.01, %v1730_v58  ;;  %v2496_v3 = vsel %vm1984_vm7, %v1728_v36, %v2240_v6  ;;  %v2243_v20 = vmul.f32 0.01, %v1731_v48  ;;  %v1732_v12 = vadd.f32 %v3790_v18, %v1470_v60  ;;  %v1222_v6 = vld [vmem:[%s6063_s4 + $0x220] sm:$0xff] }
 0x1d2   : > { %2752 = vst.msk [vmem:[%s6063_s4 + $0x190] sm:$0xff] %vm1070_vm1, %v2496_v3  ;;  %v2497_v8 = vsel %vm1985_vm8, %v1729_v57, %v2241_v2  ;;  %v1733_v35 = vadd.f32 %v3790_v18, %v1471_v25  ;;  %v1472_v9 = vmul.f32 %v3754_v47, %v1210_v1  ;;  %v1473_v39 = vmul.f32 %v3754_v47, %v1211_v10  ;;  %v1223_v25 = vld [vmem:[%s6063_s4 + $0x228] sm:$0xff] }
 0x1d3   : > { %v2498_v31 = vsel %vm1986_vm9, %v1730_v58, %v2242_v63  ;;  %2753 = vst.msk [vmem:[%s6063_s4 + $0x198] sm:$0xff] %vm1070_vm1, %v2497_v8  ;;  %v2499_v45 = vsel %vm1987_vm10, %v1731_v48, %v2243_v20  ;;  %vm1988_vm11 = vcmp.ge.f32.partialorder %v1732_v12, 0.0  ;;  %v2244_v16 = vmul.f32 0.01, %v1732_v12  ;;  %v1224_v20 = vld [vmem:[%s6063_s4 + $0x230] sm:$0xff] }
 0x1d4   : > { %2754 = vst.msk [vmem:[%s6063_s4 + $0x1a0] sm:$0xff] %vm1070_vm1, %v2498_v31  ;;  %2755 = vst.msk [vmem:[%s6063_s4 + $0x1a8] sm:$0xff] %vm1070_vm1, %v2499_v45  ;;  %vm1989_vm12 = vcmp.ge.f32.partialorder %v1733_v35, 0.0  ;;  %v2245_v30 = vmul.f32 0.01, %v1733_v35  ;;  %v1734_v19 = vadd.f32 %v3790_v18, %v1472_v9  ;;  %v1474_v21 = vmul.f32 %v3754_v47, %v1212_v7  ;;  %v1226_v9 = vld [vmem:[%s6063_s4 + $0x240] sm:$0xff] }
 0x1d5   : > { %v2500_v40 = vsel %vm1988_vm11, %v1732_v12, %v2244_v16  ;;  %v1735_v24 = vadd.f32 %v3790_v18, %v1473_v39  ;;  %v1475_v22 = vmul.f32 %v3754_v47, %v1213_v13  ;;  %v1476_v26 = vmul.f32 %v3754_v47, %v1214_v14 }
 0x1d6   : > { %2756 = vst.msk [vmem:[%s6063_s4 + $0x1b0] sm:$0xff] %vm1070_vm1, %v2500_v40  ;;  %v2501_v27 = vsel %vm1989_vm12, %v1733_v35, %v2245_v30  ;;  %vm1990_vm13 = vcmp.ge.f32.partialorder %v1734_v19, 0.0  ;;  %v2246_v34 = vmul.f32 0.01, %v1734_v19  ;;  %v1736_v28 = vadd.f32 %v3790_v18, %v1474_v21  ;;  %v1225_v35 = vld [vmem:[%s6063_s4 + $0x238] sm:$0xff] }
 0x1d7   : > { %2757 = vst.msk [vmem:[%s6063_s4 + $0x1b8] sm:$0xff] %vm1070_vm1, %v2501_v27  ;;  %vm1991_vm14 = vcmp.ge.f32.partialorder %v1735_v24, 0.0  ;;  %v2247_v59 = vmul.f32 0.01, %v1735_v24  ;;  %v1737_v4 = vadd.f32 %v3790_v18, %v1475_v22  ;;  %v1738_v32 = vadd.f32 %v3790_v18, %v1476_v26  ;;  %v1227_v22 = vld [vmem:[%s6063_s4 + $0x248] sm:$0xff] }
 0x1d8   : > { %v2502_v33 = vsel %vm1990_vm13, %v1734_v19, %v2246_v34  ;;  %vm1992_vm15 = vcmp.ge.f32.partialorder %v1736_v28, 0.0  ;;  %v2248_v5 = vmul.f32 0.01, %v1736_v28  ;;  %v1477_v62 = vmul.f32 %v3754_v47, %v1215_v56 }
 0x1d9   : > { %2758 = vst.msk [vmem:[%s6063_s4 + $0x1c0] sm:$0xff] %vm1070_vm1, %v2502_v33  ;;  %v2503_v41 = vsel %vm1991_vm14, %v1735_v24, %v2247_v59  ;;  %vm1993_vm0 = vcmp.ge.f32.partialorder %v1737_v4, 0.0  ;;  %v2249_v54 = vmul.f32 0.01, %v1737_v4  ;;  %vm1994_vm2 = vcmp.ge.f32.partialorder %v1738_v32, 0.0 }
 0x1da   : > { %2759 = vst.msk [vmem:[%s6063_s4 + $0x1c8] sm:$0xff] %vm1070_vm1, %v2503_v41  ;;  %v2504_v43 = vsel %vm1992_vm15, %v1736_v28, %v2248_v5  ;;  %v2250_v29 = vmul.f32 0.01, %v1738_v32  ;;  %v1739_v44 = vadd.f32 %v3790_v18, %v1477_v62  ;;  %v1478_v11 = vmul.f32 %v3754_v47, %v1216_v50  ;;  %v1229_v5 = vld [vmem:[%s6063_s4 + $0x258] sm:$0xff]  ;;  %v1230_v62 = vld [vmem:[%s6063_s4 + $0x260] sm:$0xff] }
 0x1db   : > { %2760 = vst.msk [vmem:[%s6063_s4 + $0x1d0] sm:$0xff] %vm1070_vm1, %v2504_v43  ;;  %v2505_v0 = vsel %vm1993_vm0, %v1737_v4, %v2249_v54  ;;  %v1479_v23 = vmul.f32 %v3754_v47, %v1217_v37  ;;  %v1480_v49 = vmul.f32 %v3754_v47, %v1218_v38  ;;  %v1481_v42 = vmul.f32 %v3754_v47, %v1219_v17  ;;  %v1228_v4 = vld [vmem:[%s6063_s4 + $0x250] sm:$0xff]  ;;  %v1231_v37 = vld [vmem:[%s6063_s4 + $0x268] sm:$0xff] }
 0x1dc   : > { %2761 = vst.msk [vmem:[%s6063_s4 + $0x1d8] sm:$0xff] %vm1070_vm1, %v2505_v0  ;;  %v2506_v52 = vsel %vm1994_vm2, %v1738_v32, %v2250_v29  ;;  %vm1995_vm3 = vcmp.ge.f32.partialorder %v1739_v44, 0.0  ;;  %v2251_v15 = vmul.f32 0.01, %v1739_v44  ;;  %v1740_v55 = vadd.f32 %v3790_v18, %v1478_v11 }
 0x1dd   : > { %2762 = vst.msk [vmem:[%s6063_s4 + $0x1e0] sm:$0xff] %vm1070_vm1, %v2506_v52  ;;  %v1741_v53 = vadd.f32 %v3790_v18, %v1479_v23  ;;  %v1742_v36 = vadd.f32 %v3790_v18, %v1480_v49  ;;  %v1743_v57 = vadd.f32 %v3790_v18, %v1481_v42  ;;  %v1482_v58 = vmul.f32 %v3754_v47, %v1220_v46  ;;  %v1233_v49 = vld [vmem:[%s6063_s4 + $0x278] sm:$0xff] }
 0x1de   : > { %v2507_v48 = vsel %vm1995_vm3, %v1739_v44, %v2251_v15  ;;  %vm1996_vm4 = vcmp.ge.f32.partialorder %v1740_v55, 0.0  ;;  %v2252_v60 = vmul.f32 0.01, %v1740_v55  ;;  %v1483_v61 = vmul.f32 %v3754_v47, %v1221_v51  ;;  %v1232_v44 = vld [vmem:[%s6063_s4 + $0x270] sm:$0xff] }
 0x1df   : > { %2763 = vst.msk [vmem:[%s6063_s4 + $0x1e8] sm:$0xff] %vm1070_vm1, %v2507_v48  ;;  %vm1997_vm5 = vcmp.ge.f32.partialorder %v1741_v53, 0.0  ;;  %v2253_v1 = vmul.f32 0.01, %v1741_v53  ;;  %vm1998_vm6 = vcmp.ge.f32.partialorder %v1742_v36, 0.0  ;;  %vm1999_vm7 = vcmp.ge.f32.partialorder %v1743_v57, 0.0 }
 0x1e0   : > { %v2254_v10 = vmul.f32 0.01, %v1742_v36  ;;  %v2508_v2 = vsel %vm1996_vm4, %v1740_v55, %v2252_v60  ;;  %v2255_v63 = vmul.f32 0.01, %v1743_v57  ;;  %v1744_v3 = vadd.f32 %v3790_v18, %v1482_v58  ;;  %v1234_v60 = vld [vmem:[%s6063_s4 + $0x280] sm:$0xff] }
 0x1e1   : > { %2764 = vst.msk [vmem:[%s6063_s4 + $0x1f0] sm:$0xff] %vm1070_vm1, %v2508_v2  ;;  %v2509_v12 = vsel %vm1997_vm5, %v1741_v53, %v2253_v1  ;;  %v1745_v8 = vadd.f32 %v3790_v18, %v1483_v61  ;;  %v1484_v31 = vmul.f32 %v3754_v47, %v1222_v6  ;;  %v1485_v45 = vmul.f32 %v3754_v47, %v1223_v25  ;;  %v1235_v61 = vld [vmem:[%s6063_s4 + $0x288] sm:$0xff] }
 0x1e2   : > { %v2510_v7 = vsel %vm1998_vm6, %v1742_v36, %v2254_v10  ;;  %2765 = vst.msk [vmem:[%s6063_s4 + $0x1f8] sm:$0xff] %vm1070_vm1, %v2509_v12  ;;  %v2511_v13 = vsel %vm1999_vm7, %v1743_v57, %v2255_v63  ;;  %vm2000_vm8 = vcmp.ge.f32.partialorder %v1744_v3, 0.0  ;;  %v2256_v14 = vmul.f32 0.01, %v1744_v3  ;;  %v1236_v63 = vld [vmem:[%s6063_s4 + $0x290] sm:$0xff] }
 0x1e3   : > { %2766 = vst.msk [vmem:[%s6063_s4 + $0x200] sm:$0xff] %vm1070_vm1, %v2510_v7  ;;  %2767 = vst.msk [vmem:[%s6063_s4 + $0x208] sm:$0xff] %vm1070_vm1, %v2511_v13  ;;  %vm2001_vm9 = vcmp.ge.f32.partialorder %v1745_v8, 0.0  ;;  %v2257_v16 = vmul.f32 0.01, %v1745_v8  ;;  %v1746_v39 = vadd.f32 %v3790_v18, %v1484_v31  ;;  %v1486_v30 = vmul.f32 %v3754_v47, %v1224_v20  ;;  %v1238_v31 = vld [vmem:[%s6063_s4 + $0x2a0] sm:$0xff] }
 0x1e4   : > { %v2512_v19 = vsel %vm2000_vm8, %v1744_v3, %v2256_v14  ;;  %v1747_v21 = vadd.f32 %v3790_v18, %v1485_v45  ;;  %v1487_v40 = vmul.f32 %v3754_v47, %v1225_v35  ;;  %v1488_v24 = vmul.f32 %v3754_v47, %v1226_v9 }
 0x1e5   : > { %2768 = vst.msk [vmem:[%s6063_s4 + $0x210] sm:$0xff] %vm1070_vm1, %v2512_v19  ;;  %v2513_v26 = vsel %vm2001_vm9, %v1745_v8, %v2257_v16  ;;  %vm2002_vm10 = vcmp.ge.f32.partialorder %v1746_v39, 0.0  ;;  %v2258_v56 = vmul.f32 0.01, %v1746_v39  ;;  %v1748_v27 = vadd.f32 %v3790_v18, %v1486_v30  ;;  %v1237_v8 = vld [vmem:[%s6063_s4 + $0x298] sm:$0xff] }
 0x1e6   : > { %2769 = vst.msk [vmem:[%s6063_s4 + $0x218] sm:$0xff] %vm1070_vm1, %v2513_v26  ;;  %vm2003_vm11 = vcmp.ge.f32.partialorder %v1747_v21, 0.0  ;;  %v2259_v34 = vmul.f32 0.01, %v1747_v21  ;;  %v1749_v28 = vadd.f32 %v3790_v18, %v1487_v40  ;;  %v1750_v59 = vadd.f32 %v3790_v18, %v1488_v24  ;;  %v1239_v40 = vld [vmem:[%s6063_s4 + $0x2a8] sm:$0xff] }
 0x1e7   : > { %v2514_v32 = vsel %vm2002_vm10, %v1746_v39, %v2258_v56  ;;  %vm2004_vm12 = vcmp.ge.f32.partialorder %v1748_v27, 0.0  ;;  %v2260_v50 = vmul.f32 0.01, %v1748_v27  ;;  %v1489_v33 = vmul.f32 %v3754_v47, %v1227_v22 }
 0x1e8   : > { %2770 = vst.msk [vmem:[%s6063_s4 + $0x220] sm:$0xff] %vm1070_vm1, %v2514_v32  ;;  %v2515_v38 = vsel %vm2003_vm11, %v1747_v21, %v2259_v34  ;;  %vm2005_vm13 = vcmp.ge.f32.partialorder %v1749_v28, 0.0  ;;  %v2261_v17 = vmul.f32 0.01, %v1749_v28  ;;  %vm2006_vm14 = vcmp.ge.f32.partialorder %v1750_v59, 0.0 }
 0x1e9   : > { %2771 = vst.msk [vmem:[%s6063_s4 + $0x228] sm:$0xff] %vm1070_vm1, %v2515_v38  ;;  %v2516_v41 = vsel %vm2004_vm12, %v1748_v27, %v2260_v50  ;;  %v2262_v54 = vmul.f32 0.01, %v1750_v59  ;;  %v1751_v43 = vadd.f32 %v3790_v18, %v1489_v33  ;;  %v1490_v29 = vmul.f32 %v3754_v47, %v1228_v4  ;;  %v1241_v50 = vld [vmem:[%s6063_s4 + $0x2b8] sm:$0xff]  ;;  %v1242_v33 = vld [vmem:[%s6063_s4 + $0x2c0] sm:$0xff] }
 0x1ea   : > { %2772 = vst.msk [vmem:[%s6063_s4 + $0x230] sm:$0xff] %vm1070_vm1, %v2516_v41  ;;  %v2517_v11 = vsel %vm2005_vm13, %v1749_v28, %v2261_v17  ;;  %v1491_v46 = vmul.f32 %v3754_v47, %v1229_v5  ;;  %v1492_v0 = vmul.f32 %v3754_v47, %v1230_v62  ;;  %v1493_v23 = vmul.f32 %v3754_v47, %v1231_v37  ;;  %v1240_v28 = vld [vmem:[%s6063_s4 + $0x2b0] sm:$0xff]  ;;  %v1243_v5 = vld [vmem:[%s6063_s4 + $0x2c8] sm:$0xff] }
 0x1eb   : > { %2773 = vst.msk [vmem:[%s6063_s4 + $0x238] sm:$0xff] %vm1070_vm1, %v2517_v11  ;;  %v2518_v42 = vsel %vm2006_vm14, %v1750_v59, %v2262_v54  ;;  %vm2007_vm15 = vcmp.ge.f32.partialorder %v1751_v43, 0.0  ;;  %v2263_v51 = vmul.f32 0.01, %v1751_v43  ;;  %v1752_v52 = vadd.f32 %v3790_v18, %v1490_v29 }
 0x1ec   : > { %2774 = vst.msk [vmem:[%s6063_s4 + $0x240] sm:$0xff] %vm1070_vm1, %v2518_v42  ;;  %v1753_v15 = vadd.f32 %v3790_v18, %v1491_v46  ;;  %v1754_v55 = vadd.f32 %v3790_v18, %v1492_v0  ;;  %v1755_v53 = vadd.f32 %v3790_v18, %v1493_v23  ;;  %v1494_v36 = vmul.f32 %v3754_v47, %v1232_v44  ;;  %v1245_v0 = vld [vmem:[%s6063_s4 + $0x2d8] sm:$0xff] }
 0x1ed   : > { %v2519_v57 = vsel %vm2007_vm15, %v1751_v43, %v2263_v51  ;;  %vm2008_vm0 = vcmp.ge.f32.partialorder %v1752_v52, 0.0  ;;  %v2264_v58 = vmul.f32 0.01, %v1752_v52  ;;  %v1495_v48 = vmul.f32 %v3754_v47, %v1233_v49  ;;  %v1244_v43 = vld [vmem:[%s6063_s4 + $0x2d0] sm:$0xff] }
 0x1ee   : > { %2775 = vst.msk [vmem:[%s6063_s4 + $0x248] sm:$0xff] %vm1070_vm1, %v2519_v57  ;;  %vm2009_vm2 = vcmp.ge.f32.partialorder %v1753_v15, 0.0  ;;  %v2265_v6 = vmul.f32 0.01, %v1753_v15  ;;  %vm2010_vm3 = vcmp.ge.f32.partialorder %v1754_v55, 0.0  ;;  %vm2011_vm4 = vcmp.ge.f32.partialorder %v1755_v53, 0.0 }
 0x1ef   : > { %v2266_v25 = vmul.f32 0.01, %v1754_v55  ;;  %v2520_v1 = vsel %vm2008_vm0, %v1752_v52, %v2264_v58  ;;  %v2267_v10 = vmul.f32 0.01, %v1755_v53  ;;  %v1756_v2 = vadd.f32 %v3790_v18, %v1494_v36  ;;  %v1246_v58 = vld [vmem:[%s6063_s4 + $0x2e0] sm:$0xff] }
 0x1f0   : > { %2776 = vst.msk [vmem:[%s6063_s4 + $0x250] sm:$0xff] %vm1070_vm1, %v2520_v1  ;;  %v2521_v3 = vsel %vm2009_vm2, %v1753_v15, %v2265_v6  ;;  %v1757_v12 = vadd.f32 %v3790_v18, %v1495_v48  ;;  %v1496_v7 = vmul.f32 %v3754_v47, %v1234_v60  ;;  %v1497_v13 = vmul.f32 %v3754_v47, %v1235_v61  ;;  %v1247_v48 = vld [vmem:[%s6063_s4 + $0x2e8] sm:$0xff] }
 0x1f1   : > { %v2522_v20 = vsel %vm2010_vm3, %v1754_v55, %v2266_v25  ;;  %2777 = vst.msk [vmem:[%s6063_s4 + $0x258] sm:$0xff] %vm1070_vm1, %v2521_v3  ;;  %v2523_v35 = vsel %vm2011_vm4, %v1755_v53, %v2267_v10  ;;  %vm2012_vm5 = vcmp.ge.f32.partialorder %v1756_v2, 0.0  ;;  %v2268_v9 = vmul.f32 0.01, %v1756_v2  ;;  %v1248_v10 = vld [vmem:[%s6063_s4 + $0x2f0] sm:$0xff] }
 0x1f2   : > { %2778 = vst.msk [vmem:[%s6063_s4 + $0x260] sm:$0xff] %vm1070_vm1, %v2522_v20  ;;  %2779 = vst.msk [vmem:[%s6063_s4 + $0x268] sm:$0xff] %vm1070_vm1, %v2523_v35  ;;  %vm2013_vm6 = vcmp.ge.f32.partialorder %v1757_v12, 0.0  ;;  %v2269_v14 = vmul.f32 0.01, %v1757_v12  ;;  %v1758_v45 = vadd.f32 %v3790_v18, %v1496_v7  ;;  %v1498_v16 = vmul.f32 %v3754_v47, %v1236_v63  ;;  %v1250_v7 = vld [vmem:[%s6063_s4 + $0x300] sm:$0xff] }
 0x1f3   : > { %v2524_v39 = vsel %vm2012_vm5, %v1756_v2, %v2268_v9  ;;  %v1759_v30 = vadd.f32 %v3790_v18, %v1497_v13  ;;  %v1499_v19 = vmul.f32 %v3754_v47, %v1237_v8  ;;  %v1500_v21 = vmul.f32 %v3754_v47, %v1238_v31 }
 0x1f4   : > { %2780 = vst.msk [vmem:[%s6063_s4 + $0x270] sm:$0xff] %vm1070_vm1, %v2524_v39  ;;  %v2525_v24 = vsel %vm2013_vm6, %v1757_v12, %v2269_v14  ;;  %vm2014_vm7 = vcmp.ge.f32.partialorder %v1758_v45, 0.0  ;;  %v2270_v22 = vmul.f32 0.01, %v1758_v45  ;;  %v1760_v26 = vadd.f32 %v3790_v18, %v1498_v16  ;;  %v1249_v12 = vld [vmem:[%s6063_s4 + $0x2f8] sm:$0xff] }
 0x1f5   : > { %2781 = vst.msk [vmem:[%s6063_s4 + $0x278] sm:$0xff] %vm1070_vm1, %v2525_v24  ;;  %vm2015_vm8 = vcmp.ge.f32.partialorder %v1759_v30, 0.0  ;;  %v2271_v56 = vmul.f32 0.01, %v1759_v30  ;;  %v1761_v27 = vadd.f32 %v3790_v18, %v1499_v19  ;;  %v1762_v34 = vadd.f32 %v3790_v18, %v1500_v21  ;;  %v1251_v19 = vld [vmem:[%s6063_s4 + $0x308] sm:$0xff] }
 0x1f6   : > { %v2526_v59 = vsel %vm2014_vm7, %v1758_v45, %v2270_v22  ;;  %vm2016_vm9 = vcmp.ge.f32.partialorder %v1760_v26, 0.0  ;;  %v2272_v4 = vmul.f32 0.01, %v1760_v26  ;;  %v1501_v32 = vmul.f32 %v3754_v47, %v1239_v40 }
 0x1f7   : > { %2782 = vst.msk [vmem:[%s6063_s4 + $0x280] sm:$0xff] %vm1070_vm1, %v2526_v59  ;;  %v2527_v62 = vsel %vm2015_vm8, %v1759_v30, %v2271_v56  ;;  %vm2017_vm10 = vcmp.ge.f32.partialorder %v1761_v27, 0.0  ;;  %v2273_v37 = vmul.f32 0.01, %v1761_v27  ;;  %vm2018_vm11 = vcmp.ge.f32.partialorder %v1762_v34, 0.0 }
 0x1f8   : > { %2783 = vst.msk [vmem:[%s6063_s4 + $0x288] sm:$0xff] %vm1070_vm1, %v2527_v62  ;;  %v2528_v38 = vsel %vm2016_vm9, %v1760_v26, %v2272_v4  ;;  %v2274_v17 = vmul.f32 0.01, %v1762_v34  ;;  %v1763_v41 = vadd.f32 %v3790_v18, %v1501_v32  ;;  %v1502_v54 = vmul.f32 %v3754_v47, %v1240_v28  ;;  %v1253_v4 = vld [vmem:[%s6063_s4 + $0x318] sm:$0xff]  ;;  %v1254_v32 = vld [vmem:[%s6063_s4 + $0x320] sm:$0xff] }
 0x1f9   : > { %2784 = vst.msk [vmem:[%s6063_s4 + $0x290] sm:$0xff] %vm1070_vm1, %v2528_v38  ;;  %v2529_v29 = vsel %vm2017_vm10, %v1761_v27, %v2273_v37  ;;  %v1503_v44 = vmul.f32 %v3754_v47, %v1241_v50  ;;  %v1504_v11 = vmul.f32 %v3754_v47, %v1242_v33  ;;  %v1505_v46 = vmul.f32 %v3754_v47, %v1243_v5  ;;  %v1252_v27 = vld [vmem:[%s6063_s4 + $0x310] sm:$0xff]  ;;  %v1255_v50 = vld [vmem:[%s6063_s4 + $0x328] sm:$0xff] }
 0x1fa   : > { %2785 = vst.msk [vmem:[%s6063_s4 + $0x298] sm:$0xff] %vm1070_vm1, %v2529_v29  ;;  %v2530_v23 = vsel %vm2018_vm11, %v1762_v34, %v2274_v17  ;;  %vm2019_vm12 = vcmp.ge.f32.partialorder %v1763_v41, 0.0  ;;  %v2275_v49 = vmul.f32 0.01, %v1763_v41  ;;  %v1764_v42 = vadd.f32 %v3790_v18, %v1502_v54 }
 0x1fb   : > { %2786 = vst.msk [vmem:[%s6063_s4 + $0x2a0] sm:$0xff] %vm1070_vm1, %v2530_v23  ;;  %v1765_v51 = vadd.f32 %v3790_v18, %v1503_v44  ;;  %v1766_v52 = vadd.f32 %v3790_v18, %v1504_v11  ;;  %v1767_v15 = vadd.f32 %v3790_v18, %v1505_v46  ;;  %v1506_v55 = vmul.f32 %v3754_v47, %v1244_v43  ;;  %v1257_v11 = vld [vmem:[%s6063_s4 + $0x338] sm:$0xff] }
 0x1fc   : > { %v2531_v53 = vsel %vm2019_vm12, %v1763_v41, %v2275_v49  ;;  %vm2020_vm13 = vcmp.ge.f32.partialorder %v1764_v42, 0.0  ;;  %v2276_v36 = vmul.f32 0.01, %v1764_v42  ;;  %v1507_v57 = vmul.f32 %v3754_v47, %v1245_v0  ;;  %v1256_v41 = vld [vmem:[%s6063_s4 + $0x330] sm:$0xff] }
 0x1fd   : > { %2787 = vst.msk [vmem:[%s6063_s4 + $0x2a8] sm:$0xff] %vm1070_vm1, %v2531_v53  ;;  %vm2021_vm14 = vcmp.ge.f32.partialorder %v1765_v51, 0.0  ;;  %v2277_v60 = vmul.f32 0.01, %v1765_v51  ;;  %vm2022_vm15 = vcmp.ge.f32.partialorder %v1766_v52, 0.0  ;;  %vm2023_vm0 = vcmp.ge.f32.partialorder %v1767_v15, 0.0 }
 0x1fe   : > { %v2278_v61 = vmul.f32 0.01, %v1766_v52  ;;  %v2532_v6 = vsel %vm2020_vm13, %v1764_v42, %v2276_v36  ;;  %v2279_v25 = vmul.f32 0.01, %v1767_v15  ;;  %v1768_v1 = vadd.f32 %v3790_v18, %v1506_v55  ;;  %v1258_v36 = vld [vmem:[%s6063_s4 + $0x340] sm:$0xff] }
 0x1ff   : > { %2788 = vst.msk [vmem:[%s6063_s4 + $0x2b0] sm:$0xff] %vm1070_vm1, %v2532_v6  ;;  %v2533_v2 = vsel %vm2021_vm14, %v1765_v51, %v2277_v60  ;;  %v1769_v3 = vadd.f32 %v3790_v18, %v1507_v57  ;;  %v1508_v20 = vmul.f32 %v3754_v47, %v1246_v58  ;;  %v1509_v35 = vmul.f32 %v3754_v47, %v1247_v48  ;;  %v1259_v57 = vld [vmem:[%s6063_s4 + $0x348] sm:$0xff] }
 0x200   : > { %v2534_v63 = vsel %vm2022_vm15, %v1766_v52, %v2278_v61  ;;  %2789 = vst.msk [vmem:[%s6063_s4 + $0x2b8] sm:$0xff] %vm1070_vm1, %v2533_v2  ;;  %v2535_v8 = vsel %vm2023_vm0, %v1767_v15, %v2279_v25  ;;  %vm2024_vm2 = vcmp.ge.f32.partialorder %v1768_v1, 0.0  ;;  %v2280_v31 = vmul.f32 0.01, %v1768_v1  ;;  %v1260_v25 = vld [vmem:[%s6063_s4 + $0x350] sm:$0xff] }
 0x201   : > { %2790 = vst.msk [vmem:[%s6063_s4 + $0x2c0] sm:$0xff] %vm1070_vm1, %v2534_v63  ;;  %2791 = vst.msk [vmem:[%s6063_s4 + $0x2c8] sm:$0xff] %vm1070_vm1, %v2535_v8  ;;  %vm2025_vm3 = vcmp.ge.f32.partialorder %v1769_v3, 0.0  ;;  %v2281_v9 = vmul.f32 0.01, %v1769_v3  ;;  %v1770_v13 = vadd.f32 %v3790_v18, %v1508_v20  ;;  %v1510_v14 = vmul.f32 %v3754_v47, %v1248_v10  ;;  %v1262_v20 = vld [vmem:[%s6063_s4 + $0x360] sm:$0xff] }
 0x202   : > { %v2536_v45 = vsel %vm2024_vm2, %v1768_v1, %v2280_v31  ;;  %v1771_v16 = vadd.f32 %v3790_v18, %v1509_v35  ;;  %v1511_v39 = vmul.f32 %v3754_v47, %v1249_v12  ;;  %v1512_v30 = vmul.f32 %v3754_v47, %v1250_v7 }
 0x203   : > { %2792 = vst.msk [vmem:[%s6063_s4 + $0x2d0] sm:$0xff] %vm1070_vm1, %v2536_v45  ;;  %v2537_v21 = vsel %vm2025_vm3, %v1769_v3, %v2281_v9  ;;  %vm2026_vm4 = vcmp.ge.f32.partialorder %v1770_v13, 0.0  ;;  %v2282_v40 = vmul.f32 0.01, %v1770_v13  ;;  %v1772_v24 = vadd.f32 %v3790_v18, %v1510_v14  ;;  %v1261_v3 = vld [vmem:[%s6063_s4 + $0x358] sm:$0xff] }
 0x204   : > { %2793 = vst.msk [vmem:[%s6063_s4 + $0x2d8] sm:$0xff] %vm1070_vm1, %v2537_v21  ;;  %vm2027_vm5 = vcmp.ge.f32.partialorder %v1771_v16, 0.0  ;;  %v2283_v22 = vmul.f32 0.01, %v1771_v16  ;;  %v1773_v26 = vadd.f32 %v3790_v18, %v1511_v39  ;;  %v1774_v56 = vadd.f32 %v3790_v18, %v1512_v30  ;;  %v1263_v39 = vld [vmem:[%s6063_s4 + $0x368] sm:$0xff] }
 0x205   : > { %v2538_v34 = vsel %vm2026_vm4, %v1770_v13, %v2282_v40  ;;  %vm2028_vm6 = vcmp.ge.f32.partialorder %v1772_v24, 0.0  ;;  %v2284_v28 = vmul.f32 0.01, %v1772_v24  ;;  %v1513_v59 = vmul.f32 %v3754_v47, %v1251_v19 }
 0x206   : > { %2794 = vst.msk [vmem:[%s6063_s4 + $0x2e0] sm:$0xff] %vm1070_vm1, %v2538_v34  ;;  %v2539_v33 = vsel %vm2027_vm5, %v1771_v16, %v2283_v22  ;;  %vm2029_vm7 = vcmp.ge.f32.partialorder %v1773_v26, 0.0  ;;  %v2285_v5 = vmul.f32 0.01, %v1773_v26  ;;  %vm2030_vm8 = vcmp.ge.f32.partialorder %v1774_v56, 0.0 }
 0x207   : > { %2795 = vst.msk [vmem:[%s6063_s4 + $0x2e8] sm:$0xff] %vm1070_vm1, %v2539_v33  ;;  %v2540_v62 = vsel %vm2028_vm6, %v1772_v24, %v2284_v28  ;;  %v2286_v37 = vmul.f32 0.01, %v1774_v56  ;;  %v1775_v38 = vadd.f32 %v3790_v18, %v1513_v59  ;;  %v1514_v17 = vmul.f32 %v3754_v47, %v1252_v27  ;;  %v1265_v28 = vld [vmem:[%s6063_s4 + $0x378] sm:$0xff]  ;;  %v1266_v59 = vld [vmem:[%s6063_s4 + $0x380] sm:$0xff] }
 0x208   : > { %2796 = vst.msk [vmem:[%s6063_s4 + $0x2f0] sm:$0xff] %vm1070_vm1, %v2540_v62  ;;  %v2541_v54 = vsel %vm2029_vm7, %v1773_v26, %v2285_v5  ;;  %v1515_v43 = vmul.f32 %v3754_v47, %v1253_v4  ;;  %v1516_v29 = vmul.f32 %v3754_v47, %v1254_v32  ;;  %v1517_v44 = vmul.f32 %v3754_v47, %v1255_v50  ;;  %v1264_v26 = vld [vmem:[%s6063_s4 + $0x370] sm:$0xff]  ;;  %v1267_v4 = vld [vmem:[%s6063_s4 + $0x388] sm:$0xff] }
 0x209   : > { %2797 = vst.msk [vmem:[%s6063_s4 + $0x2f8] sm:$0xff] %vm1070_vm1, %v2541_v54  ;;  %v2542_v46 = vsel %vm2030_vm8, %v1774_v56, %v2286_v37  ;;  %vm2031_vm9 = vcmp.ge.f32.partialorder %v1775_v38, 0.0  ;;  %v2287_v0 = vmul.f32 0.01, %v1775_v38  ;;  %v1776_v23 = vadd.f32 %v3790_v18, %v1514_v17 }
 0x20a   : > { %2798 = vst.msk [vmem:[%s6063_s4 + $0x300] sm:$0xff] %vm1070_vm1, %v2542_v46  ;;  %v1777_v49 = vadd.f32 %v3790_v18, %v1515_v43  ;;  %v1778_v42 = vadd.f32 %v3790_v18, %v1516_v29  ;;  %v1779_v51 = vadd.f32 %v3790_v18, %v1517_v44  ;;  %v1518_v52 = vmul.f32 %v3754_v47, %v1256_v41  ;;  %v1269_v29 = vld [vmem:[%s6063_s4 + $0x398] sm:$0xff] }
 0x20b   : > { %v2543_v15 = vsel %vm2031_vm9, %v1775_v38, %v2287_v0  ;;  %vm2032_vm10 = vcmp.ge.f32.partialorder %v1776_v23, 0.0  ;;  %v2288_v55 = vmul.f32 0.01, %v1776_v23  ;;  %v1519_v53 = vmul.f32 %v3754_v47, %v1257_v11  ;;  %v1268_v38 = vld [vmem:[%s6063_s4 + $0x390] sm:$0xff] }
 0x20c   : > { %2799 = vst.msk [vmem:[%s6063_s4 + $0x308] sm:$0xff] %vm1070_vm1, %v2543_v15  ;;  %vm2033_vm11 = vcmp.ge.f32.partialorder %v1777_v49, 0.0  ;;  %v2289_v58 = vmul.f32 0.01, %v1777_v49  ;;  %vm2034_vm12 = vcmp.ge.f32.partialorder %v1778_v42, 0.0  ;;  %vm2035_vm13 = vcmp.ge.f32.partialorder %v1779_v51, 0.0 }
 0x20d   : > { %v2290_v48 = vmul.f32 0.01, %v1778_v42  ;;  %v2544_v60 = vsel %vm2032_vm10, %v1776_v23, %v2288_v55  ;;  %v2291_v61 = vmul.f32 0.01, %v1779_v51  ;;  %v1780_v6 = vadd.f32 %v3790_v18, %v1518_v52  ;;  %v1270_v55 = vld [vmem:[%s6063_s4 + $0x3a0] sm:$0xff] }
 0x20e   : > { %2800 = vst.msk [vmem:[%s6063_s4 + $0x310] sm:$0xff] %vm1070_vm1, %v2544_v60  ;;  %v2545_v1 = vsel %vm2033_vm11, %v1777_v49, %v2289_v58  ;;  %v1781_v2 = vadd.f32 %v3790_v18, %v1519_v53  ;;  %v1520_v63 = vmul.f32 %v3754_v47, %v1258_v36  ;;  %v1521_v8 = vmul.f32 %v3754_v47, %v1259_v57  ;;  %v1271_v53 = vld [vmem:[%s6063_s4 + $0x3a8] sm:$0xff] }
 0x20f   : > { %v2546_v10 = vsel %vm2034_vm12, %v1778_v42, %v2290_v48  ;;  %2801 = vst.msk [vmem:[%s6063_s4 + $0x318] sm:$0xff] %vm1070_vm1, %v2545_v1  ;;  %v2547_v12 = vsel %vm2035_vm13, %v1779_v51, %v2291_v61  ;;  %vm2036_vm14 = vcmp.ge.f32.partialorder %v1780_v6, 0.0  ;;  %v2292_v7 = vmul.f32 0.01, %v1780_v6  ;;  %v1272_v61 = vld [vmem:[%s6063_s4 + $0x3b0] sm:$0xff] }
 0x210   : > { %2802 = vst.msk [vmem:[%s6063_s4 + $0x320] sm:$0xff] %vm1070_vm1, %v2546_v10  ;;  %2803 = vst.msk [vmem:[%s6063_s4 + $0x328] sm:$0xff] %vm1070_vm1, %v2547_v12  ;;  %vm2037_vm15 = vcmp.ge.f32.partialorder %v1781_v2, 0.0  ;;  %v2293_v31 = vmul.f32 0.01, %v1781_v2  ;;  %v1782_v35 = vadd.f32 %v3790_v18, %v1520_v63  ;;  %v1522_v9 = vmul.f32 %v3754_v47, %v1260_v25  ;;  %v1274_v63 = vld [vmem:[%s6063_s4 + $0x3c0] sm:$0xff] }
 0x211   : > { %v2548_v13 = vsel %vm2036_vm14, %v1780_v6, %v2292_v7  ;;  %v1783_v14 = vadd.f32 %v3790_v18, %v1521_v8  ;;  %v1523_v45 = vmul.f32 %v3754_v47, %v1261_v3  ;;  %v1524_v16 = vmul.f32 %v3754_v47, %v1262_v20 }
 0x212   : > { %2804 = vst.msk [vmem:[%s6063_s4 + $0x330] sm:$0xff] %vm1070_vm1, %v2548_v13  ;;  %v2549_v30 = vsel %vm2037_vm15, %v1781_v2, %v2293_v31  ;;  %vm2038_vm0 = vcmp.ge.f32.partialorder %v1782_v35, 0.0  ;;  %v2294_v19 = vmul.f32 0.01, %v1782_v35  ;;  %v1784_v21 = vadd.f32 %v3790_v18, %v1522_v9  ;;  %v1273_v2 = vld [vmem:[%s6063_s4 + $0x3b8] sm:$0xff] }
 0x213   : > { %2805 = vst.msk [vmem:[%s6063_s4 + $0x338] sm:$0xff] %vm1070_vm1, %v2549_v30  ;;  %vm2039_vm2 = vcmp.ge.f32.partialorder %v1783_v14, 0.0  ;;  %v2295_v40 = vmul.f32 0.01, %v1783_v14  ;;  %v1785_v24 = vadd.f32 %v3790_v18, %v1523_v45  ;;  %v1786_v22 = vadd.f32 %v3790_v18, %v1524_v16  ;;  %v1275_v45 = vld [vmem:[%s6063_s4 + $0x3c8] sm:$0xff] }
 0x214   : > { %v2550_v56 = vsel %vm2038_vm0, %v1782_v35, %v2294_v19  ;;  %vm2040_vm3 = vcmp.ge.f32.partialorder %v1784_v21, 0.0  ;;  %v2296_v27 = vmul.f32 0.01, %v1784_v21  ;;  %v1525_v34 = vmul.f32 %v3754_v47, %v1263_v39 }
 0x215   : > { %2806 = vst.msk [vmem:[%s6063_s4 + $0x340] sm:$0xff] %vm1070_vm1, %v2550_v56  ;;  %v2551_v32 = vsel %vm2039_vm2, %v1783_v14, %v2295_v40  ;;  %vm2041_vm4 = vcmp.ge.f32.partialorder %v1785_v24, 0.0  ;;  %v2297_v50 = vmul.f32 0.01, %v1785_v24  ;;  %vm2042_vm5 = vcmp.ge.f32.partialorder %v1786_v22, 0.0 }
 0x216   : > { %2807 = vst.msk [vmem:[%s6063_s4 + $0x348] sm:$0xff] %vm1070_vm1, %v2551_v32  ;;  %v2552_v33 = vsel %vm2040_vm3, %v1784_v21, %v2296_v27  ;;  %v2298_v5 = vmul.f32 0.01, %v1786_v22  ;;  %v1787_v62 = vadd.f32 %v3790_v18, %v1525_v34  ;;  %v1526_v37 = vmul.f32 %v3754_v47, %v1264_v26  ;;  %v1277_v27 = vld [vmem:[%s6063_s4 + $0x3d8] sm:$0xff]  ;;  %v1278_v34 = vld [vmem:[%s6063_s4 + $0x3e0] sm:$0xff] }
 0x217   : > { %2808 = vst.msk [vmem:[%s6063_s4 + $0x350] sm:$0xff] %vm1070_vm1, %v2552_v33  ;;  %v2553_v17 = vsel %vm2041_vm4, %v1785_v24, %v2297_v50  ;;  %v1527_v41 = vmul.f32 %v3754_v47, %v1265_v28  ;;  %v1528_v54 = vmul.f32 %v3754_v47, %v1266_v59  ;;  %v1529_v43 = vmul.f32 %v3754_v47, %v1267_v4  ;;  %v1276_v24 = vld [vmem:[%s6063_s4 + $0x3d0] sm:$0xff]  ;;  %v1279_v28 = vld [vmem:[%s6063_s4 + $0x3e8] sm:$0xff] }
 0x218   : > { %2809 = vst.msk [vmem:[%s6063_s4 + $0x358] sm:$0xff] %vm1070_vm1, %v2553_v17  ;;  %v2554_v44 = vsel %vm2042_vm5, %v1786_v22, %v2298_v5  ;;  %vm2043_vm6 = vcmp.ge.f32.partialorder %v1787_v62, 0.0  ;;  %v2299_v11 = vmul.f32 0.01, %v1787_v62  ;;  %v1788_v46 = vadd.f32 %v3790_v18, %v1526_v37 }
 0x219   : > { %2810 = vst.msk [vmem:[%s6063_s4 + $0x360] sm:$0xff] %vm1070_vm1, %v2554_v44  ;;  %v1789_v0 = vadd.f32 %v3790_v18, %v1527_v41  ;;  %v1790_v23 = vadd.f32 %v3790_v18, %v1528_v54  ;;  %v1791_v49 = vadd.f32 %v3790_v18, %v1529_v43  ;;  %v1530_v42 = vmul.f32 %v3754_v47, %v1268_v38  ;;  %v1281_v54 = vld [vmem:[%s6063_s4 + $0x3f8] sm:$0xff] }
 0x21a   : > { %v2555_v51 = vsel %vm2043_vm6, %v1787_v62, %v2299_v11  ;;  %vm2044_vm7 = vcmp.ge.f32.partialorder %v1788_v46, 0.0  ;;  %v2300_v52 = vmul.f32 0.01, %v1788_v46  ;;  %v1531_v15 = vmul.f32 %v3754_v47, %v1269_v29  ;;  %v1280_v62 = vld [vmem:[%s6063_s4 + $0x3f0] sm:$0xff] }
 0x21b   : > { %2811 = vst.msk [vmem:[%s6063_s4 + $0x368] sm:$0xff] %vm1070_vm1, %v2555_v51  ;;  %vm2045_vm8 = vcmp.ge.f32.partialorder %v1789_v0, 0.0  ;;  %v2301_v36 = vmul.f32 0.01, %v1789_v0  ;;  %vm2046_vm9 = vcmp.ge.f32.partialorder %v1790_v23, 0.0  ;;  %vm2047_vm10 = vcmp.ge.f32.partialorder %v1791_v49, 0.0 }
 0x21c   : > { %v2302_v57 = vmul.f32 0.01, %v1790_v23  ;;  %v2556_v58 = vsel %vm2044_vm7, %v1788_v46, %v2300_v52  ;;  %v2303_v48 = vmul.f32 0.01, %v1791_v49  ;;  %v1792_v60 = vadd.f32 %v3790_v18, %v1530_v42  ;;  %v1282_v52 = vld [vmem:[%s6063_s4 + $0x400] sm:$0xff] }
 0x21d   : > { %2812 = vst.msk [vmem:[%s6063_s4 + $0x370] sm:$0xff] %vm1070_vm1, %v2556_v58  ;;  %v2557_v6 = vsel %vm2045_vm8, %v1789_v0, %v2301_v36  ;;  %v1793_v1 = vadd.f32 %v3790_v18, %v1531_v15  ;;  %v1532_v10 = vmul.f32 %v3754_v47, %v1270_v55  ;;  %v1533_v12 = vmul.f32 %v3754_v47, %v1271_v53  ;;  %v1283_v15 = vld [vmem:[%s6063_s4 + $0x408] sm:$0xff] }
 0x21e   : > { %v2558_v25 = vsel %vm2046_vm9, %v1790_v23, %v2302_v57  ;;  %2813 = vst.msk [vmem:[%s6063_s4 + $0x378] sm:$0xff] %vm1070_vm1, %v2557_v6  ;;  %v2559_v3 = vsel %vm2047_vm10, %v1791_v49, %v2303_v48  ;;  %vm2048_vm11 = vcmp.ge.f32.partialorder %v1792_v60, 0.0  ;;  %v2304_v20 = vmul.f32 0.01, %v1792_v60  ;;  %v1284_v48 = vld [vmem:[%s6063_s4 + $0x410] sm:$0xff] }
 0x21f   : > { %2814 = vst.msk [vmem:[%s6063_s4 + $0x380] sm:$0xff] %vm1070_vm1, %v2558_v25  ;;  %2815 = vst.msk [vmem:[%s6063_s4 + $0x388] sm:$0xff] %vm1070_vm1, %v2559_v3  ;;  %vm2049_vm12 = vcmp.ge.f32.partialorder %v1793_v1, 0.0  ;;  %v2305_v7 = vmul.f32 0.01, %v1793_v1  ;;  %v1794_v8 = vadd.f32 %v3790_v18, %v1532_v10  ;;  %v1534_v31 = vmul.f32 %v3754_v47, %v1272_v61  ;;  %v1286_v10 = vld [vmem:[%s6063_s4 + $0x420] sm:$0xff] }
 0x220   : > { %v2560_v35 = vsel %vm2048_vm11, %v1792_v60, %v2304_v20  ;;  %v1795_v9 = vadd.f32 %v3790_v18, %v1533_v12  ;;  %v1535_v13 = vmul.f32 %v3754_v47, %v1273_v2  ;;  %v1536_v14 = vmul.f32 %v3754_v47, %v1274_v63 }
 0x221   : > { %2816 = vst.msk [vmem:[%s6063_s4 + $0x390] sm:$0xff] %vm1070_vm1, %v2560_v35  ;;  %v2561_v16 = vsel %vm2049_vm12, %v1793_v1, %v2305_v7  ;;  %vm2050_vm13 = vcmp.ge.f32.partialorder %v1794_v8, 0.0  ;;  %v2306_v39 = vmul.f32 0.01, %v1794_v8  ;;  %v1796_v30 = vadd.f32 %v3790_v18, %v1534_v31  ;;  %v1285_v1 = vld [vmem:[%s6063_s4 + $0x418] sm:$0xff] }
 0x222   : > { %2817 = vst.msk [vmem:[%s6063_s4 + $0x398] sm:$0xff] %vm1070_vm1, %v2561_v16  ;;  %vm2051_vm14 = vcmp.ge.f32.partialorder %v1795_v9, 0.0  ;;  %v2307_v19 = vmul.f32 0.01, %v1795_v9  ;;  %v1797_v21 = vadd.f32 %v3790_v18, %v1535_v13  ;;  %v1798_v40 = vadd.f32 %v3790_v18, %v1536_v14  ;;  %v1287_v13 = vld [vmem:[%s6063_s4 + $0x428] sm:$0xff] }
 0x223   : > { %v2562_v22 = vsel %vm2050_vm13, %v1794_v8, %v2306_v39  ;;  %vm2052_vm15 = vcmp.ge.f32.partialorder %v1796_v30, 0.0  ;;  %v2308_v26 = vmul.f32 0.01, %v1796_v30  ;;  %v1537_v56 = vmul.f32 %v3754_v47, %v1275_v45 }
 0x224   : > { %2818 = vst.msk [vmem:[%s6063_s4 + $0x3a0] sm:$0xff] %vm1070_vm1, %v2562_v22  ;;  %v2563_v59 = vsel %vm2051_vm14, %v1795_v9, %v2307_v19  ;;  %vm2053_vm0 = vcmp.ge.f32.partialorder %v1797_v21, 0.0  ;;  %v2309_v4 = vmul.f32 0.01, %v1797_v21  ;;  %vm2054_vm2 = vcmp.ge.f32.partialorder %v1798_v40, 0.0 }
 0x225   : > { %2819 = vst.msk [vmem:[%s6063_s4 + $0x3a8] sm:$0xff] %vm1070_vm1, %v2563_v59  ;;  %v2564_v32 = vsel %vm2052_vm15, %v1796_v30, %v2308_v26  ;;  %v2310_v50 = vmul.f32 0.01, %v1798_v40  ;;  %v1799_v33 = vadd.f32 %v3790_v18, %v1537_v56  ;;  %v1538_v5 = vmul.f32 %v3754_v47, %v1276_v24  ;;  %v1289_v26 = vld [vmem:[%s6063_s4 + $0x438] sm:$0xff]  ;;  %v1290_v56 = vld [vmem:[%s6063_s4 + $0x440] sm:$0xff] }
 0x226   : > { %2820 = vst.msk [vmem:[%s6063_s4 + $0x3b0] sm:$0xff] %vm1070_vm1, %v2564_v32  ;;  %v2565_v37 = vsel %vm2053_vm0, %v1797_v21, %v2309_v4  ;;  %v1539_v38 = vmul.f32 %v3754_v47, %v1277_v27  ;;  %v1540_v17 = vmul.f32 %v3754_v47, %v1278_v34  ;;  %v1541_v41 = vmul.f32 %v3754_v47, %v1279_v28  ;;  %v1288_v21 = vld [vmem:[%s6063_s4 + $0x430] sm:$0xff]  ;;  %v1291_v27 = vld [vmem:[%s6063_s4 + $0x448] sm:$0xff] }
 0x227   : > { %2821 = vst.msk [vmem:[%s6063_s4 + $0x3b8] sm:$0xff] %vm1070_vm1, %v2565_v37  ;;  %v2566_v43 = vsel %vm2054_vm2, %v1798_v40, %v2310_v50  ;;  %vm2055_vm3 = vcmp.ge.f32.partialorder %v1799_v33, 0.0  ;;  %v2311_v29 = vmul.f32 0.01, %v1799_v33  ;;  %v1800_v44 = vadd.f32 %v3790_v18, %v1538_v5 }
 0x228   : > { %2822 = vst.msk [vmem:[%s6063_s4 + $0x3c0] sm:$0xff] %vm1070_vm1, %v2566_v43  ;;  %v1801_v11 = vadd.f32 %v3790_v18, %v1539_v38  ;;  %v1802_v46 = vadd.f32 %v3790_v18, %v1540_v17  ;;  %v1803_v0 = vadd.f32 %v3790_v18, %v1541_v41  ;;  %v1542_v23 = vmul.f32 %v3754_v47, %v1280_v62  ;;  %v1293_v17 = vld [vmem:[%s6063_s4 + $0x458] sm:$0xff] }
 0x229   : > { %v2567_v49 = vsel %vm2055_vm3, %v1799_v33, %v2311_v29  ;;  %vm2056_vm4 = vcmp.ge.f32.partialorder %v1800_v44, 0.0  ;;  %v2312_v42 = vmul.f32 0.01, %v1800_v44  ;;  %v1543_v51 = vmul.f32 %v3754_v47, %v1281_v54  ;;  %v1292_v33 = vld [vmem:[%s6063_s4 + $0x450] sm:$0xff] }
 0x22a   : > { %2823 = vst.msk [vmem:[%s6063_s4 + $0x3c8] sm:$0xff] %vm1070_vm1, %v2567_v49  ;;  %vm2057_vm5 = vcmp.ge.f32.partialorder %v1801_v11, 0.0  ;;  %v2313_v55 = vmul.f32 0.01, %v1801_v11  ;;  %vm2058_vm6 = vcmp.ge.f32.partialorder %v1802_v46, 0.0  ;;  %vm2059_vm7 = vcmp.ge.f32.partialorder %v1803_v0, 0.0 }
 0x22b   : > { %v2314_v53 = vmul.f32 0.01, %v1802_v46  ;;  %v2568_v36 = vsel %vm2056_vm4, %v1800_v44, %v2312_v42  ;;  %v2315_v57 = vmul.f32 0.01, %v1803_v0  ;;  %v1804_v58 = vadd.f32 %v3790_v18, %v1542_v23  ;;  %v1294_v42 = vld [vmem:[%s6063_s4 + $0x460] sm:$0xff] }
 0x22c   : > { %2824 = vst.msk [vmem:[%s6063_s4 + $0x3d0] sm:$0xff] %vm1070_vm1, %v2568_v36  ;;  %v2569_v60 = vsel %vm2057_vm5, %v1801_v11, %v2313_v55  ;;  %v1805_v6 = vadd.f32 %v3790_v18, %v1543_v51  ;;  %v1544_v25 = vmul.f32 %v3754_v47, %v1282_v52  ;;  %v1545_v3 = vmul.f32 %v3754_v47, %v1283_v15  ;;  %v1295_v51 = vld [vmem:[%s6063_s4 + $0x468] sm:$0xff] }
 0x22d   : > { %v2570_v61 = vsel %vm2058_vm6, %v1802_v46, %v2314_v53  ;;  %2825 = vst.msk [vmem:[%s6063_s4 + $0x3d8] sm:$0xff] %vm1070_vm1, %v2569_v60  ;;  %v2571_v2 = vsel %vm2059_vm7, %v1803_v0, %v2315_v57  ;;  %vm2060_vm8 = vcmp.ge.f32.partialorder %v1804_v58, 0.0  ;;  %v2316_v63 = vmul.f32 0.01, %v1804_v58  ;;  %v1296_v57 = vld [vmem:[%s6063_s4 + $0x470] sm:$0xff] }
 0x22e   : > { %2826 = vst.msk [vmem:[%s6063_s4 + $0x3e0] sm:$0xff] %vm1070_vm1, %v2570_v61  ;;  %2827 = vst.msk [vmem:[%s6063_s4 + $0x3e8] sm:$0xff] %vm1070_vm1, %v2571_v2  ;;  %vm2061_vm9 = vcmp.ge.f32.partialorder %v1805_v6, 0.0  ;;  %v2317_v20 = vmul.f32 0.01, %v1805_v6  ;;  %v1806_v12 = vadd.f32 %v3790_v18, %v1544_v25  ;;  %v1546_v7 = vmul.f32 %v3754_v47, %v1284_v48  ;;  %v1298_v25 = vld [vmem:[%s6063_s4 + $0x480] sm:$0xff] }
 0x22f   : > { %v2572_v8 = vsel %vm2060_vm8, %v1804_v58, %v2316_v63  ;;  %v1807_v31 = vadd.f32 %v3790_v18, %v1545_v3  ;;  %v1547_v35 = vmul.f32 %v3754_v47, %v1285_v1  ;;  %v1548_v9 = vmul.f32 %v3754_v47, %v1286_v10 }
 0x230   : > { %2828 = vst.msk [vmem:[%s6063_s4 + $0x3f0] sm:$0xff] %vm1070_vm1, %v2572_v8  ;;  %v2573_v14 = vsel %vm2061_vm9, %v1805_v6, %v2317_v20  ;;  %vm2062_vm10 = vcmp.ge.f32.partialorder %v1806_v12, 0.0  ;;  %v2318_v45 = vmul.f32 0.01, %v1806_v12  ;;  %v1808_v16 = vadd.f32 %v3790_v18, %v1546_v7  ;;  %v1297_v6 = vld [vmem:[%s6063_s4 + $0x478] sm:$0xff] }
 0x231   : > { %2829 = vst.msk [vmem:[%s6063_s4 + $0x3f8] sm:$0xff] %vm1070_vm1, %v2573_v14  ;;  %vm2063_vm11 = vcmp.ge.f32.partialorder %v1807_v31, 0.0  ;;  %v2319_v39 = vmul.f32 0.01, %v1807_v31  ;;  %v1809_v30 = vadd.f32 %v3790_v18, %v1547_v35  ;;  %v1810_v19 = vadd.f32 %v3790_v18, %v1548_v9  ;;  %v1299_v35 = vld [vmem:[%s6063_s4 + $0x488] sm:$0xff] }
 0x232   : > { %v2574_v40 = vsel %vm2062_vm10, %v1806_v12, %v2318_v45  ;;  %vm2064_vm12 = vcmp.ge.f32.partialorder %v1808_v16, 0.0  ;;  %v2320_v24 = vmul.f32 0.01, %v1808_v16  ;;  %v1549_v22 = vmul.f32 %v3754_v47, %v1287_v13 }
 0x233   : > { %2830 = vst.msk [vmem:[%s6063_s4 + $0x400] sm:$0xff] %vm1070_vm1, %v2574_v40  ;;  %v2575_v34 = vsel %vm2063_vm11, %v1807_v31, %v2319_v39  ;;  %vm2065_vm13 = vcmp.ge.f32.partialorder %v1809_v30, 0.0  ;;  %v2321_v28 = vmul.f32 0.01, %v1809_v30  ;;  %vm2066_vm14 = vcmp.ge.f32.partialorder %v1810_v19, 0.0 }
 0x234   : > { %2831 = vst.msk [vmem:[%s6063_s4 + $0x408] sm:$0xff] %vm1070_vm1, %v2575_v34  ;;  %v2576_v59 = vsel %vm2064_vm12, %v1808_v16, %v2320_v24  ;;  %v2322_v4 = vmul.f32 0.01, %v1810_v19  ;;  %v1811_v32 = vadd.f32 %v3790_v18, %v1549_v22  ;;  %v1550_v50 = vmul.f32 %v3754_v47, %v1288_v21  ;;  %v1301_v24 = vld [vmem:[%s6063_s4 + $0x498] sm:$0xff]  ;;  %v1302_v22 = vld [vmem:[%s6063_s4 + $0x4a0] sm:$0xff] }
 0x235   : > { %2832 = vst.msk [vmem:[%s6063_s4 + $0x410] sm:$0xff] %vm1070_vm1, %v2576_v59  ;;  %v2577_v5 = vsel %vm2065_vm13, %v1809_v30, %v2321_v28  ;;  %v1551_v62 = vmul.f32 %v3754_v47, %v1289_v26  ;;  %v1552_v37 = vmul.f32 %v3754_v47, %v1290_v56  ;;  %v1553_v38 = vmul.f32 %v3754_v47, %v1291_v27  ;;  %v1300_v30 = vld [vmem:[%s6063_s4 + $0x490] sm:$0xff]  ;;  %v1303_v26 = vld [vmem:[%s6063_s4 + $0x4a8] sm:$0xff] }
 0x236   : > { %2833 = vst.msk [vmem:[%s6063_s4 + $0x418] sm:$0xff] %vm1070_vm1, %v2577_v5  ;;  %v2578_v41 = vsel %vm2066_vm14, %v1810_v19, %v2322_v4  ;;  %vm2067_vm15 = vcmp.ge.f32.partialorder %v1811_v32, 0.0  ;;  %v2323_v54 = vmul.f32 0.01, %v1811_v32  ;;  %v1812_v43 = vadd.f32 %v3790_v18, %v1550_v50 }
 0x237   : > { %2834 = vst.msk [vmem:[%s6063_s4 + $0x420] sm:$0xff] %vm1070_vm1, %v2578_v41  ;;  %v1813_v29 = vadd.f32 %v3790_v18, %v1551_v62  ;;  %v1814_v44 = vadd.f32 %v3790_v18, %v1552_v37  ;;  %v1815_v11 = vadd.f32 %v3790_v18, %v1553_v38  ;;  %v1554_v46 = vmul.f32 %v3754_v47, %v1292_v33  ;;  %v1305_v37 = vld [vmem:[%s6063_s4 + $0x4b8] sm:$0xff] }
 0x238   : > { %v2579_v0 = vsel %vm2067_vm15, %v1811_v32, %v2323_v54  ;;  %vm2068_vm0 = vcmp.ge.f32.partialorder %v1812_v43, 0.0  ;;  %v2324_v23 = vmul.f32 0.01, %v1812_v43  ;;  %v1555_v49 = vmul.f32 %v3754_v47, %v1293_v17  ;;  %v1304_v32 = vld [vmem:[%s6063_s4 + $0x4b0] sm:$0xff] }
 0x239   : > { %2835 = vst.msk [vmem:[%s6063_s4 + $0x428] sm:$0xff] %vm1070_vm1, %v2579_v0  ;;  %vm2069_vm2 = vcmp.ge.f32.partialorder %v1813_v29, 0.0  ;;  %v2325_v52 = vmul.f32 0.01, %v1813_v29  ;;  %vm2070_vm3 = vcmp.ge.f32.partialorder %v1814_v44, 0.0  ;;  %vm2071_vm4 = vcmp.ge.f32.partialorder %v1815_v11, 0.0 }
 0x23a   : > { %v2326_v15 = vmul.f32 0.01, %v1814_v44  ;;  %v2580_v55 = vsel %vm2068_vm0, %v1812_v43, %v2324_v23  ;;  %v2327_v53 = vmul.f32 0.01, %v1815_v11  ;;  %v1816_v36 = vadd.f32 %v3790_v18, %v1554_v46  ;;  %v1306_v23 = vld [vmem:[%s6063_s4 + $0x4c0] sm:$0xff] }
 0x23b   : > { %2836 = vst.msk [vmem:[%s6063_s4 + $0x430] sm:$0xff] %vm1070_vm1, %v2580_v55  ;;  %v2581_v58 = vsel %vm2069_vm2, %v1813_v29, %v2325_v52  ;;  %v1817_v60 = vadd.f32 %v3790_v18, %v1555_v49  ;;  %v1556_v61 = vmul.f32 %v3754_v47, %v1294_v42  ;;  %v1557_v2 = vmul.f32 %v3754_v47, %v1295_v51  ;;  %v1307_v49 = vld [vmem:[%s6063_s4 + $0x4c8] sm:$0xff] }
 0x23c   : > { %v2582_v48 = vsel %vm2070_vm3, %v1814_v44, %v2326_v15  ;;  %2837 = vst.msk [vmem:[%s6063_s4 + $0x438] sm:$0xff] %vm1070_vm1, %v2581_v58  ;;  %v2583_v1 = vsel %vm2071_vm4, %v1815_v11, %v2327_v53  ;;  %vm2072_vm5 = vcmp.ge.f32.partialorder %v1816_v36, 0.0  ;;  %v2328_v10 = vmul.f32 0.01, %v1816_v36  ;;  %v1308_v53 = vld [vmem:[%s6063_s4 + $0x4d0] sm:$0xff] }
 0x23d   : > { %2838 = vst.msk [vmem:[%s6063_s4 + $0x440] sm:$0xff] %vm1070_vm1, %v2582_v48  ;;  %2839 = vst.msk [vmem:[%s6063_s4 + $0x448] sm:$0xff] %vm1070_vm1, %v2583_v1  ;;  %vm2073_vm6 = vcmp.ge.f32.partialorder %v1817_v60, 0.0  ;;  %v2329_v63 = vmul.f32 0.01, %v1817_v60  ;;  %v1818_v3 = vadd.f32 %v3790_v18, %v1556_v61  ;;  %v1558_v20 = vmul.f32 %v3754_v47, %v1296_v57  ;;  %v1310_v61 = vld [vmem:[%s6063_s4 + $0x4e0] sm:$0xff] }
 0x23e   : > { %v2584_v12 = vsel %vm2072_vm5, %v1816_v36, %v2328_v10  ;;  %v1819_v7 = vadd.f32 %v3790_v18, %v1557_v2  ;;  %v1559_v8 = vmul.f32 %v3754_v47, %v1297_v6  ;;  %v1560_v31 = vmul.f32 %v3754_v47, %v1298_v25 }
 0x23f   : > { %2840 = vst.msk [vmem:[%s6063_s4 + $0x450] sm:$0xff] %vm1070_vm1, %v2584_v12  ;;  %v2585_v9 = vsel %vm2073_vm6, %v1817_v60, %v2329_v63  ;;  %vm2074_vm7 = vcmp.ge.f32.partialorder %v1818_v3, 0.0  ;;  %v2330_v13 = vmul.f32 0.01, %v1818_v3  ;;  %v1820_v14 = vadd.f32 %v3790_v18, %v1558_v20  ;;  %v1309_v60 = vld [vmem:[%s6063_s4 + $0x4d8] sm:$0xff] }
 0x240   : > { %2841 = vst.msk [vmem:[%s6063_s4 + $0x458] sm:$0xff] %vm1070_vm1, %v2585_v9  ;;  %vm2075_vm8 = vcmp.ge.f32.partialorder %v1819_v7, 0.0  ;;  %v2331_v45 = vmul.f32 0.01, %v1819_v7  ;;  %v1821_v16 = vadd.f32 %v3790_v18, %v1559_v8  ;;  %v1822_v39 = vadd.f32 %v3790_v18, %v1560_v31  ;;  %v1311_v8 = vld [vmem:[%s6063_s4 + $0x4e8] sm:$0xff] }
 0x241   : > { %v2586_v19 = vsel %vm2074_vm7, %v1818_v3, %v2330_v13  ;;  %vm2076_vm9 = vcmp.ge.f32.partialorder %v1820_v14, 0.0  ;;  %v2332_v21 = vmul.f32 0.01, %v1820_v14  ;;  %v1561_v40 = vmul.f32 %v3754_v47, %v1299_v35 }
 0x242   : > { %2842 = vst.msk [vmem:[%s6063_s4 + $0x460] sm:$0xff] %vm1070_vm1, %v2586_v19  ;;  %v2587_v56 = vsel %vm2075_vm8, %v1819_v7, %v2331_v45  ;;  %vm2077_vm10 = vcmp.ge.f32.partialorder %v1821_v16, 0.0  ;;  %v2333_v27 = vmul.f32 0.01, %v1821_v16  ;;  %vm2078_vm11 = vcmp.ge.f32.partialorder %v1822_v39, 0.0 }
 0x243   : > { %2843 = vst.msk [vmem:[%s6063_s4 + $0x468] sm:$0xff] %vm1070_vm1, %v2587_v56  ;;  %v2588_v34 = vsel %vm2076_vm9, %v1820_v14, %v2332_v21  ;;  %v2334_v28 = vmul.f32 0.01, %v1822_v39  ;;  %v1823_v59 = vadd.f32 %v3790_v18, %v1561_v40  ;;  %v1562_v4 = vmul.f32 %v3754_v47, %v1300_v30  ;;  %v1313_v21 = vld [vmem:[%s6063_s4 + $0x4f8] sm:$0xff]  ;;  %v1314_v40 = vld [vmem:[%s6063_s4 + $0x500] sm:$0xff] }
 0x244   : > { %2844 = vst.msk [vmem:[%s6063_s4 + $0x470] sm:$0xff] %vm1070_vm1, %v2588_v34  ;;  %v2589_v50 = vsel %vm2077_vm10, %v1821_v16, %v2333_v27  ;;  %v1563_v33 = vmul.f32 %v3754_v47, %v1301_v24  ;;  %v1564_v5 = vmul.f32 %v3754_v47, %v1302_v22  ;;  %v1565_v62 = vmul.f32 %v3754_v47, %v1303_v26  ;;  %v1312_v16 = vld [vmem:[%s6063_s4 + $0x4f0] sm:$0xff]  ;;  %v1315_v24 = vld [vmem:[%s6063_s4 + $0x508] sm:$0xff] }
 0x245   : > { %2845 = vst.msk [vmem:[%s6063_s4 + $0x478] sm:$0xff] %vm1070_vm1, %v2589_v50  ;;  %v2590_v38 = vsel %vm2078_vm11, %v1822_v39, %v2334_v28  ;;  %vm2079_vm12 = vcmp.ge.f32.partialorder %v1823_v59, 0.0  ;;  %v2335_v17 = vmul.f32 0.01, %v1823_v59  ;;  %v1824_v41 = vadd.f32 %v3790_v18, %v1562_v4 }
 0x246   : > { %2846 = vst.msk [vmem:[%s6063_s4 + $0x480] sm:$0xff] %vm1070_vm1, %v2590_v38  ;;  %v1825_v54 = vadd.f32 %v3790_v18, %v1563_v33  ;;  %v1826_v43 = vadd.f32 %v3790_v18, %v1564_v5  ;;  %v1827_v29 = vadd.f32 %v3790_v18, %v1565_v62  ;;  %v1566_v44 = vmul.f32 %v3754_v47, %v1304_v32  ;;  %v1317_v5 = vld [vmem:[%s6063_s4 + $0x518] sm:$0xff] }
 0x247   : > { %v2591_v11 = vsel %vm2079_vm12, %v1823_v59, %v2335_v17  ;;  %vm2080_vm13 = vcmp.ge.f32.partialorder %v1824_v41, 0.0  ;;  %v2336_v46 = vmul.f32 0.01, %v1824_v41  ;;  %v1567_v0 = vmul.f32 %v3754_v47, %v1305_v37  ;;  %v1316_v59 = vld [vmem:[%s6063_s4 + $0x510] sm:$0xff] }
 0x248   : > { %2847 = vst.msk [vmem:[%s6063_s4 + $0x488] sm:$0xff] %vm1070_vm1, %v2591_v11  ;;  %vm2081_vm14 = vcmp.ge.f32.partialorder %v1825_v54, 0.0  ;;  %v2337_v42 = vmul.f32 0.01, %v1825_v54  ;;  %vm2082_vm15 = vcmp.ge.f32.partialorder %v1826_v43, 0.0  ;;  %vm2083_vm0 = vcmp.ge.f32.partialorder %v1827_v29, 0.0 }
 0x249   : > { %v2338_v51 = vmul.f32 0.01, %v1826_v43  ;;  %v2592_v52 = vsel %vm2080_vm13, %v1824_v41, %v2336_v46  ;;  %v2339_v15 = vmul.f32 0.01, %v1827_v29  ;;  %v1828_v55 = vadd.f32 %v3790_v18, %v1566_v44  ;;  %v1318_v46 = vld [vmem:[%s6063_s4 + $0x520] sm:$0xff] }
 0x24a   : > { %2848 = vst.msk [vmem:[%s6063_s4 + $0x490] sm:$0xff] %vm1070_vm1, %v2592_v52  ;;  %v2593_v36 = vsel %vm2081_vm14, %v1825_v54, %v2337_v42  ;;  %v1829_v58 = vadd.f32 %v3790_v18, %v1567_v0  ;;  %v1568_v48 = vmul.f32 %v3754_v47, %v1306_v23  ;;  %v1569_v1 = vmul.f32 %v3754_v47, %v1307_v49  ;;  %v1319_v0 = vld [vmem:[%s6063_s4 + $0x528] sm:$0xff] }
 0x24b   : > { %v2594_v57 = vsel %vm2082_vm15, %v1826_v43, %v2338_v51  ;;  %2849 = vst.msk [vmem:[%s6063_s4 + $0x498] sm:$0xff] %vm1070_vm1, %v2593_v36  ;;  %v2595_v6 = vsel %vm2083_vm0, %v1827_v29, %v2339_v15  ;;  %vm2084_vm2 = vcmp.ge.f32.partialorder %v1828_v55, 0.0  ;;  %v2340_v25 = vmul.f32 0.01, %v1828_v55  ;;  %v1320_v15 = vld [vmem:[%s6063_s4 + $0x530] sm:$0xff] }
 0x24c   : > { %2850 = vst.msk [vmem:[%s6063_s4 + $0x4a0] sm:$0xff] %vm1070_vm1, %v2594_v57  ;;  %2851 = vst.msk [vmem:[%s6063_s4 + $0x4a8] sm:$0xff] %vm1070_vm1, %v2595_v6  ;;  %vm2085_vm3 = vcmp.ge.f32.partialorder %v1829_v58, 0.0  ;;  %v2341_v10 = vmul.f32 0.01, %v1829_v58  ;;  %v1830_v2 = vadd.f32 %v3790_v18, %v1568_v48  ;;  %v1570_v63 = vmul.f32 %v3754_v47, %v1308_v53  ;;  %v1322_v48 = vld [vmem:[%s6063_s4 + $0x540] sm:$0xff] }
 0x24d   : > { %v2596_v3 = vsel %vm2084_vm2, %v1828_v55, %v2340_v25  ;;  %v1831_v20 = vadd.f32 %v3790_v18, %v1569_v1  ;;  %v1571_v12 = vmul.f32 %v3754_v47, %v1309_v60  ;;  %v1572_v7 = vmul.f32 %v3754_v47, %v1310_v61 }
 0x24e   : > { %2852 = vst.msk [vmem:[%s6063_s4 + $0x4b0] sm:$0xff] %vm1070_vm1, %v2596_v3  ;;  %v2597_v31 = vsel %vm2085_vm3, %v1829_v58, %v2341_v10  ;;  %vm2086_vm4 = vcmp.ge.f32.partialorder %v1830_v2, 0.0  ;;  %v2342_v35 = vmul.f32 0.01, %v1830_v2  ;;  %v1832_v9 = vadd.f32 %v3790_v18, %v1570_v63  ;;  %v1321_v58 = vld [vmem:[%s6063_s4 + $0x538] sm:$0xff] }
 0x24f   : > { %2853 = vst.msk [vmem:[%s6063_s4 + $0x4b8] sm:$0xff] %vm1070_vm1, %v2597_v31  ;;  %vm2087_vm5 = vcmp.ge.f32.partialorder %v1831_v20, 0.0  ;;  %v2343_v13 = vmul.f32 0.01, %v1831_v20  ;;  %v1833_v14 = vadd.f32 %v3790_v18, %v1571_v12  ;;  %v1834_v45 = vadd.f32 %v3790_v18, %v1572_v7  ;;  %v1323_v12 = vld [vmem:[%s6063_s4 + $0x548] sm:$0xff] }
 0x250   : > { %v2598_v39 = vsel %vm2086_vm4, %v1830_v2, %v2342_v35  ;;  %vm2088_vm6 = vcmp.ge.f32.partialorder %v1832_v9, 0.0  ;;  %v2344_v30 = vmul.f32 0.01, %v1832_v9  ;;  %v1573_v19 = vmul.f32 %v3754_v47, %v1311_v8 }
 0x251   : > { %2854 = vst.msk [vmem:[%s6063_s4 + $0x4c0] sm:$0xff] %vm1070_vm1, %v2598_v39  ;;  %v2599_v22 = vsel %vm2087_vm5, %v1831_v20, %v2343_v13  ;;  %vm2089_vm7 = vcmp.ge.f32.partialorder %v1833_v14, 0.0  ;;  %v2345_v26 = vmul.f32 0.01, %v1833_v14  ;;  %vm2090_vm8 = vcmp.ge.f32.partialorder %v1834_v45, 0.0 }
 0x252   : > { %2855 = vst.msk [vmem:[%s6063_s4 + $0x4c8] sm:$0xff] %vm1070_vm1, %v2599_v22  ;;  %v2600_v56 = vsel %vm2088_vm6, %v1832_v9, %v2344_v30  ;;  %v2346_v27 = vmul.f32 0.01, %v1834_v45  ;;  %v1835_v34 = vadd.f32 %v3790_v18, %v1573_v19  ;;  %v1574_v28 = vmul.f32 %v3754_v47, %v1312_v16  ;;  %v1325_v30 = vld [vmem:[%s6063_s4 + $0x558] sm:$0xff]  ;;  %v1326_v19 = vld [vmem:[%s6063_s4 + $0x560] sm:$0xff] }
 0x253   : > { %2856 = vst.msk [vmem:[%s6063_s4 + $0x4d0] sm:$0xff] %vm1070_vm1, %v2600_v56  ;;  %v2601_v4 = vsel %vm2089_vm7, %v1833_v14, %v2345_v26  ;;  %v1575_v32 = vmul.f32 %v3754_v47, %v1313_v21  ;;  %v1576_v50 = vmul.f32 %v3754_v47, %v1314_v40  ;;  %v1577_v33 = vmul.f32 %v3754_v47, %v1315_v24  ;;  %v1324_v14 = vld [vmem:[%s6063_s4 + $0x550] sm:$0xff]  ;;  %v1327_v21 = vld [vmem:[%s6063_s4 + $0x568] sm:$0xff] }
 0x254   : > { %2857 = vst.msk [vmem:[%s6063_s4 + $0x4d8] sm:$0xff] %vm1070_vm1, %v2601_v4  ;;  %v2602_v62 = vsel %vm2090_vm8, %v1834_v45, %v2346_v27  ;;  %vm2091_vm9 = vcmp.ge.f32.partialorder %v1835_v34, 0.0  ;;  %v2347_v37 = vmul.f32 0.01, %v1835_v34  ;;  %v1836_v38 = vadd.f32 %v3790_v18, %v1574_v28 }
 0x255   : > { %2858 = vst.msk [vmem:[%s6063_s4 + $0x4e0] sm:$0xff] %vm1070_vm1, %v2602_v62  ;;  %v1837_v17 = vadd.f32 %v3790_v18, %v1575_v32  ;;  %v1838_v41 = vadd.f32 %v3790_v18, %v1576_v50  ;;  %v1839_v54 = vadd.f32 %v3790_v18, %v1577_v33  ;;  %v1578_v43 = vmul.f32 %v3754_v47, %v1316_v59  ;;  %v1329_v50 = vld [vmem:[%s6063_s4 + $0x578] sm:$0xff] }
 0x256   : > { %v2603_v29 = vsel %vm2091_vm9, %v1835_v34, %v2347_v37  ;;  %vm2092_vm10 = vcmp.ge.f32.partialorder %v1836_v38, 0.0  ;;  %v2348_v44 = vmul.f32 0.01, %v1836_v38  ;;  %v1579_v11 = vmul.f32 %v3754_v47, %v1317_v5  ;;  %v1328_v34 = vld [vmem:[%s6063_s4 + $0x570] sm:$0xff] }
 0x257   : > { %2859 = vst.msk [vmem:[%s6063_s4 + $0x4e8] sm:$0xff] %vm1070_vm1, %v2603_v29  ;;  %vm2093_vm11 = vcmp.ge.f32.partialorder %v1837_v17, 0.0  ;;  %v2349_v23 = vmul.f32 0.01, %v1837_v17  ;;  %vm2094_vm12 = vcmp.ge.f32.partialorder %v1838_v41, 0.0  ;;  %vm2095_vm13 = vcmp.ge.f32.partialorder %v1839_v54, 0.0 }
 0x258   : > { %v2350_v49 = vmul.f32 0.01, %v1838_v41  ;;  %v2604_v42 = vsel %vm2092_vm10, %v1836_v38, %v2348_v44  ;;  %v2351_v51 = vmul.f32 0.01, %v1839_v54  ;;  %v1840_v52 = vadd.f32 %v3790_v18, %v1578_v43  ;;  %v1330_v44 = vld [vmem:[%s6063_s4 + $0x580] sm:$0xff] }
 0x259   : > { %2860 = vst.msk [vmem:[%s6063_s4 + $0x4f0] sm:$0xff] %vm1070_vm1, %v2604_v42  ;;  %v2605_v55 = vsel %vm2093_vm11, %v1837_v17, %v2349_v23  ;;  %v1841_v36 = vadd.f32 %v3790_v18, %v1579_v11  ;;  %v1580_v57 = vmul.f32 %v3754_v47, %v1318_v46  ;;  %v1581_v6 = vmul.f32 %v3754_v47, %v1319_v0  ;;  %v1331_v11 = vld [vmem:[%s6063_s4 + $0x588] sm:$0xff] }
 0x25a   : > { %v2606_v53 = vsel %vm2094_vm12, %v1838_v41, %v2350_v49  ;;  %2861 = vst.msk [vmem:[%s6063_s4 + $0x4f8] sm:$0xff] %vm1070_vm1, %v2605_v55  ;;  %v2607_v60 = vsel %vm2095_vm13, %v1839_v54, %v2351_v51  ;;  %vm2096_vm14 = vcmp.ge.f32.partialorder %v1840_v52, 0.0  ;;  %v2352_v61 = vmul.f32 0.01, %v1840_v52  ;;  %v1332_v51 = vld [vmem:[%s6063_s4 + $0x590] sm:$0xff] }
 0x25b   : > { %2862 = vst.msk [vmem:[%s6063_s4 + $0x500] sm:$0xff] %vm1070_vm1, %v2606_v53  ;;  %2863 = vst.msk [vmem:[%s6063_s4 + $0x508] sm:$0xff] %vm1070_vm1, %v2607_v60  ;;  %vm2097_vm15 = vcmp.ge.f32.partialorder %v1841_v36, 0.0  ;;  %v2353_v25 = vmul.f32 0.01, %v1841_v36  ;;  %v1842_v1 = vadd.f32 %v3790_v18, %v1580_v57  ;;  %v1582_v10 = vmul.f32 %v3754_v47, %v1320_v15  ;;  %v1334_v57 = vld [vmem:[%s6063_s4 + $0x5a0] sm:$0xff] }
 0x25c   : > { %v2608_v2 = vsel %vm2096_vm14, %v1840_v52, %v2352_v61  ;;  %v1843_v63 = vadd.f32 %v3790_v18, %v1581_v6  ;;  %v1583_v3 = vmul.f32 %v3754_v47, %v1321_v58  ;;  %v1584_v20 = vmul.f32 %v3754_v47, %v1322_v48 }
 0x25d   : > { %2864 = vst.msk [vmem:[%s6063_s4 + $0x510] sm:$0xff] %vm1070_vm1, %v2608_v2  ;;  %v2609_v7 = vsel %vm2097_vm15, %v1841_v36, %v2353_v25  ;;  %vm2098_vm0 = vcmp.ge.f32.partialorder %v1842_v1, 0.0  ;;  %v2354_v8 = vmul.f32 0.01, %v1842_v1  ;;  %v1844_v31 = vadd.f32 %v3790_v18, %v1582_v10  ;;  %v1333_v36 = vld [vmem:[%s6063_s4 + $0x598] sm:$0xff] }
 0x25e   : > { %2865 = vst.msk [vmem:[%s6063_s4 + $0x518] sm:$0xff] %vm1070_vm1, %v2609_v7  ;;  %vm2099_vm2 = vcmp.ge.f32.partialorder %v1843_v63, 0.0  ;;  %v2355_v35 = vmul.f32 0.01, %v1843_v63  ;;  %v1845_v9 = vadd.f32 %v3790_v18, %v1583_v3  ;;  %v1846_v13 = vadd.f32 %v3790_v18, %v1584_v20  ;;  %v1335_v3 = vld [vmem:[%s6063_s4 + $0x5a8] sm:$0xff] }
 0x25f   : > { %v2610_v45 = vsel %vm2098_vm0, %v1842_v1, %v2354_v8  ;;  %vm2100_vm3 = vcmp.ge.f32.partialorder %v1844_v31, 0.0  ;;  %v2356_v16 = vmul.f32 0.01, %v1844_v31  ;;  %v1585_v39 = vmul.f32 %v3754_v47, %v1323_v12 }
 0x260   : > { %2866 = vst.msk [vmem:[%s6063_s4 + $0x520] sm:$0xff] %vm1070_vm1, %v2610_v45  ;;  %v2611_v40 = vsel %vm2099_vm2, %v1843_v63, %v2355_v35  ;;  %vm2101_vm4 = vcmp.ge.f32.partialorder %v1845_v9, 0.0  ;;  %v2357_v24 = vmul.f32 0.01, %v1845_v9  ;;  %vm2102_vm5 = vcmp.ge.f32.partialorder %v1846_v13, 0.0 }
 0x261   : > { %2867 = vst.msk [vmem:[%s6063_s4 + $0x528] sm:$0xff] %vm1070_vm1, %v2611_v40  ;;  %v2612_v22 = vsel %vm2100_vm3, %v1844_v31, %v2356_v16  ;;  %v2358_v26 = vmul.f32 0.01, %v1846_v13  ;;  %v1847_v56 = vadd.f32 %v3790_v18, %v1585_v39  ;;  %v1586_v27 = vmul.f32 %v3754_v47, %v1324_v14  ;;  %v1337_v16 = vld [vmem:[%s6063_s4 + $0x5b8] sm:$0xff]  ;;  %v1338_v39 = vld [vmem:[%s6063_s4 + $0x5c0] sm:$0xff] }
 0x262   : > { %2868 = vst.msk [vmem:[%s6063_s4 + $0x530] sm:$0xff] %vm1070_vm1, %v2612_v22  ;;  %v2613_v28 = vsel %vm2101_vm4, %v1845_v9, %v2357_v24  ;;  %v1587_v59 = vmul.f32 %v3754_v47, %v1325_v30  ;;  %v1588_v4 = vmul.f32 %v3754_v47, %v1326_v19  ;;  %v1589_v32 = vmul.f32 %v3754_v47, %v1327_v21  ;;  %v1336_v9 = vld [vmem:[%s6063_s4 + $0x5b0] sm:$0xff]  ;;  %v1339_v30 = vld [vmem:[%s6063_s4 + $0x5c8] sm:$0xff] }
 0x263   : > { %2869 = vst.msk [vmem:[%s6063_s4 + $0x538] sm:$0xff] %vm1070_vm1, %v2613_v28  ;;  %v2614_v33 = vsel %vm2102_vm5, %v1846_v13, %v2358_v26  ;;  %vm2103_vm6 = vcmp.ge.f32.partialorder %v1847_v56, 0.0  ;;  %v2359_v5 = vmul.f32 0.01, %v1847_v56  ;;  %v1848_v62 = vadd.f32 %v3790_v18, %v1586_v27 }
 0x264   : > { %2870 = vst.msk [vmem:[%s6063_s4 + $0x540] sm:$0xff] %vm1070_vm1, %v2614_v33  ;;  %v1849_v37 = vadd.f32 %v3790_v18, %v1587_v59  ;;  %v1850_v38 = vadd.f32 %v3790_v18, %v1588_v4  ;;  %v1851_v17 = vadd.f32 %v3790_v18, %v1589_v32  ;;  %v1590_v41 = vmul.f32 %v3754_v47, %v1328_v34  ;;  %v1341_v4 = vld [vmem:[%s6063_s4 + $0x5d8] sm:$0xff] }
 0x265   : > { %v2615_v54 = vsel %vm2103_vm6, %v1847_v56, %v2359_v5  ;;  %vm2104_vm7 = vcmp.ge.f32.partialorder %v1848_v62, 0.0  ;;  %v2360_v43 = vmul.f32 0.01, %v1848_v62  ;;  %v1591_v29 = vmul.f32 %v3754_v47, %v1329_v50  ;;  %v1340_v56 = vld [vmem:[%s6063_s4 + $0x5d0] sm:$0xff] }
 0x266   : > { %2871 = vst.msk [vmem:[%s6063_s4 + $0x548] sm:$0xff] %vm1070_vm1, %v2615_v54  ;;  %vm2105_vm8 = vcmp.ge.f32.partialorder %v1849_v37, 0.0  ;;  %v2361_v46 = vmul.f32 0.01, %v1849_v37  ;;  %vm2106_vm9 = vcmp.ge.f32.partialorder %v1850_v38, 0.0  ;;  %vm2107_vm10 = vcmp.ge.f32.partialorder %v1851_v17, 0.0 }
 0x267   : > { %v2362_v0 = vmul.f32 0.01, %v1850_v38  ;;  %v2616_v23 = vsel %vm2104_vm7, %v1848_v62, %v2360_v43  ;;  %v2363_v49 = vmul.f32 0.01, %v1851_v17  ;;  %v1852_v42 = vadd.f32 %v3790_v18, %v1590_v41  ;;  %v1342_v43 = vld [vmem:[%s6063_s4 + $0x5e0] sm:$0xff] }
 0x268   : > { %2872 = vst.msk [vmem:[%s6063_s4 + $0x550] sm:$0xff] %vm1070_vm1, %v2616_v23  ;;  %v2617_v52 = vsel %vm2105_vm8, %v1849_v37, %v2361_v46  ;;  %v1853_v55 = vadd.f32 %v3790_v18, %v1591_v29  ;;  %v1592_v53 = vmul.f32 %v3754_v47, %v1330_v44  ;;  %v1593_v60 = vmul.f32 %v3754_v47, %v1331_v11  ;;  %v1343_v29 = vld [vmem:[%s6063_s4 + $0x5e8] sm:$0xff] }
 0x269   : > { %v2618_v15 = vsel %vm2106_vm9, %v1850_v38, %v2362_v0  ;;  %2873 = vst.msk [vmem:[%s6063_s4 + $0x558] sm:$0xff] %vm1070_vm1, %v2617_v52  ;;  %v2619_v58 = vsel %vm2107_vm10, %v1851_v17, %v2363_v49  ;;  %vm2108_vm11 = vcmp.ge.f32.partialorder %v1852_v42, 0.0  ;;  %v2364_v48 = vmul.f32 0.01, %v1852_v42  ;;  %v1344_v49 = vld [vmem:[%s6063_s4 + $0x5f0] sm:$0xff] }
 0x26a   : > { %2874 = vst.msk [vmem:[%s6063_s4 + $0x560] sm:$0xff] %vm1070_vm1, %v2618_v15  ;;  %2875 = vst.msk [vmem:[%s6063_s4 + $0x568] sm:$0xff] %vm1070_vm1, %v2619_v58  ;;  %vm2109_vm12 = vcmp.ge.f32.partialorder %v1853_v55, 0.0  ;;  %v2365_v61 = vmul.f32 0.01, %v1853_v55  ;;  %v1854_v6 = vadd.f32 %v3790_v18, %v1592_v53  ;;  %v1594_v25 = vmul.f32 %v3754_v47, %v1332_v51  ;;  %v1346_v53 = vld [vmem:[%s6063_s4 + $0x600] sm:$0xff] }
 0x26b   : > { %v2620_v1 = vsel %vm2108_vm11, %v1852_v42, %v2364_v48  ;;  %v1855_v10 = vadd.f32 %v3790_v18, %v1593_v60  ;;  %v1595_v2 = vmul.f32 %v3754_v47, %v1333_v36  ;;  %v1596_v63 = vmul.f32 %v3754_v47, %v1334_v57 }
 0x26c   : > { %2876 = vst.msk [vmem:[%s6063_s4 + $0x570] sm:$0xff] %vm1070_vm1, %v2620_v1  ;;  %v2621_v20 = vsel %vm2109_vm12, %v1853_v55, %v2365_v61  ;;  %vm2110_vm13 = vcmp.ge.f32.partialorder %v1854_v6, 0.0  ;;  %v2366_v12 = vmul.f32 0.01, %v1854_v6  ;;  %v1856_v7 = vadd.f32 %v3790_v18, %v1594_v25  ;;  %v1345_v55 = vld [vmem:[%s6063_s4 + $0x5f8] sm:$0xff] }
 0x26d   : > { %2877 = vst.msk [vmem:[%s6063_s4 + $0x578] sm:$0xff] %vm1070_vm1, %v2621_v20  ;;  %vm2111_vm14 = vcmp.ge.f32.partialorder %v1855_v10, 0.0  ;;  %v2367_v8 = vmul.f32 0.01, %v1855_v10  ;;  %v1857_v31 = vadd.f32 %v3790_v18, %v1595_v2  ;;  %v1858_v35 = vadd.f32 %v3790_v18, %v1596_v63  ;;  %v1347_v2 = vld [vmem:[%s6063_s4 + $0x608] sm:$0xff] }
 0x26e   : > { %v2622_v13 = vsel %vm2110_vm13, %v1854_v6, %v2366_v12  ;;  %vm2112_vm15 = vcmp.ge.f32.partialorder %v1856_v7, 0.0  ;;  %v2368_v14 = vmul.f32 0.01, %v1856_v7  ;;  %v1597_v45 = vmul.f32 %v3754_v47, %v1335_v3 }
 0x26f   : > { %2878 = vst.msk [vmem:[%s6063_s4 + $0x580] sm:$0xff] %vm1070_vm1, %v2622_v13  ;;  %v2623_v19 = vsel %vm2111_vm14, %v1855_v10, %v2367_v8  ;;  %vm2113_vm0 = vcmp.ge.f32.partialorder %v1857_v31, 0.0  ;;  %v2369_v21 = vmul.f32 0.01, %v1857_v31  ;;  %vm2114_vm2 = vcmp.ge.f32.partialorder %v1858_v35, 0.0 }
 0x270   : > { %2879 = vst.msk [vmem:[%s6063_s4 + $0x588] sm:$0xff] %vm1070_vm1, %v2623_v19  ;;  %v2624_v40 = vsel %vm2112_vm15, %v1856_v7, %v2368_v14  ;;  %v2370_v24 = vmul.f32 0.01, %v1858_v35  ;;  %v1859_v22 = vadd.f32 %v3790_v18, %v1597_v45  ;;  %v1598_v26 = vmul.f32 %v3754_v47, %v1336_v9  ;;  %v1349_v14 = vld [vmem:[%s6063_s4 + $0x618] sm:$0xff]  ;;  %v1350_v45 = vld [vmem:[%s6063_s4 + $0x620] sm:$0xff] }
 0x271   : > { %2880 = vst.msk [vmem:[%s6063_s4 + $0x590] sm:$0xff] %vm1070_vm1, %v2624_v40  ;;  %v2625_v27 = vsel %vm2113_vm0, %v1857_v31, %v2369_v21  ;;  %v1599_v34 = vmul.f32 %v3754_v47, %v1337_v16  ;;  %v1600_v28 = vmul.f32 %v3754_v47, %v1338_v39  ;;  %v1601_v59 = vmul.f32 %v3754_v47, %v1339_v30  ;;  %v1348_v31 = vld [vmem:[%s6063_s4 + $0x610] sm:$0xff]  ;;  %v1351_v16 = vld [vmem:[%s6063_s4 + $0x628] sm:$0xff] }
 0x272   : > { %2881 = vst.msk [vmem:[%s6063_s4 + $0x598] sm:$0xff] %vm1070_vm1, %v2625_v27  ;;  %v2626_v32 = vsel %vm2114_vm2, %v1858_v35, %v2370_v24  ;;  %vm2115_vm3 = vcmp.ge.f32.partialorder %v1859_v22, 0.0  ;;  %v2371_v50 = vmul.f32 0.01, %v1859_v22  ;;  %v1860_v33 = vadd.f32 %v3790_v18, %v1598_v26 }
 0x273   : > { %2882 = vst.msk [vmem:[%s6063_s4 + $0x5a0] sm:$0xff] %vm1070_vm1, %v2626_v32  ;;  %v1861_v5 = vadd.f32 %v3790_v18, %v1599_v34  ;;  %v1862_v62 = vadd.f32 %v3790_v18, %v1600_v28  ;;  %v1863_v37 = vadd.f32 %v3790_v18, %v1601_v59  ;;  %v1602_v38 = vmul.f32 %v3754_v47, %v1340_v56  ;;  %v1353_v28 = vld [vmem:[%s6063_s4 + $0x638] sm:$0xff] }
 0x274   : > { %v2627_v17 = vsel %vm2115_vm3, %v1859_v22, %v2371_v50  ;;  %vm2116_vm4 = vcmp.ge.f32.partialorder %v1860_v33, 0.0  ;;  %v2372_v41 = vmul.f32 0.01, %v1860_v33  ;;  %v1603_v54 = vmul.f32 %v3754_v47, %v1341_v4  ;;  %v1352_v22 = vld [vmem:[%s6063_s4 + $0x630] sm:$0xff] }
 0x275   : > { %2883 = vst.msk [vmem:[%s6063_s4 + $0x5a8] sm:$0xff] %vm1070_vm1, %v2627_v17  ;;  %vm2117_vm5 = vcmp.ge.f32.partialorder %v1861_v5, 0.0  ;;  %v2373_v44 = vmul.f32 0.01, %v1861_v5  ;;  %vm2118_vm6 = vcmp.ge.f32.partialorder %v1862_v62, 0.0  ;;  %vm2119_vm7 = vcmp.ge.f32.partialorder %v1863_v37, 0.0 }
 0x276   : > { %v2374_v11 = vmul.f32 0.01, %v1862_v62  ;;  %v2628_v46 = vsel %vm2116_vm4, %v1860_v33, %v2372_v41  ;;  %v2375_v0 = vmul.f32 0.01, %v1863_v37  ;;  %v1864_v23 = vadd.f32 %v3790_v18, %v1602_v38  ;;  %v1354_v41 = vld [vmem:[%s6063_s4 + $0x640] sm:$0xff] }
 0x277   : > { %2884 = vst.msk [vmem:[%s6063_s4 + $0x5b0] sm:$0xff] %vm1070_vm1, %v2628_v46  ;;  %v2629_v42 = vsel %vm2117_vm5, %v1861_v5, %v2373_v44  ;;  %v1865_v52 = vadd.f32 %v3790_v18, %v1603_v54  ;;  %v1604_v15 = vmul.f32 %v3754_v47, %v1342_v43  ;;  %v1605_v58 = vmul.f32 %v3754_v47, %v1343_v29  ;;  %v1355_v54 = vld [vmem:[%s6063_s4 + $0x648] sm:$0xff] }
 0x278   : > { %v2630_v51 = vsel %vm2118_vm6, %v1862_v62, %v2374_v11  ;;  %2885 = vst.msk [vmem:[%s6063_s4 + $0x5b8] sm:$0xff] %vm1070_vm1, %v2629_v42  ;;  %v2631_v36 = vsel %vm2119_vm7, %v1863_v37, %v2375_v0  ;;  %vm2120_vm8 = vcmp.ge.f32.partialorder %v1864_v23, 0.0  ;;  %v2376_v57 = vmul.f32 0.01, %v1864_v23  ;;  %v1356_v0 = vld [vmem:[%s6063_s4 + $0x650] sm:$0xff] }
 0x279   : > { %2886 = vst.msk [vmem:[%s6063_s4 + $0x5c0] sm:$0xff] %vm1070_vm1, %v2630_v51  ;;  %2887 = vst.msk [vmem:[%s6063_s4 + $0x5c8] sm:$0xff] %vm1070_vm1, %v2631_v36  ;;  %vm2121_vm9 = vcmp.ge.f32.partialorder %v1865_v52, 0.0  ;;  %v2377_v48 = vmul.f32 0.01, %v1865_v52  ;;  %v1866_v60 = vadd.f32 %v3790_v18, %v1604_v15  ;;  %v1606_v61 = vmul.f32 %v3754_v47, %v1344_v49  ;;  %v1358_v15 = vld [vmem:[%s6063_s4 + $0x660] sm:$0xff] }
 0x27a   : > { %v2632_v6 = vsel %vm2120_vm8, %v1864_v23, %v2376_v57  ;;  %v1867_v25 = vadd.f32 %v3790_v18, %v1605_v58  ;;  %v1607_v1 = vmul.f32 %v3754_v47, %v1345_v55  ;;  %v1608_v10 = vmul.f32 %v3754_v47, %v1346_v53 }
 0x27b   : > { %2888 = vst.msk [vmem:[%s6063_s4 + $0x5d0] sm:$0xff] %vm1070_vm1, %v2632_v6  ;;  %v2633_v63 = vsel %vm2121_vm9, %v1865_v52, %v2377_v48  ;;  %vm2122_vm10 = vcmp.ge.f32.partialorder %v1866_v60, 0.0  ;;  %v2378_v3 = vmul.f32 0.01, %v1866_v60  ;;  %v1868_v20 = vadd.f32 %v3790_v18, %v1606_v61  ;;  %v1357_v52 = vld [vmem:[%s6063_s4 + $0x658] sm:$0xff] }
 0x27c   : > { %2889 = vst.msk [vmem:[%s6063_s4 + $0x5d8] sm:$0xff] %vm1070_vm1, %v2633_v63  ;;  %vm2123_vm11 = vcmp.ge.f32.partialorder %v1867_v25, 0.0  ;;  %v2379_v12 = vmul.f32 0.01, %v1867_v25  ;;  %v1869_v7 = vadd.f32 %v3790_v18, %v1607_v1  ;;  %v1870_v8 = vadd.f32 %v3790_v18, %v1608_v10  ;;  %v1359_v1 = vld [vmem:[%s6063_s4 + $0x668] sm:$0xff] }
 0x27d   : > { %v2634_v35 = vsel %vm2122_vm10, %v1866_v60, %v2378_v3  ;;  %vm2124_vm12 = vcmp.ge.f32.partialorder %v1868_v20, 0.0  ;;  %v2380_v9 = vmul.f32 0.01, %v1868_v20  ;;  %v1609_v13 = vmul.f32 %v3754_v47, %v1347_v2 }
 0x27e   : > { %2890 = vst.msk [vmem:[%s6063_s4 + $0x5e0] sm:$0xff] %vm1070_vm1, %v2634_v35  ;;  %v2635_v39 = vsel %vm2123_vm11, %v1867_v25, %v2379_v12  ;;  %vm2125_vm13 = vcmp.ge.f32.partialorder %v1869_v7, 0.0  ;;  %v2381_v30 = vmul.f32 0.01, %v1869_v7  ;;  %vm2126_vm14 = vcmp.ge.f32.partialorder %v1870_v8, 0.0 }
 0x27f   : > { %2891 = vst.msk [vmem:[%s6063_s4 + $0x5e8] sm:$0xff] %vm1070_vm1, %v2635_v39  ;;  %v2636_v19 = vsel %vm2124_vm12, %v1868_v20, %v2380_v9  ;;  %v2382_v21 = vmul.f32 0.01, %v1870_v8  ;;  %v1871_v40 = vadd.f32 %v3790_v18, %v1609_v13  ;;  %v1610_v24 = vmul.f32 %v3754_v47, %v1348_v31  ;;  %v1361_v9 = vld [vmem:[%s6063_s4 + $0x678] sm:$0xff]  ;;  %v1362_v13 = vld [vmem:[%s6063_s4 + $0x680] sm:$0xff] }
 0x280   : > { %2892 = vst.msk [vmem:[%s6063_s4 + $0x5f0] sm:$0xff] %vm1070_vm1, %v2636_v19  ;;  %v2637_v26 = vsel %vm2125_vm13, %v1869_v7, %v2381_v30  ;;  %v1611_v56 = vmul.f32 %v3754_v47, %v1349_v14  ;;  %v1612_v27 = vmul.f32 %v3754_v47, %v1350_v45  ;;  %v1613_v34 = vmul.f32 %v3754_v47, %v1351_v16  ;;  %v1360_v7 = vld [vmem:[%s6063_s4 + $0x670] sm:$0xff]  ;;  %v1363_v14 = vld [vmem:[%s6063_s4 + $0x688] sm:$0xff] }
 0x281   : > { %2893 = vst.msk [vmem:[%s6063_s4 + $0x5f8] sm:$0xff] %vm1070_vm1, %v2637_v26  ;;  %v2638_v59 = vsel %vm2126_vm14, %v1870_v8, %v2382_v21  ;;  %vm2127_vm15 = vcmp.ge.f32.partialorder %v1871_v40, 0.0  ;;  %v2383_v4 = vmul.f32 0.01, %v1871_v40  ;;  %v1872_v32 = vadd.f32 %v3790_v18, %v1610_v24 }
 0x282   : > { %2894 = vst.msk [vmem:[%s6063_s4 + $0x600] sm:$0xff] %vm1070_vm1, %v2638_v59  ;;  %v1873_v50 = vadd.f32 %v3790_v18, %v1611_v56  ;;  %v1874_v33 = vadd.f32 %v3790_v18, %v1612_v27  ;;  %v1875_v5 = vadd.f32 %v3790_v18, %v1613_v34  ;;  %v1614_v62 = vmul.f32 %v3754_v47, %v1352_v22  ;;  %v1365_v27 = vld [vmem:[%s6063_s4 + $0x698] sm:$0xff] }
 0x283   : > { %v2639_v37 = vsel %vm2127_vm15, %v1871_v40, %v2383_v4  ;;  %vm2128_vm0 = vcmp.ge.f32.partialorder %v1872_v32, 0.0  ;;  %v2384_v38 = vmul.f32 0.01, %v1872_v32  ;;  %v1615_v17 = vmul.f32 %v3754_v47, %v1353_v28  ;;  %v1364_v40 = vld [vmem:[%s6063_s4 + $0x690] sm:$0xff] }
 0x284   : > { %2895 = vst.msk [vmem:[%s6063_s4 + $0x608] sm:$0xff] %vm1070_vm1, %v2639_v37  ;;  %vm2129_vm2 = vcmp.ge.f32.partialorder %v1873_v50, 0.0  ;;  %v2385_v43 = vmul.f32 0.01, %v1873_v50  ;;  %vm2130_vm3 = vcmp.ge.f32.partialorder %v1874_v33, 0.0  ;;  %vm2131_vm4 = vcmp.ge.f32.partialorder %v1875_v5, 0.0 }
 0x285   : > { %v2386_v29 = vmul.f32 0.01, %v1874_v33  ;;  %v2640_v44 = vsel %vm2128_vm0, %v1872_v32, %v2384_v38  ;;  %v2387_v11 = vmul.f32 0.01, %v1875_v5  ;;  %v1876_v46 = vadd.f32 %v3790_v18, %v1614_v62  ;;  %v1366_v38 = vld [vmem:[%s6063_s4 + $0x6a0] sm:$0xff] }
 0x286   : > { %2896 = vst.msk [vmem:[%s6063_s4 + $0x610] sm:$0xff] %vm1070_vm1, %v2640_v44  ;;  %v2641_v23 = vsel %vm2129_vm2, %v1873_v50, %v2385_v43  ;;  %v1877_v42 = vadd.f32 %v3790_v18, %v1615_v17  ;;  %v1616_v51 = vmul.f32 %v3754_v47, %v1354_v41  ;;  %v1617_v36 = vmul.f32 %v3754_v47, %v1355_v54  ;;  %v1367_v17 = vld [vmem:[%s6063_s4 + $0x6a8] sm:$0xff] }
 0x287   : > { %v2642_v49 = vsel %vm2130_vm3, %v1874_v33, %v2386_v29  ;;  %2897 = vst.msk [vmem:[%s6063_s4 + $0x618] sm:$0xff] %vm1070_vm1, %v2641_v23  ;;  %v2643_v55 = vsel %vm2131_vm4, %v1875_v5, %v2387_v11  ;;  %vm2132_vm5 = vcmp.ge.f32.partialorder %v1876_v46, 0.0  ;;  %v2388_v53 = vmul.f32 0.01, %v1876_v46  ;;  %v1368_v11 = vld [vmem:[%s6063_s4 + $0x6b0] sm:$0xff] }
 0x288   : > { %2898 = vst.msk [vmem:[%s6063_s4 + $0x620] sm:$0xff] %vm1070_vm1, %v2642_v49  ;;  %2899 = vst.msk [vmem:[%s6063_s4 + $0x628] sm:$0xff] %vm1070_vm1, %v2643_v55  ;;  %vm2133_vm6 = vcmp.ge.f32.partialorder %v1877_v42, 0.0  ;;  %v2389_v57 = vmul.f32 0.01, %v1877_v42  ;;  %v1878_v58 = vadd.f32 %v3790_v18, %v1616_v51  ;;  %v1618_v48 = vmul.f32 %v3754_v47, %v1356_v0  ;;  %v1370_v51 = vld [vmem:[%s6063_s4 + $0x6c0] sm:$0xff] }
 0x289   : > { %v2644_v60 = vsel %vm2132_vm5, %v1876_v46, %v2388_v53  ;;  %v1879_v61 = vadd.f32 %v3790_v18, %v1617_v36  ;;  %v1619_v6 = vmul.f32 %v3754_v47, %v1357_v52  ;;  %v1620_v25 = vmul.f32 %v3754_v47, %v1358_v15 }
 0x28a   : > { %2900 = vst.msk [vmem:[%s6063_s4 + $0x630] sm:$0xff] %vm1070_vm1, %v2644_v60  ;;  %v2645_v10 = vsel %vm2133_vm6, %v1877_v42, %v2389_v57  ;;  %vm2134_vm7 = vcmp.ge.f32.partialorder %v1878_v58, 0.0  ;;  %v2390_v2 = vmul.f32 0.01, %v1878_v58  ;;  %v1880_v63 = vadd.f32 %v3790_v18, %v1618_v48  ;;  %v1369_v42 = vld [vmem:[%s6063_s4 + $0x6b8] sm:$0xff] }
 0x28b   : > { %2901 = vst.msk [vmem:[%s6063_s4 + $0x638] sm:$0xff] %vm1070_vm1, %v2645_v10  ;;  %vm2135_vm8 = vcmp.ge.f32.partialorder %v1879_v61, 0.0  ;;  %v2391_v3 = vmul.f32 0.01, %v1879_v61  ;;  %v1881_v20 = vadd.f32 %v3790_v18, %v1619_v6  ;;  %v1882_v12 = vadd.f32 %v3790_v18, %v1620_v25  ;;  %v1371_v6 = vld [vmem:[%s6063_s4 + $0x6c8] sm:$0xff] }
 0x28c   : > { %v2646_v8 = vsel %vm2134_vm7, %v1878_v58, %v2390_v2  ;;  %vm2136_vm9 = vcmp.ge.f32.partialorder %v1880_v63, 0.0  ;;  %v2392_v31 = vmul.f32 0.01, %v1880_v63  ;;  %v1621_v35 = vmul.f32 %v3754_v47, %v1359_v1 }
 0x28d   : > { %2902 = vst.msk [vmem:[%s6063_s4 + $0x640] sm:$0xff] %vm1070_vm1, %v2646_v8  ;;  %v2647_v45 = vsel %vm2135_vm8, %v1879_v61, %v2391_v3  ;;  %vm2137_vm10 = vcmp.ge.f32.partialorder %v1881_v20, 0.0  ;;  %v2393_v16 = vmul.f32 0.01, %v1881_v20  ;;  %vm2138_vm11 = vcmp.ge.f32.partialorder %v1882_v12, 0.0 }
 0x28e   : > { %2903 = vst.msk [vmem:[%s6063_s4 + $0x648] sm:$0xff] %vm1070_vm1, %v2647_v45  ;;  %v2648_v39 = vsel %vm2136_vm9, %v1880_v63, %v2392_v31  ;;  %v2394_v30 = vmul.f32 0.01, %v1882_v12  ;;  %v1883_v19 = vadd.f32 %v3790_v18, %v1621_v35  ;;  %v1622_v21 = vmul.f32 %v3754_v47, %v1360_v7  ;;  %v1373_v31 = vld [vmem:[%s6063_s4 + $0x6d8] sm:$0xff]  ;;  %v1374_v35 = vld [vmem:[%s6063_s4 + $0x6e0] sm:$0xff] }
 0x28f   : > { %2904 = vst.msk [vmem:[%s6063_s4 + $0x650] sm:$0xff] %vm1070_vm1, %v2648_v39  ;;  %v2649_v24 = vsel %vm2137_vm10, %v1881_v20, %v2393_v16  ;;  %v1623_v22 = vmul.f32 %v3754_v47, %v1361_v9  ;;  %v1624_v26 = vmul.f32 %v3754_v47, %v1362_v13  ;;  %v1625_v56 = vmul.f32 %v3754_v47, %v1363_v14  ;;  %v1372_v20 = vld [vmem:[%s6063_s4 + $0x6d0] sm:$0xff]  ;;  %v1375_v9 = vld [vmem:[%s6063_s4 + $0x6e8] sm:$0xff] }
 0x290   : > { %2905 = vst.msk [vmem:[%s6063_s4 + $0x658] sm:$0xff] %vm1070_vm1, %v2649_v24  ;;  %v2650_v34 = vsel %vm2138_vm11, %v1882_v12, %v2394_v30  ;;  %vm2139_vm12 = vcmp.ge.f32.partialorder %v1883_v19, 0.0  ;;  %v2395_v28 = vmul.f32 0.01, %v1883_v19  ;;  %v1884_v59 = vadd.f32 %v3790_v18, %v1622_v21 }
 0x291   : > { %2906 = vst.msk [vmem:[%s6063_s4 + $0x660] sm:$0xff] %vm1070_vm1, %v2650_v34  ;;  %v1885_v4 = vadd.f32 %v3790_v18, %v1623_v22  ;;  %v1886_v32 = vadd.f32 %v3790_v18, %v1624_v26  ;;  %v1887_v50 = vadd.f32 %v3790_v18, %v1625_v56  ;;  %v1626_v33 = vmul.f32 %v3754_v47, %v1364_v40  ;;  %v1377_v26 = vld [vmem:[%s6063_s4 + $0x6f8] sm:$0xff] }
 0x292   : > { %v2651_v5 = vsel %vm2139_vm12, %v1883_v19, %v2395_v28  ;;  %vm2140_vm13 = vcmp.ge.f32.partialorder %v1884_v59, 0.0  ;;  %v2396_v62 = vmul.f32 0.01, %v1884_v59  ;;  %v1627_v37 = vmul.f32 %v3754_v47, %v1365_v27  ;;  %v1376_v19 = vld [vmem:[%s6063_s4 + $0x6f0] sm:$0xff] }
 0x293   : > { %2907 = vst.msk [vmem:[%s6063_s4 + $0x668] sm:$0xff] %vm1070_vm1, %v2651_v5  ;;  %vm2141_vm14 = vcmp.ge.f32.partialorder %v1885_v4, 0.0  ;;  %v2397_v41 = vmul.f32 0.01, %v1885_v4  ;;  %vm2142_vm15 = vcmp.ge.f32.partialorder %v1886_v32, 0.0  ;;  %vm2143_vm0 = vcmp.ge.f32.partialorder %v1887_v50, 0.0 }
 0x294   : > { %v2398_v54 = vmul.f32 0.01, %v1886_v32  ;;  %v2652_v43 = vsel %vm2140_vm13, %v1884_v59, %v2396_v62  ;;  %v2399_v29 = vmul.f32 0.01, %v1887_v50  ;;  %v1888_v44 = vadd.f32 %v3790_v18, %v1626_v33  ;;  %v1378_v62 = vld [vmem:[%s6063_s4 + $0x700] sm:$0xff] }
 0x295   : > { %2908 = vst.msk [vmem:[%s6063_s4 + $0x670] sm:$0xff] %vm1070_vm1, %v2652_v43  ;;  %v2653_v46 = vsel %vm2141_vm14, %v1885_v4, %v2397_v41  ;;  %v1889_v23 = vadd.f32 %v3790_v18, %v1627_v37  ;;  %v1628_v49 = vmul.f32 %v3754_v47, %v1366_v38  ;;  %v1629_v55 = vmul.f32 %v3754_v47, %v1367_v17  ;;  %v1379_v37 = vld [vmem:[%s6063_s4 + $0x708] sm:$0xff] }
 0x296   : > { %v2654_v0 = vsel %vm2142_vm15, %v1886_v32, %v2398_v54  ;;  %2909 = vst.msk [vmem:[%s6063_s4 + $0x678] sm:$0xff] %vm1070_vm1, %v2653_v46  ;;  %v2655_v52 = vsel %vm2143_vm0, %v1887_v50, %v2399_v29  ;;  %vm2144_vm2 = vcmp.ge.f32.partialorder %v1888_v44, 0.0  ;;  %v2400_v15 = vmul.f32 0.01, %v1888_v44  ;;  %v1380_v29 = vld [vmem:[%s6063_s4 + $0x710] sm:$0xff] }
 0x297   : > { %2910 = vst.msk [vmem:[%s6063_s4 + $0x680] sm:$0xff] %vm1070_vm1, %v2654_v0  ;;  %2911 = vst.msk [vmem:[%s6063_s4 + $0x688] sm:$0xff] %vm1070_vm1, %v2655_v52  ;;  %vm2145_vm3 = vcmp.ge.f32.partialorder %v1889_v23, 0.0  ;;  %v2401_v53 = vmul.f32 0.01, %v1889_v23  ;;  %v1890_v36 = vadd.f32 %v3790_v18, %v1628_v49  ;;  %v1630_v57 = vmul.f32 %v3754_v47, %v1368_v11  ;;  %v1382_v49 = vld [vmem:[%s6063_s4 + $0x720] sm:$0xff] }
 0x298   : > { %v2656_v58 = vsel %vm2144_vm2, %v1888_v44, %v2400_v15  ;;  %v1891_v48 = vadd.f32 %v3790_v18, %v1629_v55  ;;  %v1631_v60 = vmul.f32 %v3754_v47, %v1369_v42  ;;  %v1632_v61 = vmul.f32 %v3754_v47, %v1370_v51 }
 0x299   : > { %2912 = vst.msk [vmem:[%s6063_s4 + $0x690] sm:$0xff] %vm1070_vm1, %v2656_v58  ;;  %v2657_v25 = vsel %vm2145_vm3, %v1889_v23, %v2401_v53  ;;  %vm2146_vm4 = vcmp.ge.f32.partialorder %v1890_v36, 0.0  ;;  %v2402_v1 = vmul.f32 0.01, %v1890_v36  ;;  %v1892_v10 = vadd.f32 %v3790_v18, %v1630_v57  ;;  %v1381_v23 = vld [vmem:[%s6063_s4 + $0x718] sm:$0xff] }
 0x29a   : > { %2913 = vst.msk [vmem:[%s6063_s4 + $0x698] sm:$0xff] %vm1070_vm1, %v2657_v25  ;;  %vm2147_vm5 = vcmp.ge.f32.partialorder %v1891_v48, 0.0  ;;  %v2403_v2 = vmul.f32 0.01, %v1891_v48  ;;  %v1893_v63 = vadd.f32 %v3790_v18, %v1631_v60  ;;  %v1894_v3 = vadd.f32 %v3790_v18, %v1632_v61  ;;  %v1383_v60 = vld [vmem:[%s6063_s4 + $0x728] sm:$0xff] }
 0x29b   : > { %v2658_v12 = vsel %vm2146_vm4, %v1890_v36, %v2402_v1  ;;  %vm2148_vm6 = vcmp.ge.f32.partialorder %v1892_v10, 0.0  ;;  %v2404_v7 = vmul.f32 0.01, %v1892_v10  ;;  %v1633_v8 = vmul.f32 %v3754_v47, %v1371_v6 }
 0x29c   : > { %2914 = vst.msk [vmem:[%s6063_s4 + $0x6a0] sm:$0xff] %vm1070_vm1, %v2658_v12  ;;  %v2659_v13 = vsel %vm2147_vm5, %v1891_v48, %v2403_v2  ;;  %vm2149_vm7 = vcmp.ge.f32.partialorder %v1893_v63, 0.0  ;;  %v2405_v14 = vmul.f32 0.01, %v1893_v63  ;;  %vm2150_vm8 = vcmp.ge.f32.partialorder %v1894_v3, 0.0 }
 0x29d   : > { %2915 = vst.msk [vmem:[%s6063_s4 + $0x6a8] sm:$0xff] %vm1070_vm1, %v2659_v13  ;;  %v2660_v45 = vsel %vm2148_vm6, %v1892_v10, %v2404_v7  ;;  %v2406_v16 = vmul.f32 0.01, %v1894_v3  ;;  %v1895_v39 = vadd.f32 %v3790_v18, %v1633_v8  ;;  %v1634_v30 = vmul.f32 %v3754_v47, %v1372_v20  ;;  %v1385_v7 = vld [vmem:[%s6063_s4 + $0x738] sm:$0xff]  ;;  %v1386_v8 = vld [vmem:[%s6063_s4 + $0x740] sm:$0xff] }
 0x29e   : > { %2916 = vst.msk [vmem:[%s6063_s4 + $0x6b0] sm:$0xff] %vm1070_vm1, %v2660_v45  ;;  %v2661_v21 = vsel %vm2149_vm7, %v1893_v63, %v2405_v14  ;;  %v1635_v40 = vmul.f32 %v3754_v47, %v1373_v31  ;;  %v1636_v24 = vmul.f32 %v3754_v47, %v1374_v35  ;;  %v1637_v22 = vmul.f32 %v3754_v47, %v1375_v9  ;;  %v1384_v63 = vld [vmem:[%s6063_s4 + $0x730] sm:$0xff]  ;;  %v1387_v31 = vld [vmem:[%s6063_s4 + $0x748] sm:$0xff] }
 0x29f   : > { %2917 = vst.msk [vmem:[%s6063_s4 + $0x6b8] sm:$0xff] %vm1070_vm1, %v2661_v21  ;;  %v2662_v56 = vsel %vm2150_vm8, %v1894_v3, %v2406_v16  ;;  %vm2151_vm9 = vcmp.ge.f32.partialorder %v1895_v39, 0.0  ;;  %v2407_v27 = vmul.f32 0.01, %v1895_v39  ;;  %v1896_v34 = vadd.f32 %v3790_v18, %v1634_v30 }
 0x2a0   : > { %2918 = vst.msk [vmem:[%s6063_s4 + $0x6c0] sm:$0xff] %vm1070_vm1, %v2662_v56  ;;  %v1897_v28 = vadd.f32 %v3790_v18, %v1635_v40  ;;  %v1898_v59 = vadd.f32 %v3790_v18, %v1636_v24  ;;  %v1899_v4 = vadd.f32 %v3790_v18, %v1637_v22  ;;  %v1638_v32 = vmul.f32 %v3754_v47, %v1376_v19  ;;  %v1389_v24 = vld [vmem:[%s6063_s4 + $0x758] sm:$0xff] }
 0x2a1   : > { %v2663_v50 = vsel %vm2151_vm9, %v1895_v39, %v2407_v27  ;;  %vm2152_vm10 = vcmp.ge.f32.partialorder %v1896_v34, 0.0  ;;  %v2408_v33 = vmul.f32 0.01, %v1896_v34  ;;  %v1639_v5 = vmul.f32 %v3754_v47, %v1377_v26  ;;  %v1388_v39 = vld [vmem:[%s6063_s4 + $0x750] sm:$0xff] }
 0x2a2   : > { %2919 = vst.msk [vmem:[%s6063_s4 + $0x6c8] sm:$0xff] %vm1070_vm1, %v2663_v50  ;;  %vm2153_vm11 = vcmp.ge.f32.partialorder %v1897_v28, 0.0  ;;  %v2409_v38 = vmul.f32 0.01, %v1897_v28  ;;  %vm2154_vm12 = vcmp.ge.f32.partialorder %v1898_v59, 0.0  ;;  %vm2155_vm13 = vcmp.ge.f32.partialorder %v1899_v4, 0.0 }
 0x2a3   : > { %v2410_v17 = vmul.f32 0.01, %v1898_v59  ;;  %v2664_v41 = vsel %vm2152_vm10, %v1896_v34, %v2408_v33  ;;  %v2411_v54 = vmul.f32 0.01, %v1899_v4  ;;  %v1900_v43 = vadd.f32 %v3790_v18, %v1638_v32  ;;  %v1390_v33 = vld [vmem:[%s6063_s4 + $0x760] sm:$0xff] }
 0x2a4   : > { %2920 = vst.msk [vmem:[%s6063_s4 + $0x6d0] sm:$0xff] %vm1070_vm1, %v2664_v41  ;;  %v2665_v44 = vsel %vm2153_vm11, %v1897_v28, %v2409_v38  ;;  %v1901_v46 = vadd.f32 %v3790_v18, %v1639_v5  ;;  %v1640_v0 = vmul.f32 %v3754_v47, %v1378_v62  ;;  %v1641_v52 = vmul.f32 %v3754_v47, %v1379_v37  ;;  %v1391_v5 = vld [vmem:[%s6063_s4 + $0x768] sm:$0xff] }
 0x2a5   : > { %v2666_v11 = vsel %vm2154_vm12, %v1898_v59, %v2410_v17  ;;  %2921 = vst.msk [vmem:[%s6063_s4 + $0x6d8] sm:$0xff] %vm1070_vm1, %v2665_v44  ;;  %v2667_v42 = vsel %vm2155_vm13, %v1899_v4, %v2411_v54  ;;  %vm2156_vm14 = vcmp.ge.f32.partialorder %v1900_v43, 0.0  ;;  %v2412_v51 = vmul.f32 0.01, %v1900_v43  ;;  %v1392_v54 = vld [vmem:[%s6063_s4 + $0x770] sm:$0xff] }
 0x2a6   : > { %2922 = vst.msk [vmem:[%s6063_s4 + $0x6e0] sm:$0xff] %vm1070_vm1, %v2666_v11  ;;  %2923 = vst.msk [vmem:[%s6063_s4 + $0x6e8] sm:$0xff] %vm1070_vm1, %v2667_v42  ;;  %vm2157_vm15 = vcmp.ge.f32.partialorder %v1901_v46, 0.0  ;;  %v2413_v15 = vmul.f32 0.01, %v1901_v46  ;;  %v1902_v55 = vadd.f32 %v3790_v18, %v1640_v0  ;;  %v1642_v53 = vmul.f32 %v3754_v47, %v1380_v29  ;;  %v1394_v0 = vld [vmem:[%s6063_s4 + $0x780] sm:$0xff] }
 0x2a7   : > { %v2668_v36 = vsel %vm2156_vm14, %v1900_v43, %v2412_v51  ;;  %v1903_v57 = vadd.f32 %v3790_v18, %v1641_v52  ;;  %v1643_v58 = vmul.f32 %v3754_v47, %v1381_v23  ;;  %v1644_v48 = vmul.f32 %v3754_v47, %v1382_v49 }
 0x2a8   : > { %2924 = vst.msk [vmem:[%s6063_s4 + $0x6f0] sm:$0xff] %vm1070_vm1, %v2668_v36  ;;  %v2669_v61 = vsel %vm2157_vm15, %v1901_v46, %v2413_v15  ;;  %vm2158_vm0 = vcmp.ge.f32.partialorder %v1902_v55, 0.0  ;;  %v2414_v6 = vmul.f32 0.01, %v1902_v55  ;;  %v1904_v25 = vadd.f32 %v3790_v18, %v1642_v53  ;;  %v1393_v46 = vld [vmem:[%s6063_s4 + $0x778] sm:$0xff] }
 0x2a9   : > { %2925 = vst.msk [vmem:[%s6063_s4 + $0x6f8] sm:$0xff] %vm1070_vm1, %v2669_v61  ;;  %vm2159_vm2 = vcmp.ge.f32.partialorder %v1903_v57, 0.0  ;;  %v2415_v1 = vmul.f32 0.01, %v1903_v57  ;;  %v1905_v10 = vadd.f32 %v3790_v18, %v1643_v58  ;;  %v1906_v2 = vadd.f32 %v3790_v18, %v1644_v48  ;;  %v1395_v58 = vld [vmem:[%s6063_s4 + $0x788] sm:$0xff] }
 0x2aa   : > { %v2670_v3 = vsel %vm2158_vm0, %v1902_v55, %v2414_v6  ;;  %vm2160_vm3 = vcmp.ge.f32.partialorder %v1904_v25, 0.0  ;;  %v2416_v20 = vmul.f32 0.01, %v1904_v25  ;;  %v1645_v12 = vmul.f32 %v3754_v47, %v1383_v60 }
 0x2ab   : > { %2926 = vst.msk [vmem:[%s6063_s4 + $0x700] sm:$0xff] %vm1070_vm1, %v2670_v3  ;;  %v2671_v35 = vsel %vm2159_vm2, %v1903_v57, %v2415_v1  ;;  %vm2161_vm4 = vcmp.ge.f32.partialorder %v1905_v10, 0.0  ;;  %v2417_v9 = vmul.f32 0.01, %v1905_v10  ;;  %vm2162_vm5 = vcmp.ge.f32.partialorder %v1906_v2, 0.0 }
 0x2ac   : > { %2927 = vst.msk [vmem:[%s6063_s4 + $0x708] sm:$0xff] %vm1070_vm1, %v2671_v35  ;;  %v2672_v13 = vsel %vm2160_vm3, %v1904_v25, %v2416_v20  ;;  %v2418_v14 = vmul.f32 0.01, %v1906_v2  ;;  %v1907_v45 = vadd.f32 %v3790_v18, %v1645_v12  ;;  %v1646_v16 = vmul.f32 %v3754_v47, %v1384_v63  ;;  %v1397_v20 = vld [vmem:[%s6063_s4 + $0x798] sm:$0xff]  ;;  %v1398_v12 = vld [vmem:[%s6063_s4 + $0x7a0] sm:$0xff] }
 0x2ad   : > { %2928 = vst.msk [vmem:[%s6063_s4 + $0x710] sm:$0xff] %vm1070_vm1, %v2672_v13  ;;  %v2673_v30 = vsel %vm2161_vm4, %v1905_v10, %v2417_v9  ;;  %v1647_v19 = vmul.f32 %v3754_v47, %v1385_v7  ;;  %v1648_v21 = vmul.f32 %v3754_v47, %v1386_v8  ;;  %v1649_v40 = vmul.f32 %v3754_v47, %v1387_v31  ;;  %v1396_v10 = vld [vmem:[%s6063_s4 + $0x790] sm:$0xff]  ;;  %v1399_v7 = vld [vmem:[%s6063_s4 + $0x7a8] sm:$0xff] }
 0x2ae   : > { %2929 = vst.msk [vmem:[%s6063_s4 + $0x718] sm:$0xff] %vm1070_vm1, %v2673_v30  ;;  %v2674_v22 = vsel %vm2162_vm5, %v1906_v2, %v2418_v14  ;;  %vm2163_vm6 = vcmp.ge.f32.partialorder %v1907_v45, 0.0  ;;  %v2419_v26 = vmul.f32 0.01, %v1907_v45  ;;  %v1908_v56 = vadd.f32 %v3790_v18, %v1646_v16 }
 0x2af   : > { %2930 = vst.msk [vmem:[%s6063_s4 + $0x720] sm:$0xff] %vm1070_vm1, %v2674_v22  ;;  %v1909_v27 = vadd.f32 %v3790_v18, %v1647_v19  ;;  %v1910_v34 = vadd.f32 %v3790_v18, %v1648_v21  ;;  %v1911_v28 = vadd.f32 %v3790_v18, %v1649_v40  ;;  %v1650_v59 = vmul.f32 %v3754_v47, %v1388_v39  ;;  %v1401_v21 = vld [vmem:[%s6063_s4 + $0x7b8] sm:$0xff] }
 0x2b0   : > { %v2675_v4 = vsel %vm2163_vm6, %v1907_v45, %v2419_v26  ;;  %vm2164_vm7 = vcmp.ge.f32.partialorder %v1908_v56, 0.0  ;;  %v2420_v32 = vmul.f32 0.01, %v1908_v56  ;;  %v1651_v50 = vmul.f32 %v3754_v47, %v1389_v24  ;;  %v1400_v45 = vld [vmem:[%s6063_s4 + $0x7b0] sm:$0xff] }
 0x2b1   : > { %2931 = vst.msk [vmem:[%s6063_s4 + $0x728] sm:$0xff] %vm1070_vm1, %v2675_v4  ;;  %vm2165_vm8 = vcmp.ge.f32.partialorder %v1909_v27, 0.0  ;;  %v2421_v62 = vmul.f32 0.01, %v1909_v27  ;;  %vm2166_vm9 = vcmp.ge.f32.partialorder %v1910_v34, 0.0  ;;  %vm2167_vm10 = vcmp.ge.f32.partialorder %v1911_v28, 0.0 }
 0x2b2   : > { %v2422_v37 = vmul.f32 0.01, %v1910_v34  ;;  %v2676_v38 = vsel %vm2164_vm7, %v1908_v56, %v2420_v32  ;;  %v2423_v17 = vmul.f32 0.01, %v1911_v28  ;;  %v1912_v41 = vadd.f32 %v3790_v18, %v1650_v59  ;;  %v1402_v32 = vld [vmem:[%s6063_s4 + $0x7c0] sm:$0xff] }
 0x2b3   : > { %2932 = vst.msk [vmem:[%s6063_s4 + $0x730] sm:$0xff] %vm1070_vm1, %v2676_v38  ;;  %v2677_v43 = vsel %vm2165_vm8, %v1909_v27, %v2421_v62  ;;  %v1913_v44 = vadd.f32 %v3790_v18, %v1651_v50  ;;  %v1652_v11 = vmul.f32 %v3754_v47, %v1390_v33  ;;  %v1653_v42 = vmul.f32 %v3754_v47, %v1391_v5  ;;  %v1403_v50 = vld [vmem:[%s6063_s4 + $0x7c8] sm:$0xff] }
 0x2b4   : > { %v2678_v29 = vsel %vm2166_vm9, %v1910_v34, %v2422_v37  ;;  %2933 = vst.msk [vmem:[%s6063_s4 + $0x738] sm:$0xff] %vm1070_vm1, %v2677_v43  ;;  %v2679_v23 = vsel %vm2167_vm10, %v1911_v28, %v2423_v17  ;;  %vm2168_vm11 = vcmp.ge.f32.partialorder %v1912_v41, 0.0  ;;  %v2424_v49 = vmul.f32 0.01, %v1912_v41  ;;  %v1404_v17 = vld [vmem:[%s6063_s4 + $0x7d0] sm:$0xff] }
 0x2b5   : > { %2934 = vst.msk [vmem:[%s6063_s4 + $0x740] sm:$0xff] %vm1070_vm1, %v2678_v29  ;;  %2935 = vst.msk [vmem:[%s6063_s4 + $0x748] sm:$0xff] %vm1070_vm1, %v2679_v23  ;;  %vm2169_vm12 = vcmp.ge.f32.partialorder %v1913_v44, 0.0  ;;  %v2425_v51 = vmul.f32 0.01, %v1913_v44  ;;  %v1914_v52 = vadd.f32 %v3790_v18, %v1652_v11  ;;  %v1654_v15 = vmul.f32 %v3754_v47, %v1392_v54  ;;  %v1406_v11 = vld [vmem:[%s6063_s4 + $0x7e0] sm:$0xff] }
 0x2b6   : > { %v2680_v55 = vsel %vm2168_vm11, %v1912_v41, %v2424_v49  ;;  %v1915_v53 = vadd.f32 %v3790_v18, %v1653_v42  ;;  %v1655_v36 = vmul.f32 %v3754_v47, %v1393_v46  ;;  %v1656_v57 = vmul.f32 %v3754_v47, %v1394_v0 }
 0x2b7   : > { %2936 = vst.msk [vmem:[%s6063_s4 + $0x750] sm:$0xff] %vm1070_vm1, %v2680_v55  ;;  %v2681_v48 = vsel %vm2169_vm12, %v1913_v44, %v2425_v51  ;;  %vm2170_vm13 = vcmp.ge.f32.partialorder %v1914_v52, 0.0  ;;  %v2426_v60 = vmul.f32 0.01, %v1914_v52  ;;  %v1916_v61 = vadd.f32 %v3790_v18, %v1654_v15  ;;  %v1405_v44 = vld [vmem:[%s6063_s4 + $0x7d8] sm:$0xff] }
 0x2b8   : > { %2937 = vst.msk [vmem:[%s6063_s4 + $0x758] sm:$0xff] %vm1070_vm1, %v2681_v48  ;;  %vm2171_vm14 = vcmp.ge.f32.partialorder %v1915_v53, 0.0  ;;  %v2427_v6 = vmul.f32 0.01, %v1915_v53  ;;  %v1917_v25 = vadd.f32 %v3790_v18, %v1655_v36  ;;  %v1918_v1 = vadd.f32 %v3790_v18, %v1656_v57  ;;  %v1407_v36 = vld [vmem:[%s6063_s4 + $0x7e8] sm:$0xff] }
 0x2b9   : > { %v2682_v2 = vsel %vm2170_vm13, %v1914_v52, %v2426_v60  ;;  %vm2172_vm15 = vcmp.ge.f32.partialorder %v1916_v61, 0.0  ;;  %v2428_v63 = vmul.f32 0.01, %v1916_v61  ;;  %v1657_v3 = vmul.f32 %v3754_v47, %v1395_v58 }
 0x2ba   : > { %2938 = vst.msk [vmem:[%s6063_s4 + $0x760] sm:$0xff] %vm1070_vm1, %v2682_v2  ;;  %v2683_v8 = vsel %vm2171_vm14, %v1915_v53, %v2427_v6  ;;  %vm2173_vm0 = vcmp.ge.f32.partialorder %v1917_v25, 0.0  ;;  %v2429_v31 = vmul.f32 0.01, %v1917_v25  ;;  %vm2174_vm2 = vcmp.ge.f32.partialorder %v1918_v1, 0.0 }
 0x2bb   : > { %2939 = vst.msk [vmem:[%s6063_s4 + $0x768] sm:$0xff] %vm1070_vm1, %v2683_v8  ;;  %v2684_v35 = vsel %vm2172_vm15, %v1916_v61, %v2428_v63  ;;  %v2430_v9 = vmul.f32 0.01, %v1918_v1  ;;  %v1919_v13 = vadd.f32 %v3790_v18, %v1657_v3  ;;  %v1658_v14 = vmul.f32 %v3754_v47, %v1396_v10  ;;  %v1409_v63 = vld [vmem:[%s6063_s4 + $0x7f8] sm:$0xff] }
 0x2bc   : > { %2940 = vst.msk [vmem:[%s6063_s4 + $0x770] sm:$0xff] %vm1070_vm1, %v2684_v35  ;;  %v2685_v16 = vsel %vm2173_vm0, %v1917_v25, %v2429_v31  ;;  %v1659_v39 = vmul.f32 %v3754_v47, %v1397_v20  ;;  %v1660_v30 = vmul.f32 %v3754_v47, %v1398_v12  ;;  %v1661_v19 = vmul.f32 %v3754_v47, %v1399_v7  ;;  %v1408_v25 = vld [vmem:[%s6063_s4 + $0x7f0] sm:$0xff] }
 0x2bd   : > { %2941 = vst.msk [vmem:[%s6063_s4 + $0x778] sm:$0xff] %vm1070_vm1, %v2685_v16  ;;  %v2686_v40 = vsel %vm2174_vm2, %v1918_v1, %v2430_v9  ;;  %vm2175_vm3 = vcmp.ge.f32.partialorder %v1919_v13, 0.0  ;;  %v2431_v24 = vmul.f32 0.01, %v1919_v13  ;;  %v1920_v22 = vadd.f32 %v3790_v18, %v1658_v14 }
 0x2be   : > { %2942 = vst.msk [vmem:[%s6063_s4 + $0x780] sm:$0xff] %vm1070_vm1, %v2686_v40  ;;  %v1921_v26 = vadd.f32 %v3790_v18, %v1659_v39  ;;  %v1922_v56 = vadd.f32 %v3790_v18, %v1660_v30  ;;  %v1923_v27 = vadd.f32 %v3790_v18, %v1661_v19  ;;  %v1662_v34 = vmul.f32 %v3754_v47, %v1400_v45 }
 0x2bf   : > { %v2687_v28 = vsel %vm2175_vm3, %v1919_v13, %v2431_v24  ;;  %vm2176_vm4 = vcmp.ge.f32.partialorder %v1920_v22, 0.0  ;;  %v2432_v59 = vmul.f32 0.01, %v1920_v22  ;;  %v1663_v4 = vmul.f32 %v3754_v47, %v1401_v21 }
 0x2c0   : > { %2943 = vst.msk [vmem:[%s6063_s4 + $0x788] sm:$0xff] %vm1070_vm1, %v2687_v28  ;;  %vm2177_vm5 = vcmp.ge.f32.partialorder %v1921_v26, 0.0  ;;  %v2433_v33 = vmul.f32 0.01, %v1921_v26  ;;  %vm2178_vm6 = vcmp.ge.f32.partialorder %v1922_v56, 0.0  ;;  %vm2179_vm7 = vcmp.ge.f32.partialorder %v1923_v27, 0.0 }
 0x2c1   : > { %v2434_v5 = vmul.f32 0.01, %v1922_v56  ;;  %v2688_v62 = vsel %vm2176_vm4, %v1920_v22, %v2432_v59  ;;  %v2435_v37 = vmul.f32 0.01, %v1923_v27  ;;  %v1924_v38 = vadd.f32 %v3790_v18, %v1662_v34 }
 0x2c2   : > { %2944 = vst.msk [vmem:[%s6063_s4 + $0x790] sm:$0xff] %vm1070_vm1, %v2688_v62  ;;  %v2689_v41 = vsel %vm2177_vm5, %v1921_v26, %v2433_v33  ;;  %v1925_v43 = vadd.f32 %v3790_v18, %v1663_v4  ;;  %v1664_v29 = vmul.f32 %v3754_v47, %v1402_v32  ;;  %v1665_v23 = vmul.f32 %v3754_v47, %v1403_v50 }
 0x2c3   : > { %v2690_v54 = vsel %vm2178_vm6, %v1922_v56, %v2434_v5  ;;  %2945 = vst.msk [vmem:[%s6063_s4 + $0x798] sm:$0xff] %vm1070_vm1, %v2689_v41  ;;  %v2691_v46 = vsel %vm2179_vm7, %v1923_v27, %v2435_v37  ;;  %vm2180_vm8 = vcmp.ge.f32.partialorder %v1924_v38, 0.0  ;;  %v2436_v0 = vmul.f32 0.01, %v1924_v38 }
 0x2c4   : > { %2946 = vst.msk [vmem:[%s6063_s4 + $0x7a0] sm:$0xff] %vm1070_vm1, %v2690_v54  ;;  %2947 = vst.msk [vmem:[%s6063_s4 + $0x7a8] sm:$0xff] %vm1070_vm1, %v2691_v46  ;;  %vm2181_vm9 = vcmp.ge.f32.partialorder %v1925_v43, 0.0  ;;  %v2437_v49 = vmul.f32 0.01, %v1925_v43  ;;  %v1926_v42 = vadd.f32 %v3790_v18, %v1664_v29  ;;  %v1666_v51 = vmul.f32 %v3754_v47, %v1404_v17 }
 0x2c5   : > { %v2692_v52 = vsel %vm2180_vm8, %v1924_v38, %v2436_v0  ;;  %v1927_v15 = vadd.f32 %v3790_v18, %v1665_v23  ;;  %v1667_v55 = vmul.f32 %v3754_v47, %v1405_v44  ;;  %v1668_v53 = vmul.f32 %v3754_v47, %v1406_v11 }
 0x2c6   : > { %2948 = vst.msk [vmem:[%s6063_s4 + $0x7b0] sm:$0xff] %vm1070_vm1, %v2692_v52  ;;  %v2693_v57 = vsel %vm2181_vm9, %v1925_v43, %v2437_v49  ;;  %vm2182_vm10 = vcmp.ge.f32.partialorder %v1926_v42, 0.0  ;;  %v2438_v58 = vmul.f32 0.01, %v1926_v42  ;;  %v1928_v48 = vadd.f32 %v3790_v18, %v1666_v51 }
 0x2c7   : > { %2949 = vst.msk [vmem:[%s6063_s4 + $0x7b8] sm:$0xff] %vm1070_vm1, %v2693_v57  ;;  %vm2183_vm11 = vcmp.ge.f32.partialorder %v1927_v15, 0.0  ;;  %v2439_v60 = vmul.f32 0.01, %v1927_v15  ;;  %v1929_v61 = vadd.f32 %v3790_v18, %v1667_v55  ;;  %v1930_v6 = vadd.f32 %v3790_v18, %v1668_v53 }
 0x2c8   : > { %v2694_v1 = vsel %vm2182_vm10, %v1926_v42, %v2438_v58  ;;  %vm2184_vm12 = vcmp.ge.f32.partialorder %v1928_v48, 0.0  ;;  %v2440_v10 = vmul.f32 0.01, %v1928_v48  ;;  %v1669_v2 = vmul.f32 %v3754_v47, %v1407_v36 }
 0x2c9   : > { %2950 = vst.msk [vmem:[%s6063_s4 + $0x7c0] sm:$0xff] %vm1070_vm1, %v2694_v1  ;;  %v2695_v3 = vsel %vm2183_vm11, %v1927_v15, %v2439_v60  ;;  %vm2185_vm13 = vcmp.ge.f32.partialorder %v1929_v61, 0.0  ;;  %v2441_v20 = vmul.f32 0.01, %v1929_v61  ;;  %vm2186_vm14 = vcmp.ge.f32.partialorder %v1930_v6, 0.0 }
 0x2ca   : > { %2951 = vst.msk [vmem:[%s6063_s4 + $0x7c8] sm:$0xff] %vm1070_vm1, %v2695_v3  ;;  %v2696_v12 = vsel %vm2184_vm12, %v1928_v48, %v2440_v10  ;;  %v2442_v7 = vmul.f32 0.01, %v1930_v6  ;;  %v1931_v8 = vadd.f32 %v3790_v18, %v1669_v2  ;;  %v1670_v31 = vmul.f32 %v3754_v47, %v1408_v25 }
 0x2cb   : > { %2952 = vst.msk [vmem:[%s6063_s4 + $0x7d0] sm:$0xff] %vm1070_vm1, %v2696_v12  ;;  %v2697_v35 = vsel %vm2185_vm13, %v1929_v61, %v2441_v20  ;;  %v1671_v9 = vmul.f32 %v3754_v47, %v1409_v63 }
 0x2cc   : > { %2953 = vst.msk [vmem:[%s6063_s4 + $0x7d8] sm:$0xff] %vm1070_vm1, %v2697_v35  ;;  %v2698_v13 = vsel %vm2186_vm14, %v1930_v6, %v2442_v7  ;;  %vm2187_vm15 = vcmp.ge.f32.partialorder %v1931_v8, 0.0  ;;  %v2443_v14 = vmul.f32 0.01, %v1931_v8  ;;  %v1932_v45 = vadd.f32 %v3790_v18, %v1670_v31 }
 0x2cd   : > { %2954 = vst.msk [vmem:[%s6063_s4 + $0x7e0] sm:$0xff] %vm1070_vm1, %v2698_v13  ;;  %v1933_v16 = vadd.f32 %v3790_v18, %v1671_v9 }
 0x2ce   : > { %v2699_v39 = vsel %vm2187_vm15, %v1931_v8, %v2443_v14  ;;  %vm2188_vm0 = vcmp.ge.f32.partialorder %v1932_v45, 0.0  ;;  %v2444_v47 = vmul.f32 0.01, %v1932_v45 }
 0x2cf   : > { %2955 = vst.msk [vmem:[%s6063_s4 + $0x7e8] sm:$0xff] %vm1070_vm1, %v2699_v39  ;;  %vm2189_vm2 = vcmp.ge.f32.partialorder %v1933_v16, 0.0  ;;  %v2445_v30 = vmul.f32 0.01, %v1933_v16 }
 0x2d0   : > { %v2700_v19 = vsel %vm2188_vm0, %v1932_v45, %v2444_v47 }
 0x2d1   : > { %2956 = vst.msk [vmem:[%s6063_s4 + $0x7f0] sm:$0xff] %vm1070_vm1, %v2700_v19  ;;  %v2701_v21 = vsel %vm2189_vm2, %v1933_v16, %v2445_v30 }
 0x2d2   : > { %2957 = vst.msk [vmem:[%s6063_s4 + $0x7f8] sm:$0xff] %vm1070_vm1, %v2701_v21 }
 0x2d3 PF: > { %s14_s17 = sadd.s32 1, %s3281_s17   ;;  %s6064_s15 = smov %s3277_s16 }
 0x2d4   : > { %p11_p7 = scmp.ge.s32.totalorder %s14_s17, 6   ;;  %s6065_s16 = smov %s6067_s18 }
 0x2d6   :  { %13 = sbr.rel (!%p11_p7) target bundleno = 2 (0x2), region = 74 }

</bundles_post_ra>
